<compile_context>
chip_gen: v6e
topology: v6e:2x2x1
jax: 0.10.0
libtpu: 0.0.40
codegen_flags: <defaults>
</compile_context>

<pallas_src>
import functools

import jax
import jax.numpy as jnp
from jax.experimental import pallas as pl
from jax.experimental.pallas import tpu as pltpu

F32 = jnp.float32
BF16 = jnp.bfloat16

_VMEM_LIMIT = 32 * 1024 * 1024  # safe on v5e/v6e (128 MiB phys) and v7x (64 MiB phys)


def _round_up(x, m):
    return ((x + m - 1) // m) * m


def _pick_tile(dim, candidates):
    """Pad `dim` to a multiple of 128 and pick the largest candidate tile that
    divides the padded size (128 always does)."""
    p = _round_up(dim, 128)
    for c in candidates:
        if p % c == 0:
            return c, p
    return 128, p


# ---------------------------------------------------------------------------
# Fused tiled matmul:  out = [relu]( A @ B + bias [+ residual] )
# ---------------------------------------------------------------------------
def _mm_kernel(*refs, has_res, relu):
    if has_res:
        a_ref, b_ref, bias_ref, res_ref, o_ref, acc_ref = refs
    else:
        a_ref, b_ref, bias_ref, o_ref, acc_ref = refs
        res_ref = None

    k = pl.program_id(2)

    @pl.when(k == 0)
    def _init():
        acc_ref[...] = jnp.zeros_like(acc_ref)

    acc_ref[...] += jnp.dot(a_ref[...], b_ref[...],
                            preferred_element_type=jnp.float32)

    @pl.when(k == pl.num_programs(2) - 1)
    def _finalize():
        out = acc_ref[...] + bias_ref[...]
        if has_res:
            out = out + res_ref[...]
        if relu:
            out = jnp.maximum(out, 0.0)
        o_ref[...] = out.astype(o_ref.dtype)


def fused_matmul(a, b, bias=None, residual=None, relu=False):
    """[M,K] @ [K,N] with fused bias / residual-add / ReLU epilogue.

    A/B are fed to the MXU in bf16; accumulation, bias, residual and the
    epilogue stay in f32.  Operands are zero-padded to 128-aligned tiles so
    every output block is lane-dense (unmasked stores)."""
    M, K = a.shape
    K2, N = b.shape
    assert K == K2

    TM, Mp = _pick_tile(M, (256, 128))
    TN, Np = _pick_tile(N, (256, 128))
    TK, Kp = _pick_tile(K, (512, 384, 256, 128))

    a_p = jnp.pad(a.astype(BF16), ((0, Mp - M), (0, Kp - K)))
    b_p = jnp.pad(b.astype(BF16), ((0, Kp - K), (0, Np - N)))
    if bias is None:
        bias_p = jnp.zeros((1, Np), F32)
    else:
        bias_p = jnp.pad(bias.astype(F32).reshape(1, N), ((0, 0), (0, Np - N)))

    inputs = [a_p, b_p, bias_p]
    in_specs = [
        pl.BlockSpec((TM, TK), lambda i, j, k: (i, k)),
        pl.BlockSpec((TK, TN), lambda i, j, k: (k, j)),
        pl.BlockSpec((1, TN), lambda i, j, k: (0, j)),
    ]
    has_res = residual is not None
    if has_res:
        r_p = jnp.pad(residual.astype(F32), ((0, Mp - M), (0, Np - N)))
        inputs.append(r_p)
        in_specs.append(pl.BlockSpec((TM, TN), lambda i, j, k: (i, j)))

    out = pl.pallas_call(
        functools.partial(_mm_kernel, has_res=has_res, relu=relu),
        out_shape=jax.ShapeDtypeStruct((Mp, Np), F32),
        grid_spec=pltpu.PrefetchScalarGridSpec(
            num_scalar_prefetch=0,
            grid=(Mp // TM, Np // TN, Kp // TK),
            in_specs=in_specs,
            out_specs=pl.BlockSpec((TM, TN), lambda i, j, k: (i, j)),
            scratch_shapes=[pltpu.VMEM((TM, TN), jnp.float32)],
        ),
        compiler_params=pltpu.CompilerParams(
            dimension_semantics=("parallel", "parallel", "arbitrary"),
            vmem_limit_bytes=_VMEM_LIMIT,
        ),
    )(*inputs)
    return out[:M, :N]


# ---------------------------------------------------------------------------
# Vector quantizer (pre_vq 1x1 conv fused in), tiled over M
# ---------------------------------------------------------------------------
def _vq_kernel(h_ref, pw_ref, pb_ref, emb_ref, embt_ref, e2_ref,
               q_ref, enc_ref, idx_ref, loss_ref, perp_ref,
               sse_ref, cnt_ref, *, m_total, d_dim):
    i = pl.program_id(0)

    @pl.when(i == 0)
    def _init():
        sse_ref[...] = jnp.zeros_like(sse_ref)
        cnt_ref[...] = jnp.zeros_like(cnt_ref)

    # fused pre-VQ 1x1 conv: z = h @ pre_w + pre_b  (f32 so the discrete
    # argmin matches the reference numerics)
    z = jnp.dot(h_ref[...], pw_ref[...],
                preferred_element_type=jnp.float32) + pb_ref[...]       # [TM, D]

    z2 = jnp.sum(z * z, axis=1, keepdims=True)                          # [TM, 1]
    ze = jnp.dot(z, embt_ref[...], preferred_element_type=jnp.float32)  # [TM, K]
    d = z2 + e2_ref[...] - 2.0 * ze

    Kn = d.shape[1]
    dmin = jnp.min(d, axis=1, keepdims=True)
    iota = jax.lax.broadcasted_iota(jnp.int32, d.shape, 1)
    idx = jnp.min(jnp.where(d <= dmin, iota, Kn), axis=1, keepdims=True)  # first argmin
    enc = (iota == idx).astype(jnp.float32)                               # one-hot
    q = jnp.dot(enc, emb_ref[...], preferred_element_type=jnp.float32)    # [TM, D]

    q_ref[...] = q
    enc_ref[...] = enc
    idx_ref[...] = idx

    diff = q - z
    sse_ref[...] += jnp.sum(diff * diff, keepdims=True)
    cnt_ref[...] += jnp.sum(enc, axis=0, keepdims=True)

    @pl.when(i == pl.num_programs(0) - 1)
    def _finalize():
        loss_ref[...] = (0.25 / float(m_total * d_dim)) * sse_ref[...]
        avg = cnt_ref[...] / float(m_total)
        perp_ref[...] = jnp.exp(-jnp.sum(avg * jnp.log(avg + 1e-10),
                                         keepdims=True))


def pallas_vq(h_flat, pre_w_mat, pre_b, emb):
    """h_flat: [M, Ch] pre-quantizer features, pre_w_mat: [Ch, D], emb: [K, D]."""
    M, Ch = h_flat.shape
    D = pre_w_mat.shape[1]
    K = emb.shape[0]

    TM = M
    for t in (512, 256, 128, 64, 32, 16, 8):
        if M % t == 0:
            TM = t
            break

    emb = emb.astype(F32)
    emb_t = emb.T                                   # [D, K]  (no in-kernel transpose)
    e2 = jnp.sum(emb * emb, axis=1).reshape(1, K)   # precomputed outside the kernel
    pre_b2 = pre_b.astype(F32).reshape(1, D)

    kernel = functools.partial(_vq_kernel, m_total=M, d_dim=D)
    return pl.pallas_call(
        kernel,
        out_shape=(
            jax.ShapeDtypeStruct((M, D), F32),        # quantized (flat)
            jax.ShapeDtypeStruct((M, K), F32),        # encodings (one-hot)
            jax.ShapeDtypeStruct((M, 1), jnp.int32),  # encoding indices
            jax.ShapeDtypeStruct((1, 1), F32),        # loss
            jax.ShapeDtypeStruct((1, 1), F32),        # perplexity
        ),
        grid_spec=pltpu.PrefetchScalarGridSpec(
            num_scalar_prefetch=0,
            grid=(M // TM,),
            in_specs=[
                pl.BlockSpec((TM, Ch), lambda i: (i, 0)),
                pl.BlockSpec((Ch, D), lambda i: (0, 0)),
                pl.BlockSpec((1, D), lambda i: (0, 0)),
                pl.BlockSpec((K, D), lambda i: (0, 0)),
                pl.BlockSpec((D, K), lambda i: (0, 0)),
                pl.BlockSpec((1, K), lambda i: (0, 0)),
            ],
            out_specs=(
                pl.BlockSpec((TM, D), lambda i: (i, 0)),
                pl.BlockSpec((TM, K), lambda i: (i, 0)),
                pl.BlockSpec((TM, 1), lambda i: (i, 0)),
                pl.BlockSpec((1, 1), lambda i: (0, 0)),
                pl.BlockSpec((1, 1), lambda i: (0, 0)),
            ),
            scratch_shapes=[pltpu.VMEM((1, 1), jnp.float32),
                            pltpu.VMEM((1, K), jnp.float32)],
        ),
        compiler_params=pltpu.CompilerParams(
            dimension_semantics=("arbitrary",),
            vmem_limit_bytes=_VMEM_LIMIT,
        ),
    )(h_flat.astype(F32), pre_w_mat.astype(F32), pre_b2, emb, emb_t, e2)


# ---------------------------------------------------------------------------
# Convolutions (im2col glue in JAX, fused tiled matmul in Pallas)
# ---------------------------------------------------------------------------
def conv2d(x, w, b, stride, padding, relu=False, residual=None):
    """x: NHWC, w: PyTorch Conv2d layout [O, I, KH, KW]."""
    N, H, W_, C = x.shape
    O, I, KH, KW = w.shape
    assert I == C
    OH = (H + 2 * padding - KH) // stride + 1
    OW = (W_ + 2 * padding - KW) // stride + 1
    if KH == 1 and KW == 1 and stride == 1 and padding == 0:
        a = x.reshape(N * H * W_, C)
    else:
        # TODO(synk): im2col is still materialized in HBM; in-kernel shifted-window
        # reads (grid axis over taps) would cut HBM traffic a further KH*KW x.
        x_pad = jnp.pad(x, ((0, 0), (padding, padding), (padding, padding), (0, 0)))
        cols = []
        for kh in range(KH):
            for kw in range(KW):
                cols.append(x_pad[:, kh:kh + stride * OH:stride,
                                  kw:kw + stride * OW:stride, :])
        patches = jnp.stack(cols, axis=3)                  # [N,OH,OW,T,C]
        patches = jnp.transpose(patches, (0, 1, 2, 4, 3))  # [N,OH,OW,C,T]
        a = patches.reshape(N * OH * OW, C * KH * KW)
    wm = w.reshape(O, I * KH * KW).T                       # [C*KH*KW, O]
    res_flat = None if residual is None else residual.reshape(N * OH * OW, O)
    out = fused_matmul(a, wm, b, residual=res_flat, relu=relu)
    return out.reshape(N, OH, OW, O)


# tap-offset -> kernel index mapping for ConvTranspose2d(kernel=4, stride=2, pad=1)
_KSEL = {0: (3, 1), 1: (2, 0)}
_PSEL = {0: (1, 0), 1: (0, 1)}   # per-phase (pad_before, pad_after)


def conv_transpose2d(x, w, b, relu=False):
    """ConvTranspose2d(kernel=4, stride=2, padding=1) via 4-phase sub-pixel
    decomposition: four 2x2 convs on the undilated input + interleave."""
    N, H, W_, C = x.shape
    I, O, KH, KW = w.shape
    assert I == C and KH == 4 and KW == 4
    phases = {}
    for r in (0, 1):
        for s in (0, 1):
            rows = []
            for dh in range(2):
                cols = []
                for dw in range(2):
                    cols.append(w[:, :, _KSEL[r][dh], _KSEL[s][dw]])  # [I, O]
                rows.append(jnp.stack(cols, axis=-1))                 # [I, O, 2]
            w_eff = jnp.stack(rows, axis=-2)                          # [I, O, 2, 2]
            w_eff = jnp.transpose(w_eff, (1, 0, 2, 3))                # [O, I, 2, 2]
            xp = jnp.pad(x, ((0, 0), _PSEL[r], _PSEL[s], (0, 0)))
            phases[(r, s)] = conv2d(xp, w_eff, b, stride=1, padding=0, relu=relu)
    row0 = jnp.stack([phases[(0, 0)], phases[(0, 1)]], axis=3)        # [N,H,W,2,O]
    row1 = jnp.stack([phases[(1, 0)], phases[(1, 1)]], axis=3)
    full = jnp.stack([row0, row1], axis=2)                            # [N,H,2,W,2,O]
    return full.reshape(N, 2 * H, 2 * W_, O)


def residual_stack(h, layers):
    # `h` must already be post-ReLU (the inplace nn.ReLU(True) at the head of every
    # residual block relus its input before either the skip or the block reads it).
    # The stack's trailing F.relu is fused into the last block's 1x1-conv epilogue,
    # and each intermediate relu is fused into the producing conv's epilogue.
    for (w3, w1) in layers:
        t = conv2d(h, w3, None, stride=1, padding=1, relu=True)      # relu(conv3x3(h))
        h = conv2d(t, w1, None, stride=1, padding=0,
                   residual=h, relu=True)                            # relu(h + conv1x1(t))
    return h


# ---------------------------------------------------------------------------
# Model (Encoder -> pre_vq conv -> VQ -> Decoder)
# ---------------------------------------------------------------------------
def init_params(key):
    def nrm(k, shape, scale=0.05):
        return scale * jax.random.normal(k, shape, F32)

    keys = list(jax.random.split(key, 32))
    it = iter(keys)
    p = {}
    # Encoder
    p["e1_w"] = nrm(next(it), (64, 3, 4, 4));    p["e1_b"] = nrm(next(it), (64,))
    p["e2_w"] = nrm(next(it), (128, 64, 4, 4));  p["e2_b"] = nrm(next(it), (128,))
    p["e3_w"] = nrm(next(it), (128, 128, 3, 3)); p["e3_b"] = nrm(next(it), (128,))
    p["enc_res"] = [(nrm(next(it), (32, 128, 3, 3)), nrm(next(it), (128, 32, 1, 1)))
                    for _ in range(2)]
    # pre_vq
    p["pre_w"] = nrm(next(it), (64, 128, 1, 1)); p["pre_b"] = nrm(next(it), (64,))
    # VQ codebook (embedding.weight.data.normal_())
    p["emb"] = jax.random.normal(next(it), (512, 64), F32)
    # Decoder
    p["d1_w"] = nrm(next(it), (128, 64, 3, 3));  p["d1_b"] = nrm(next(it), (128,))
    p["dec_res"] = [(nrm(next(it), (32, 128, 3, 3)), nrm(next(it), (128, 32, 1, 1)))
                    for _ in range(2)]
    p["t1_w"] = nrm(next(it), (128, 64, 4, 4));  p["t1_b"] = nrm(next(it), (64,))
    p["t2_w"] = nrm(next(it), (64, 3, 4, 4));    p["t2_b"] = nrm(next(it), (3,))
    return p


def model_forward(params, x_nchw):
    x = jnp.transpose(x_nchw, (0, 2, 3, 1)).astype(F32)              # NCHW -> NHWC

    # ---- Encoder ----
    h = conv2d(x, params["e1_w"], params["e1_b"], stride=2, padding=1, relu=True)
    h = conv2d(h, params["e2_w"], params["e2_b"], stride=2, padding=1, relu=True)
    # conv_3 has no ReLU in PyTorch, but the first residual block's inplace ReLU
    # applies relu to its input before anything reads it -> fuse it here.
    h = conv2d(h, params["e3_w"], params["e3_b"], stride=1, padding=1, relu=True)
    h = residual_stack(h, params["enc_res"])

    N, ZH, ZW, Ch = h.shape
    D = params["pre_b"].shape[0]

    # ---- pre-VQ 1x1 conv fused into the VQ kernel ----
    h_flat = h.reshape(N * ZH * ZW, Ch)
    pre_w_mat = params["pre_w"].reshape(D, Ch).T                      # [Ch, D]
    q_flat, encodings, indices, loss, perplexity = pallas_vq(
        h_flat, pre_w_mat, params["pre_b"], params["emb"])
    # straight-through: inputs + (quantized - inputs).detach() == quantized (forward)
    q_nhwc = q_flat.reshape(N, ZH, ZW, D)

    # ---- Decoder ----
    d = conv2d(q_nhwc, params["d1_w"], params["d1_b"], stride=1, padding=1, relu=True)
    d = residual_stack(d, params["dec_res"])
    d = conv_transpose2d(d, params["t1_w"], params["t1_b"], relu=True)
    x_recon_nhwc = conv_transpose2d(d, params["t2_w"], params["t2_b"], relu=False)

    x_recon = jnp.transpose(x_recon_nhwc, (0, 3, 1, 2))               # NHWC -> NCHW
    quantized_nchw = jnp.transpose(q_nhwc, (0, 3, 1, 2))

    return (loss[0, 0], x_recon, perplexity[0, 0], encodings, indices, quantized_nchw)


if __name__ == "__main__":
    key = jax.random.PRNGKey(0)
    pkey, xkey = jax.random.split(key)
    params = init_params(pkey)

    # small image batch: [2, 3, 16, 16] (NCHW, like the PyTorch module expects)
    x = jax.random.normal(xkey, (2, 3, 16, 16), F32)

    fwd = jax.jit(model_forward)
    loss, x_recon, perplexity, encodings, indices, quantized = fwd(params, x)
    jax.block_until_ready((loss, x_recon, perplexity, encodings, indices, quantized))

    assert x_recon.shape == (2, 3, 16, 16)
    assert quantized.shape == (2, 64, 4, 4)
    assert encodings.shape == (32, 512)
    assert indices.shape == (32, 1)
    print("KERNEL_OK")
</pallas_src>

<mosaic_0001>
module attributes {stable_mosaic.version = 11 : i64} {
  func.func @_mm_kernel(%arg0: i32, %arg1: i32, %arg2: i32, %arg3: memref<128x128xbf16, #tpu.memory_space<vmem>>, %arg4: memref<128x128xbf16, #tpu.memory_space<vmem>>, %arg5: memref<1x128xf32, #tpu.memory_space<vmem>>, %arg6: memref<128x128xf32, #tpu.memory_space<vmem>>, %arg7: memref<128x128xf32, #tpu.memory_space<vmem>>) attributes {dimension_semantics = [#tpu.dimension_semantics<parallel>, #tpu.dimension_semantics<parallel>, #tpu.dimension_semantics<arbitrary>], iteration_bounds = array<i64: 1, 1, 1>, scalar_prefetch = 0 : i64, scratch_operands = 1 : i64, tpu.core_type = #tpu.core_type<tc>, window_params = [{transform_indices = @transform_0, window_bounds = array<i64: 128, 128>}, {transform_indices = @transform_1, window_bounds = array<i64: 128, 128>}, {transform_indices = @transform_2, window_bounds = array<i64: 1, 128>}, {transform_indices = @transform_3, window_bounds = array<i64: 128, 128>}]} {
    %c0_i32 = arith.constant 0 : i32
    %0 = arith.cmpi eq, %arg2, %c0_i32 : i32
    %1 = arith.extui %0 : i1 to i32
    %c0_i32_0 = arith.constant 0 : i32
    %2 = arith.cmpi ne, %1, %c0_i32_0 : i32
    scf.if %2 {
      %cst_10 = arith.constant 0.000000e+00 : f32
      %12 = vector.broadcast %cst_10 : f32 to vector<128x128xf32>
      %c0_11 = arith.constant 0 : index
      %c0_12 = arith.constant 0 : index
      %13 = vector.load %arg7[%c0_11, %c0_12] : memref<128x128xf32, #tpu.memory_space<vmem>>, vector<128x128xf32>
      tpu.vector_store %arg7[%c0_11, %c0_12], %12 {strides = array<i32>} : memref<128x128xf32, #tpu.memory_space<vmem>>, vector<128x128xf32>,
    } else {
    }
    %c0 = arith.constant 0 : index
    %c0_1 = arith.constant 0 : index
    %3 = vector.load %arg7[%c0, %c0_1] : memref<128x128xf32, #tpu.memory_space<vmem>>, vector<128x128xf32>
    %c0_2 = arith.constant 0 : index
    %c0_3 = arith.constant 0 : index
    %4 = vector.load %arg3[%c0_2, %c0_3] : memref<128x128xbf16, #tpu.memory_space<vmem>>, vector<128x128xbf16>
    %c0_4 = arith.constant 0 : index
    %c0_5 = arith.constant 0 : index
    %5 = vector.load %arg4[%c0_4, %c0_5] : memref<128x128xbf16, #tpu.memory_space<vmem>>, vector<128x128xbf16>
    %cst = arith.constant dense<0.000000e+00> : vector<128x128xf32>
    %6 = tpu.matmul %4, %5, %cst {dimension_numbers = #tpu.dot_dimension_numbers<[1], [0], [0], [1], [0, 0, 1, 1], [], []>} : vector<128x128xbf16>, vector<128x128xbf16>, vector<128x128xf32> -> vector<128x128xf32>
    %7 = arith.addf %3, %6 : vector<128x128xf32>
    %c0_6 = arith.constant 0 : index
    %c0_7 = arith.constant 0 : index
    %8 = vector.load %arg7[%c0_6, %c0_7] : memref<128x128xf32, #tpu.memory_space<vmem>>, vector<128x128xf32>
    tpu.vector_store %arg7[%c0_6, %c0_7], %7 {strides = array<i32>} : memref<128x128xf32, #tpu.memory_space<vmem>>, vector<128x128xf32>,
    %c0_i32_8 = arith.constant 0 : i32
    %9 = arith.cmpi eq, %arg2, %c0_i32_8 : i32
    %10 = arith.extui %9 : i1 to i32
    %c0_i32_9 = arith.constant 0 : i32
    %11 = arith.cmpi ne, %10, %c0_i32_9 : i32
    scf.if %11 {
      %c0_10 = arith.constant 0 : index
      %c0_11 = arith.constant 0 : index
      %12 = vector.load %arg7[%c0_10, %c0_11] : memref<128x128xf32, #tpu.memory_space<vmem>>, vector<128x128xf32>
      %c0_12 = arith.constant 0 : index
      %c0_13 = arith.constant 0 : index
      %13 = vector.load %arg5[%c0_12, %c0_13] : memref<1x128xf32, #tpu.memory_space<vmem>>, vector<1x128xf32>
      %14 = vector.broadcast %13 : vector<1x128xf32> to vector<128x128xf32>
      %15 = arith.addf %12, %14 : vector<128x128xf32>
      %cst_14 = arith.constant 0.000000e+00 : f32
      %16 = vector.broadcast %cst_14 : f32 to vector<128x128xf32>
      %17 = arith.maximumf %15, %16 : vector<128x128xf32>
      %c0_15 = arith.constant 0 : index
      %c0_16 = arith.constant 0 : index
      %18 = vector.load %arg6[%c0_15, %c0_16] : memref<128x128xf32, #tpu.memory_space<vmem>>, vector<128x128xf32>
      tpu.vector_store %arg6[%c0_15, %c0_16], %17 {strides = array<i32>} : memref<128x128xf32, #tpu.memory_space<vmem>>, vector<128x128xf32>,
    } else {
    }
    return
  }
  func.func @transform_0(%arg0: i32, %arg1: i32, %arg2: i32) -> (i32, i32) {
    %c0_i32 = arith.constant 0 : i32
    return %arg0, %arg2 : i32, i32
  }
  func.func @transform_1(%arg0: i32, %arg1: i32, %arg2: i32) -> (i32, i32) {
    %c0_i32 = arith.constant 0 : i32
    return %arg2, %arg1 : i32, i32
  }
  func.func @transform_2(%arg0: i32, %arg1: i32, %arg2: i32) -> (i32, i32) {
    %c0_i32 = arith.constant 0 : i32
    %c0_i32_0 = arith.constant 0 : i32
    return %c0_i32, %arg1 : i32, i32
  }
  func.func @transform_3(%arg0: i32, %arg1: i32, %arg2: i32) -> (i32, i32) {
    %c0_i32 = arith.constant 0 : i32
    return %arg0, %arg1 : i32, i32
  }
}

module attributes {stable_mosaic.version = 11 : i64} {
  func.func @_mm_kernel(%arg0: i32, %arg1: i32, %arg2: i32, %arg3: memref<128x512xbf16, #tpu.memory_space<vmem>>, %arg4: memref<512x128xbf16, #tpu.memory_space<vmem>>, %arg5: memref<1x128xf32, #tpu.memory_space<vmem>>, %arg6: memref<128x128xf32, #tpu.memory_space<vmem>>, %arg7: memref<128x128xf32, #tpu.memory_space<vmem>>) attributes {dimension_semantics = [#tpu.dimension_semantics<parallel>, #tpu.dimension_semantics<parallel>, #tpu.dimension_semantics<arbitrary>], iteration_bounds = array<i64: 1, 1, 2>, scalar_prefetch = 0 : i64, scratch_operands = 1 : i64, tpu.core_type = #tpu.core_type<tc>, window_params = [{transform_indices = @transform_0, window_bounds = array<i64: 128, 512>}, {transform_indices = @transform_1, window_bounds = array<i64: 512, 128>}, {transform_indices = @transform_2, window_bounds = array<i64: 1, 128>}, {transform_indices = @transform_3, window_bounds = array<i64: 128, 128>}]} {
    %c0_i32 = arith.constant 0 : i32
    %0 = arith.cmpi eq, %arg2, %c0_i32 : i32
    %1 = arith.extui %0 : i1 to i32
    %c0_i32_0 = arith.constant 0 : i32
    %2 = arith.cmpi ne, %1, %c0_i32_0 : i32
    scf.if %2 {
      %cst_9 = arith.constant 0.000000e+00 : f32
      %12 = vector.broadcast %cst_9 : f32 to vector<128x128xf32>
      %c0_10 = arith.constant 0 : index
      %c0_11 = arith.constant 0 : index
      %13 = vector.load %arg7[%c0_10, %c0_11] : memref<128x128xf32, #tpu.memory_space<vmem>>, vector<128x128xf32>
      tpu.vector_store %arg7[%c0_10, %c0_11], %12 {strides = array<i32>} : memref<128x128xf32, #tpu.memory_space<vmem>>, vector<128x128xf32>,
    } else {
    }
    %c0 = arith.constant 0 : index
    %c0_1 = arith.constant 0 : index
    %3 = vector.load %arg7[%c0, %c0_1] : memref<128x128xf32, #tpu.memory_space<vmem>>, vector<128x128xf32>
    %c0_2 = arith.constant 0 : index
    %c0_3 = arith.constant 0 : index
    %4 = vector.load %arg3[%c0_2, %c0_3] : memref<128x512xbf16, #tpu.memory_space<vmem>>, vector<128x512xbf16>
    %c0_4 = arith.constant 0 : index
    %c0_5 = arith.constant 0 : index
    %5 = vector.load %arg4[%c0_4, %c0_5] : memref<512x128xbf16, #tpu.memory_space<vmem>>, vector<512x128xbf16>
    %cst = arith.constant dense<0.000000e+00> : vector<128x128xf32>
    %6 = tpu.matmul %4, %5, %cst {dimension_numbers = #tpu.dot_dimension_numbers<[1], [0], [0], [1], [0, 0, 1, 1], [], []>} : vector<128x512xbf16>, vector<512x128xbf16>, vector<128x128xf32> -> vector<128x128xf32>
    %7 = arith.addf %3, %6 : vector<128x128xf32>
    %c0_6 = arith.constant 0 : index
    %c0_7 = arith.constant 0 : index
    %8 = vector.load %arg7[%c0_6, %c0_7] : memref<128x128xf32, #tpu.memory_space<vmem>>, vector<128x128xf32>
    tpu.vector_store %arg7[%c0_6, %c0_7], %7 {strides = array<i32>} : memref<128x128xf32, #tpu.memory_space<vmem>>, vector<128x128xf32>,
    %c1_i32 = arith.constant 1 : i32
    %9 = arith.cmpi eq, %arg2, %c1_i32 : i32
    %10 = arith.extui %9 : i1 to i32
    %c0_i32_8 = arith.constant 0 : i32
    %11 = arith.cmpi ne, %10, %c0_i32_8 : i32
    scf.if %11 {
      %c0_9 = arith.constant 0 : index
      %c0_10 = arith.constant 0 : index
      %12 = vector.load %arg7[%c0_9, %c0_10] : memref<128x128xf32, #tpu.memory_space<vmem>>, vector<128x128xf32>
      %c0_11 = arith.constant 0 : index
      %c0_12 = arith.constant 0 : index
      %13 = vector.load %arg5[%c0_11, %c0_12] : memref<1x128xf32, #tpu.memory_space<vmem>>, vector<1x128xf32>
      %14 = vector.broadcast %13 : vector<1x128xf32> to vector<128x128xf32>
      %15 = arith.addf %12, %14 : vector<128x128xf32>
      %cst_13 = arith.constant 0.000000e+00 : f32
      %16 = vector.broadcast %cst_13 : f32 to vector<128x128xf32>
      %17 = arith.maximumf %15, %16 : vector<128x128xf32>
      %c0_14 = arith.constant 0 : index
      %c0_15 = arith.constant 0 : index
      %18 = vector.load %arg6[%c0_14, %c0_15] : memref<128x128xf32, #tpu.memory_space<vmem>>, vector<128x128xf32>
      tpu.vector_store %arg6[%c0_14, %c0_15], %17 {strides = array<i32>} : memref<128x128xf32, #tpu.memory_space<vmem>>, vector<128x128xf32>,
    } else {
    }
    return
  }
  func.func @transform_0(%arg0: i32, %arg1: i32, %arg2: i32) -> (i32, i32) {
    %c0_i32 = arith.constant 0 : i32
    return %arg0, %arg2 : i32, i32
  }
  func.func @transform_1(%arg0: i32, %arg1: i32, %arg2: i32) -> (i32, i32) {
    %c0_i32 = arith.constant 0 : i32
    return %arg2, %arg1 : i32, i32
  }
  func.func @transform_2(%arg0: i32, %arg1: i32, %arg2: i32) -> (i32, i32) {
    %c0_i32 = arith.constant 0 : i32
    %c0_i32_0 = arith.constant 0 : i32
    return %c0_i32, %arg1 : i32, i32
  }
  func.func @transform_3(%arg0: i32, %arg1: i32, %arg2: i32) -> (i32, i32) {
    %c0_i32 = arith.constant 0 : i32
    return %arg0, %arg1 : i32, i32
  }
}

module attributes {stable_mosaic.version = 11 : i64} {
  func.func @_mm_kernel(%arg0: i32, %arg1: i32, %arg2: i32, %arg3: memref<128x384xbf16, #tpu.memory_space<vmem>>, %arg4: memref<384x128xbf16, #tpu.memory_space<vmem>>, %arg5: memref<1x128xf32, #tpu.memory_space<vmem>>, %arg6: memref<128x128xf32, #tpu.memory_space<vmem>>, %arg7: memref<128x128xf32, #tpu.memory_space<vmem>>) attributes {dimension_semantics = [#tpu.dimension_semantics<parallel>, #tpu.dimension_semantics<parallel>, #tpu.dimension_semantics<arbitrary>], iteration_bounds = array<i64: 1, 1, 3>, scalar_prefetch = 0 : i64, scratch_operands = 1 : i64, tpu.core_type = #tpu.core_type<tc>, window_params = [{transform_indices = @transform_0, window_bounds = array<i64: 128, 384>}, {transform_indices = @transform_1, window_bounds = array<i64: 384, 128>}, {transform_indices = @transform_2, window_bounds = array<i64: 1, 128>}, {transform_indices = @transform_3, window_bounds = array<i64: 128, 128>}]} {
    %c0_i32 = arith.constant 0 : i32
    %0 = arith.cmpi eq, %arg2, %c0_i32 : i32
    %1 = arith.extui %0 : i1 to i32
    %c0_i32_0 = arith.constant 0 : i32
    %2 = arith.cmpi ne, %1, %c0_i32_0 : i32
    scf.if %2 {
      %cst_9 = arith.constant 0.000000e+00 : f32
      %12 = vector.broadcast %cst_9 : f32 to vector<128x128xf32>
      %c0_10 = arith.constant 0 : index
      %c0_11 = arith.constant 0 : index
      %13 = vector.load %arg7[%c0_10, %c0_11] : memref<128x128xf32, #tpu.memory_space<vmem>>, vector<128x128xf32>
      tpu.vector_store %arg7[%c0_10, %c0_11], %12 {strides = array<i32>} : memref<128x128xf32, #tpu.memory_space<vmem>>, vector<128x128xf32>,
    } else {
    }
    %c0 = arith.constant 0 : index
    %c0_1 = arith.constant 0 : index
    %3 = vector.load %arg7[%c0, %c0_1] : memref<128x128xf32, #tpu.memory_space<vmem>>, vector<128x128xf32>
    %c0_2 = arith.constant 0 : index
    %c0_3 = arith.constant 0 : index
    %4 = vector.load %arg3[%c0_2, %c0_3] : memref<128x384xbf16, #tpu.memory_space<vmem>>, vector<128x384xbf16>
    %c0_4 = arith.constant 0 : index
    %c0_5 = arith.constant 0 : index
    %5 = vector.load %arg4[%c0_4, %c0_5] : memref<384x128xbf16, #tpu.memory_space<vmem>>, vector<384x128xbf16>
    %cst = arith.constant dense<0.000000e+00> : vector<128x128xf32>
    %6 = tpu.matmul %4, %5, %cst {dimension_numbers = #tpu.dot_dimension_numbers<[1], [0], [0], [1], [0, 0, 1, 1], [], []>} : vector<128x384xbf16>, vector<384x128xbf16>, vector<128x128xf32> -> vector<128x128xf32>
    %7 = arith.addf %3, %6 : vector<128x128xf32>
    %c0_6 = arith.constant 0 : index
    %c0_7 = arith.constant 0 : index
    %8 = vector.load %arg7[%c0_6, %c0_7] : memref<128x128xf32, #tpu.memory_space<vmem>>, vector<128x128xf32>
    tpu.vector_store %arg7[%c0_6, %c0_7], %7 {strides = array<i32>} : memref<128x128xf32, #tpu.memory_space<vmem>>, vector<128x128xf32>,
    %c2_i32 = arith.constant 2 : i32
    %9 = arith.cmpi eq, %arg2, %c2_i32 : i32
    %10 = arith.extui %9 : i1 to i32
    %c0_i32_8 = arith.constant 0 : i32
    %11 = arith.cmpi ne, %10, %c0_i32_8 : i32
    scf.if %11 {
      %c0_9 = arith.constant 0 : index
      %c0_10 = arith.constant 0 : index
      %12 = vector.load %arg7[%c0_9, %c0_10] : memref<128x128xf32, #tpu.memory_space<vmem>>, vector<128x128xf32>
      %c0_11 = arith.constant 0 : index
      %c0_12 = arith.constant 0 : index
      %13 = vector.load %arg5[%c0_11, %c0_12] : memref<1x128xf32, #tpu.memory_space<vmem>>, vector<1x128xf32>
      %14 = vector.broadcast %13 : vector<1x128xf32> to vector<128x128xf32>
      %15 = arith.addf %12, %14 : vector<128x128xf32>
      %cst_13 = arith.constant 0.000000e+00 : f32
      %16 = vector.broadcast %cst_13 : f32 to vector<128x128xf32>
      %17 = arith.maximumf %15, %16 : vector<128x128xf32>
      %c0_14 = arith.constant 0 : index
      %c0_15 = arith.constant 0 : index
      %18 = vector.load %arg6[%c0_14, %c0_15] : memref<128x128xf32, #tpu.memory_space<vmem>>, vector<128x128xf32>
      tpu.vector_store %arg6[%c0_14, %c0_15], %17 {strides = array<i32>} : memref<128x128xf32, #tpu.memory_space<vmem>>, vector<128x128xf32>,
    } else {
    }
    return
  }
  func.func @transform_0(%arg0: i32, %arg1: i32, %arg2: i32) -> (i32, i32) {
    %c0_i32 = arith.constant 0 : i32
    return %arg0, %arg2 : i32, i32
  }
  func.func @transform_1(%arg0: i32, %arg1: i32, %arg2: i32) -> (i32, i32) {
    %c0_i32 = arith.constant 0 : i32
    return %arg2, %arg1 : i32, i32
  }
  func.func @transform_2(%arg0: i32, %arg1: i32, %arg2: i32) -> (i32, i32) {
    %c0_i32 = arith.constant 0 : i32
    %c0_i32_0 = arith.constant 0 : i32
    return %c0_i32, %arg1 : i32, i32
  }
  func.func @transform_3(%arg0: i32, %arg1: i32, %arg2: i32) -> (i32, i32) {
    %c0_i32 = arith.constant 0 : i32
    return %arg0, %arg1 : i32, i32
  }
}

module attributes {stable_mosaic.version = 11 : i64} {
  func.func @_mm_kernel(%arg0: i32, %arg1: i32, %arg2: i32, %arg3: memref<128x128xbf16, #tpu.memory_space<vmem>>, %arg4: memref<128x128xbf16, #tpu.memory_space<vmem>>, %arg5: memref<1x128xf32, #tpu.memory_space<vmem>>, %arg6: memref<128x128xf32, #tpu.memory_space<vmem>>, %arg7: memref<128x128xf32, #tpu.memory_space<vmem>>, %arg8: memref<128x128xf32, #tpu.memory_space<vmem>>) attributes {dimension_semantics = [#tpu.dimension_semantics<parallel>, #tpu.dimension_semantics<parallel>, #tpu.dimension_semantics<arbitrary>], iteration_bounds = array<i64: 1, 1, 1>, scalar_prefetch = 0 : i64, scratch_operands = 1 : i64, tpu.core_type = #tpu.core_type<tc>, window_params = [{transform_indices = @transform_0, window_bounds = array<i64: 128, 128>}, {transform_indices = @transform_1, window_bounds = array<i64: 128, 128>}, {transform_indices = @transform_2, window_bounds = array<i64: 1, 128>}, {transform_indices = @transform_3, window_bounds = array<i64: 128, 128>}, {transform_indices = @transform_4, window_bounds = array<i64: 128, 128>}]} {
    %c0_i32 = arith.constant 0 : i32
    %0 = arith.cmpi eq, %arg2, %c0_i32 : i32
    %1 = arith.extui %0 : i1 to i32
    %c0_i32_0 = arith.constant 0 : i32
    %2 = arith.cmpi ne, %1, %c0_i32_0 : i32
    scf.if %2 {
      %cst_10 = arith.constant 0.000000e+00 : f32
      %12 = vector.broadcast %cst_10 : f32 to vector<128x128xf32>
      %c0_11 = arith.constant 0 : index
      %c0_12 = arith.constant 0 : index
      %13 = vector.load %arg8[%c0_11, %c0_12] : memref<128x128xf32, #tpu.memory_space<vmem>>, vector<128x128xf32>
      tpu.vector_store %arg8[%c0_11, %c0_12], %12 {strides = array<i32>} : memref<128x128xf32, #tpu.memory_space<vmem>>, vector<128x128xf32>,
    } else {
    }
    %c0 = arith.constant 0 : index
    %c0_1 = arith.constant 0 : index
    %3 = vector.load %arg8[%c0, %c0_1] : memref<128x128xf32, #tpu.memory_space<vmem>>, vector<128x128xf32>
    %c0_2 = arith.constant 0 : index
    %c0_3 = arith.constant 0 : index
    %4 = vector.load %arg3[%c0_2, %c0_3] : memref<128x128xbf16, #tpu.memory_space<vmem>>, vector<128x128xbf16>
    %c0_4 = arith.constant 0 : index
    %c0_5 = arith.constant 0 : index
    %5 = vector.load %arg4[%c0_4, %c0_5] : memref<128x128xbf16, #tpu.memory_space<vmem>>, vector<128x128xbf16>
    %cst = arith.constant dense<0.000000e+00> : vector<128x128xf32>
    %6 = tpu.matmul %4, %5, %cst {dimension_numbers = #tpu.dot_dimension_numbers<[1], [0], [0], [1], [0, 0, 1, 1], [], []>} : vector<128x128xbf16>, vector<128x128xbf16>, vector<128x128xf32> -> vector<128x128xf32>
    %7 = arith.addf %3, %6 : vector<128x128xf32>
    %c0_6 = arith.constant 0 : index
    %c0_7 = arith.constant 0 : index
    %8 = vector.load %arg8[%c0_6, %c0_7] : memref<128x128xf32, #tpu.memory_space<vmem>>, vector<128x128xf32>
    tpu.vector_store %arg8[%c0_6, %c0_7], %7 {strides = array<i32>} : memref<128x128xf32, #tpu.memory_space<vmem>>, vector<128x128xf32>,
    %c0_i32_8 = arith.constant 0 : i32
    %9 = arith.cmpi eq, %arg2, %c0_i32_8 : i32
    %10 = arith.extui %9 : i1 to i32
    %c0_i32_9 = arith.constant 0 : i32
    %11 = arith.cmpi ne, %10, %c0_i32_9 : i32
    scf.if %11 {
      %c0_10 = arith.constant 0 : index
      %c0_11 = arith.constant 0 : index
      %12 = vector.load %arg8[%c0_10, %c0_11] : memref<128x128xf32, #tpu.memory_space<vmem>>, vector<128x128xf32>
      %c0_12 = arith.constant 0 : index
      %c0_13 = arith.constant 0 : index
      %13 = vector.load %arg5[%c0_12, %c0_13] : memref<1x128xf32, #tpu.memory_space<vmem>>, vector<1x128xf32>
      %14 = vector.broadcast %13 : vector<1x128xf32> to vector<128x128xf32>
      %15 = arith.addf %12, %14 : vector<128x128xf32>
      %c0_14 = arith.constant 0 : index
      %c0_15 = arith.constant 0 : index
      %16 = vector.load %arg6[%c0_14, %c0_15] : memref<128x128xf32, #tpu.memory_space<vmem>>, vector<128x128xf32>
      %17 = arith.addf %15, %16 : vector<128x128xf32>
      %cst_16 = arith.constant 0.000000e+00 : f32
      %18 = vector.broadcast %cst_16 : f32 to vector<128x128xf32>
      %19 = arith.maximumf %17, %18 : vector<128x128xf32>
      %c0_17 = arith.constant 0 : index
      %c0_18 = arith.constant 0 : index
      %20 = vector.load %arg7[%c0_17, %c0_18] : memref<128x128xf32, #tpu.memory_space<vmem>>, vector<128x128xf32>
      tpu.vector_store %arg7[%c0_17, %c0_18], %19 {strides = array<i32>} : memref<128x128xf32, #tpu.memory_space<vmem>>, vector<128x128xf32>,
    } else {
    }
    return
  }
  func.func @transform_0(%arg0: i32, %arg1: i32, %arg2: i32) -> (i32, i32) {
    %c0_i32 = arith.constant 0 : i32
    return %arg0, %arg2 : i32, i32
  }
  func.func @transform_1(%arg0: i32, %arg1: i32, %arg2: i32) -> (i32, i32) {
    %c0_i32 = arith.constant 0 : i32
    return %arg2, %arg1 : i32, i32
  }
  func.func @transform_2(%arg0: i32, %arg1: i32, %arg2: i32) -> (i32, i32) {
    %c0_i32 = arith.constant 0 : i32
    %c0_i32_0 = arith.constant 0 : i32
    return %c0_i32, %arg1 : i32, i32
  }
  func.func @transform_3(%arg0: i32, %arg1: i32, %arg2: i32) -> (i32, i32) {
    %c0_i32 = arith.constant 0 : i32
    return %arg0, %arg1 : i32, i32
  }
  func.func @transform_4(%arg0: i32, %arg1: i32, %arg2: i32) -> (i32, i32) {
    %c0_i32 = arith.constant 0 : i32
    return %arg0, %arg1 : i32, i32
  }
}

module attributes {stable_mosaic.version = 11 : i64} {
  func.func @_vq_kernel(%arg0: i32, %arg1: memref<32x128xf32, #tpu.memory_space<vmem>>, %arg2: memref<128x64xf32, #tpu.memory_space<vmem>>, %arg3: memref<1x64xf32, #tpu.memory_space<vmem>>, %arg4: memref<512x64xf32, #tpu.memory_space<vmem>>, %arg5: memref<64x512xf32, #tpu.memory_space<vmem>>, %arg6: memref<1x512xf32, #tpu.memory_space<vmem>>, %arg7: memref<32x64xf32, #tpu.memory_space<vmem>>, %arg8: memref<32x512xf32, #tpu.memory_space<vmem>>, %arg9: memref<32x1xi32, #tpu.memory_space<vmem>>, %arg10: memref<1x1xf32, #tpu.memory_space<vmem>>, %arg11: memref<1x1xf32, #tpu.memory_space<vmem>>, %arg12: memref<1x1xf32, #tpu.memory_space<vmem>>, %arg13: memref<1x512xf32, #tpu.memory_space<vmem>>) attributes {dimension_semantics = [#tpu.dimension_semantics<arbitrary>], iteration_bounds = array<i64: 1>, scalar_prefetch = 0 : i64, scratch_operands = 2 : i64, tpu.core_type = #tpu.core_type<tc>, window_params = [{transform_indices = @transform_0, window_bounds = array<i64: 32, 128>}, {pipeline_mode = #tpu.pipeline_mode<synchronous>, transform_indices = @transform_1, window_bounds = array<i64: 128, 64>}, {pipeline_mode = #tpu.pipeline_mode<synchronous>, transform_indices = @transform_2, window_bounds = array<i64: 1, 64>}, {pipeline_mode = #tpu.pipeline_mode<synchronous>, transform_indices = @transform_3, window_bounds = array<i64: 512, 64>}, {pipeline_mode = #tpu.pipeline_mode<synchronous>, transform_indices = @transform_4, window_bounds = array<i64: 64, 512>}, {pipeline_mode = #tpu.pipeline_mode<synchronous>, transform_indices = @transform_5, window_bounds = array<i64: 1, 512>}, {transform_indices = @transform_6, window_bounds = array<i64: 32, 64>}, {transform_indices = @transform_7, window_bounds = array<i64: 32, 512>}, {transform_indices = @transform_8, window_bounds = array<i64: 32, 1>}, {pipeline_mode = #tpu.pipeline_mode<synchronous>, transform_indices = @transform_9, window_bounds = array<i64: 1, 1>}, {pipeline_mode = #tpu.pipeline_mode<synchronous>, transform_indices = @transform_10, window_bounds = array<i64: 1, 1>}]} {
    %c0_i32 = arith.constant 0 : i32
    %0 = arith.cmpi eq, %arg0, %c0_i32 : i32
    %1 = arith.extui %0 : i1 to i32
    %c0_i32_0 = arith.constant 0 : i32
    %2 = arith.cmpi ne, %1, %c0_i32_0 : i32
    scf.if %2 {
      %cst_36 = arith.constant 0.000000e+00 : f32
      %57 = vector.broadcast %cst_36 : f32 to vector<1x1xf32>
      %c0_37 = arith.constant 0 : index
      %c0_38 = arith.constant 0 : index
      %58 = vector.load %arg12[%c0_37, %c0_38] : memref<1x1xf32, #tpu.memory_space<vmem>>, vector<1x1xf32>
      tpu.vector_store %arg12[%c0_37, %c0_38], %57 {strides = array<i32>} : memref<1x1xf32, #tpu.memory_space<vmem>>, vector<1x1xf32>,
      %cst_39 = arith.constant 0.000000e+00 : f32
      %59 = vector.broadcast %cst_39 : f32 to vector<1x512xf32>
      %c0_40 = arith.constant 0 : index
      %c0_41 = arith.constant 0 : index
      %60 = vector.load %arg13[%c0_40, %c0_41] : memref<1x512xf32, #tpu.memory_space<vmem>>, vector<1x512xf32>
      tpu.vector_store %arg13[%c0_40, %c0_41], %59 {strides = array<i32>} : memref<1x512xf32, #tpu.memory_space<vmem>>, vector<1x512xf32>,
    } else {
    }
    %c0 = arith.constant 0 : index
    %c0_1 = arith.constant 0 : index
    %3 = vector.load %arg1[%c0, %c0_1] : memref<32x128xf32, #tpu.memory_space<vmem>>, vector<32x128xf32>
    %c0_2 = arith.constant 0 : index
    %c0_3 = arith.constant 0 : index
    %4 = vector.load %arg2[%c0_2, %c0_3] : memref<128x64xf32, #tpu.memory_space<vmem>>, vector<128x64xf32>
    %cst = arith.constant dense<0.000000e+00> : vector<32x64xf32>
    %5 = tpu.matmul %3, %4, %cst {dimension_numbers = #tpu.dot_dimension_numbers<[1], [0], [0], [1], [0, 0, 1, 1], [], []>} : vector<32x128xf32>, vector<128x64xf32>, vector<32x64xf32> -> vector<32x64xf32>
    %c0_4 = arith.constant 0 : index
    %c0_5 = arith.constant 0 : index
    %6 = vector.load %arg3[%c0_4, %c0_5] : memref<1x64xf32, #tpu.memory_space<vmem>>, vector<1x64xf32>
    %7 = vector.broadcast %6 : vector<1x64xf32> to vector<32x64xf32>
    %8 = arith.addf %5, %7 : vector<32x64xf32>
    %9 = arith.mulf %8, %8 : vector<32x64xf32>
    %cst_6 = arith.constant dense<0.000000e+00> : vector<32xf32>
    %10 = vector.multi_reduction <add>, %9, %cst_6 [1] : vector<32x64xf32> to vector<32xf32>
    %11 = vector.shape_cast %10 : vector<32xf32> to vector<32x1xf32>
    %c0_7 = arith.constant 0 : index
    %c0_8 = arith.constant 0 : index
    %12 = vector.load %arg5[%c0_7, %c0_8] : memref<64x512xf32, #tpu.memory_space<vmem>>, vector<64x512xf32>
    %cst_9 = arith.constant dense<0.000000e+00> : vector<32x512xf32>
    %13 = tpu.matmul %8, %12, %cst_9 {dimension_numbers = #tpu.dot_dimension_numbers<[1], [0], [0], [1], [0, 0, 1, 1], [], []>} : vector<32x64xf32>, vector<64x512xf32>, vector<32x512xf32> -> vector<32x512xf32>
    %c0_10 = arith.constant 0 : index
    %c0_11 = arith.constant 0 : index
    %14 = vector.load %arg6[%c0_10, %c0_11] : memref<1x512xf32, #tpu.memory_space<vmem>>, vector<1x512xf32>
    %15 = vector.broadcast %11 : vector<32x1xf32> to vector<32x512xf32>
    %16 = vector.broadcast %14 : vector<1x512xf32> to vector<32x512xf32>
    %17 = arith.addf %15, %16 : vector<32x512xf32>
    %cst_12 = arith.constant 2.000000e+00 : f32
    %18 = vector.broadcast %cst_12 : f32 to vector<32x512xf32>
    %19 = arith.mulf %18, %13 : vector<32x512xf32>
    %20 = arith.subf %17, %19 : vector<32x512xf32>
    %cst_13 = arith.constant dense<0x7F800000> : vector<32xf32>
    %21 = vector.multi_reduction <minimumf>, %20, %cst_13 [1] : vector<32x512xf32> to vector<32xf32>
    %22 = vector.shape_cast %21 : vector<32xf32> to vector<32x1xf32>
    %23 = tpu.iota {dimensions = array<i32: 1>} : vector<32x512xi32>
    %24 = vector.broadcast %22 : vector<32x1xf32> to vector<32x512xf32>
    %25 = arith.cmpf ole, %20, %24 : vector<32x512xf32>
    %c512_i32 = arith.constant 512 : i32
    %26 = vector.broadcast %c512_i32 : i32 to vector<32x512xi32>
    %27 = arith.select %25, %23, %26 : vector<32x512xi1>, vector<32x512xi32>
    %cst_14 = arith.constant dense<2147483647> : vector<32xi32>
    %28 = vector.multi_reduction <minsi>, %27, %cst_14 [1] : vector<32x512xi32> to vector<32xi32>
    %29 = vector.shape_cast %28 : vector<32xi32> to vector<32x1xi32>
    %30 = vector.broadcast %29 : vector<32x1xi32> to vector<32x512xi32>
    %31 = arith.cmpi eq, %23, %30 : vector<32x512xi32>
    %32 = arith.extui %31 : vector<32x512xi1> to vector<32x512xi32>
    %33 = arith.sitofp %32 : vector<32x512xi32> to vector<32x512xf32>
    %c0_15 = arith.constant 0 : index
    %c0_16 = arith.constant 0 : index
    %34 = vector.load %arg4[%c0_15, %c0_16] : memref<512x64xf32, #tpu.memory_space<vmem>>, vector<512x64xf32>
    %cst_17 = arith.constant dense<0.000000e+00> : vector<32x64xf32>
    %35 = tpu.matmul %33, %34, %cst_17 {dimension_numbers = #tpu.dot_dimension_numbers<[1], [0], [0], [1], [0, 0, 1, 1], [], []>} : vector<32x512xf32>, vector<512x64xf32>, vector<32x64xf32> -> vector<32x64xf32>
    %c0_18 = arith.constant 0 : index
    %c0_19 = arith.constant 0 : index
    %36 = vector.load %arg7[%c0_18, %c0_19] : memref<32x64xf32, #tpu.memory_space<vmem>>, vector<32x64xf32>
    tpu.vector_store %arg7[%c0_18, %c0_19], %35 {strides = array<i32>} : memref<32x64xf32, #tpu.memory_space<vmem>>, vector<32x64xf32>,
    %c0_20 = arith.constant 0 : index
    %c0_21 = arith.constant 0 : index
    %37 = vector.load %arg8[%c0_20, %c0_21] : memref<32x512xf32, #tpu.memory_space<vmem>>, vector<32x512xf32>
    tpu.vector_store %arg8[%c0_20, %c0_21], %33 {strides = array<i32>} : memref<32x512xf32, #tpu.memory_space<vmem>>, vector<32x512xf32>,
    %c0_22 = arith.constant 0 : index
    %c0_23 = arith.constant 0 : index
    %38 = vector.load %arg9[%c0_22, %c0_23] : memref<32x1xi32, #tpu.memory_space<vmem>>, vector<32x1xi32>
    tpu.vector_store %arg9[%c0_22, %c0_23], %29 {strides = array<i32>} : memref<32x1xi32, #tpu.memory_space<vmem>>, vector<32x1xi32>,
    %39 = arith.subf %35, %8 : vector<32x64xf32>
    %c0_24 = arith.constant 0 : index
    %c0_25 = arith.constant 0 : index
    %40 = vector.load %arg12[%c0_24, %c0_25] : memref<1x1xf32, #tpu.memory_space<vmem>>, vector<1x1xf32>
    %41 = arith.mulf %39, %39 : vector<32x64xf32>
    %42 = vector.shape_cast %41 : vector<32x64xf32> to vector<1x32x64xf32>
    %cst_26 = arith.constant dense<0.000000e+00> : vector<1xf32>
    %43 = vector.multi_reduction <add>, %42, %cst_26 [1, 2] : vector<1x32x64xf32> to vector<1xf32>
    %44 = vector.shape_cast %43 : vector<1xf32> to vector<1x1x1xf32>
    %45 = vector.extract %44[0, 0, 0] : f32 from vector<1x1x1xf32>
    %46 = vector.broadcast %45 : f32 to vector<1x1xf32>
    %47 = arith.addf %40, %46 : vector<1x1xf32>
    %c0_27 = arith.constant 0 : index
    %c0_28 = arith.constant 0 : index
    %48 = vector.load %arg12[%c0_27, %c0_28] : memref<1x1xf32, #tpu.memory_space<vmem>>, vector<1x1xf32>
    tpu.vector_store %arg12[%c0_27, %c0_28], %47 {strides = array<i32>} : memref<1x1xf32, #tpu.memory_space<vmem>>, vector<1x1xf32>,
    %c0_29 = arith.constant 0 : index
    %c0_30 = arith.constant 0 : index
    %49 = vector.load %arg13[%c0_29, %c0_30] : memref<1x512xf32, #tpu.memory_space<vmem>>, vector<1x512xf32>
    %cst_31 = arith.constant dense<0.000000e+00> : vector<512xf32>
    %50 = vector.multi_reduction <add>, %33, %cst_31 [0] : vector<32x512xf32> to vector<512xf32>
    %51 = vector.shape_cast %50 : vector<512xf32> to vector<1x512xf32>
    %52 = arith.addf %49, %51 : vector<1x512xf32>
    %c0_32 = arith.constant 0 : index
    %c0_33 = arith.constant 0 : index
    %53 = vector.load %arg13[%c0_32, %c0_33] : memref<1x512xf32, #tpu.memory_space<vmem>>, vector<1x512xf32>
    tpu.vector_store %arg13[%c0_32, %c0_33], %52 {strides = array<i32>} : memref<1x512xf32, #tpu.memory_space<vmem>>, vector<1x512xf32>,
    %c0_i32_34 = arith.constant 0 : i32
    %54 = arith.cmpi eq, %arg0, %c0_i32_34 : i32
    %55 = arith.extui %54 : i1 to i32
    %c0_i32_35 = arith.constant 0 : i32
    %56 = arith.cmpi ne, %55, %c0_i32_35 : i32
    scf.if %56 {
      %c0_36 = arith.constant 0 : index
      %c0_37 = arith.constant 0 : index
      %57 = vector.load %arg12[%c0_36, %c0_37] : memref<1x1xf32, #tpu.memory_space<vmem>>, vector<1x1xf32>
      %cst_38 = arith.constant 1.22070313E-4 : f32
      %58 = vector.broadcast %cst_38 : f32 to vector<1x1xf32>
      %59 = arith.mulf %58, %57 : vector<1x1xf32>
      %c0_39 = arith.constant 0 : index
      %c0_40 = arith.constant 0 : index
      %60 = vector.load %arg10[%c0_39, %c0_40] : memref<1x1xf32, #tpu.memory_space<vmem>>, vector<1x1xf32>
      tpu.vector_store %arg10[%c0_39, %c0_40], %59 {strides = array<i32>} : memref<1x1xf32, #tpu.memory_space<vmem>>, vector<1x1xf32>,
      %c0_41 = arith.constant 0 : index
      %c0_42 = arith.constant 0 : index
      %61 = vector.load %arg13[%c0_41, %c0_42] : memref<1x512xf32, #tpu.memory_space<vmem>>, vector<1x512xf32>
      %cst_43 = arith.constant 3.200000e+01 : f32
      %62 = vector.broadcast %cst_43 : f32 to vector<1x512xf32>
      %63 = arith.divf %61, %62 : vector<1x512xf32>
      %cst_44 = arith.constant 1.000000e-10 : f32
      %64 = vector.broadcast %cst_44 : f32 to vector<1x512xf32>
      %65 = arith.addf %63, %64 : vector<1x512xf32>
      %66 = math.log %65 : vector<1x512xf32>
      %67 = arith.mulf %63, %66 : vector<1x512xf32>
      %68 = vector.shape_cast %67 : vector<1x512xf32> to vector<1x1x512xf32>
      %cst_45 = arith.constant dense<0.000000e+00> : vector<1xf32>
      %69 = vector.multi_reduction <add>, %68, %cst_45 [1, 2] : vector<1x1x512xf32> to vector<1xf32>
      %70 = vector.shape_cast %69 : vector<1xf32> to vector<1x1x1xf32>
      %71 = vector.extract %70[0, 0, 0] : f32 from vector<1x1x1xf32>
      %72 = vector.broadcast %71 : f32 to vector<1x1xf32>
      %cst_46 = arith.constant 0.000000e+00 : f32
      %73 = vector.broadcast %cst_46 : f32 to vector<1x1xf32>
      %74 = arith.subf %73, %72 : vector<1x1xf32>
      %75 = math.exp %74 : vector<1x1xf32>
      %c0_47 = arith.constant 0 : index
      %c0_48 = arith.constant 0 : index
      %76 = vector.load %arg11[%c0_47, %c0_48] : memref<1x1xf32, #tpu.memory_space<vmem>>, vector<1x1xf32>
      tpu.vector_store %arg11[%c0_47, %c0_48], %75 {strides = array<i32>} : memref<1x1xf32, #tpu.memory_space<vmem>>, vector<1x1xf32>,
    } else {
    }
    return
  }
  func.func @transform_0(%arg0: i32) -> (i32, i32) {
    %c0_i32 = arith.constant 0 : i32
    %c0_i32_0 = arith.constant 0 : i32
    return %arg0, %c0_i32 : i32, i32
  }
  func.func @transform_1(%arg0: i32) -> (i32, i32) {
    %c0_i32 = arith.constant 0 : i32
    %c0_i32_0 = arith.constant 0 : i32
    %c0_i32_1 = arith.constant 0 : i32
    return %c0_i32, %c0_i32_0 : i32, i32
  }
  func.func @transform_2(%arg0: i32) -> (i32, i32) {
    %c0_i32 = arith.constant 0 : i32
    %c0_i32_0 = arith.constant 0 : i32
    %c0_i32_1 = arith.constant 0 : i32
    return %c0_i32, %c0_i32_0 : i32, i32
  }
  func.func @transform_3(%arg0: i32) -> (i32, i32) {
    %c0_i32 = arith.constant 0 : i32
    %c0_i32_0 = arith.constant 0 : i32
    %c0_i32_1 = arith.constant 0 : i32
    return %c0_i32, %c0_i32_0 : i32, i32
  }
  func.func @transform_4(%arg0: i32) -> (i32, i32) {
    %c0_i32 = arith.constant 0 : i32
    %c0_i32_0 = arith.constant 0 : i32
    %c0_i32_1 = arith.constant 0 : i32
    return %c0_i32, %c0_i32_0 : i32, i32
  }
  func.func @transform_5(%arg0: i32) -> (i32, i32) {
    %c0_i32 = arith.constant 0 : i32
    %c0_i32_0 = arith.constant 0 : i32
    %c0_i32_1 = arith.constant 0 : i32
    return %c0_i32, %c0_i32_0 : i32, i32
  }
  func.func @transform_6(%arg0: i32) -> (i32, i32) {
    %c0_i32 = arith.constant 0 : i32
    %c0_i32_0 = arith.constant 0 : i32
    return %arg0, %c0_i32 : i32, i32
  }
  func.func @transform_7(%arg0: i32) -> (i32, i32) {
    %c0_i32 = arith.constant 0 : i32
    %c0_i32_0 = arith.constant 0 : i32
    return %arg0, %c0_i32 : i32, i32
  }
  func.func @transform_8(%arg0: i32) -> (i32, i32) {
    %c0_i32 = arith.constant 0 : i32
    %c0_i32_0 = arith.constant 0 : i32
    return %arg0, %c0_i32 : i32, i32
  }
  func.func @transform_9(%arg0: i32) -> (i32, i32) {
    %c0_i32 = arith.constant 0 : i32
    %c0_i32_0 = arith.constant 0 : i32
    %c0_i32_1 = arith.constant 0 : i32
    return %c0_i32, %c0_i32_0 : i32, i32
  }
  func.func @transform_10(%arg0: i32) -> (i32, i32) {
    %c0_i32 = arith.constant 0 : i32
    %c0_i32_0 = arith.constant 0 : i32
    %c0_i32_1 = arith.constant 0 : i32
    return %c0_i32, %c0_i32_0 : i32, i32
  }
}

module attributes {stable_mosaic.version = 11 : i64} {
  func.func @_mm_kernel(%arg0: i32, %arg1: i32, %arg2: i32, %arg3: memref<128x128xbf16, #tpu.memory_space<vmem>>, %arg4: memref<128x128xbf16, #tpu.memory_space<vmem>>, %arg5: memref<1x128xf32, #tpu.memory_space<vmem>>, %arg6: memref<128x128xf32, #tpu.memory_space<vmem>>, %arg7: memref<128x128xf32, #tpu.memory_space<vmem>>) attributes {dimension_semantics = [#tpu.dimension_semantics<parallel>, #tpu.dimension_semantics<parallel>, #tpu.dimension_semantics<arbitrary>], iteration_bounds = array<i64: 1, 1, 5>, scalar_prefetch = 0 : i64, scratch_operands = 1 : i64, tpu.core_type = #tpu.core_type<tc>, window_params = [{transform_indices = @transform_0, window_bounds = array<i64: 128, 128>}, {transform_indices = @transform_1, window_bounds = array<i64: 128, 128>}, {transform_indices = @transform_2, window_bounds = array<i64: 1, 128>}, {transform_indices = @transform_3, window_bounds = array<i64: 128, 128>}]} {
    %c0_i32 = arith.constant 0 : i32
    %0 = arith.cmpi eq, %arg2, %c0_i32 : i32
    %1 = arith.extui %0 : i1 to i32
    %c0_i32_0 = arith.constant 0 : i32
    %2 = arith.cmpi ne, %1, %c0_i32_0 : i32
    scf.if %2 {
      %cst_9 = arith.constant 0.000000e+00 : f32
      %12 = vector.broadcast %cst_9 : f32 to vector<128x128xf32>
      %c0_10 = arith.constant 0 : index
      %c0_11 = arith.constant 0 : index
      %13 = vector.load %arg7[%c0_10, %c0_11] : memref<128x128xf32, #tpu.memory_space<vmem>>, vector<128x128xf32>
      tpu.vector_store %arg7[%c0_10, %c0_11], %12 {strides = array<i32>} : memref<128x128xf32, #tpu.memory_space<vmem>>, vector<128x128xf32>,
    } else {
    }
    %c0 = arith.constant 0 : index
    %c0_1 = arith.constant 0 : index
    %3 = vector.load %arg7[%c0, %c0_1] : memref<128x128xf32, #tpu.memory_space<vmem>>, vector<128x128xf32>
    %c0_2 = arith.constant 0 : index
    %c0_3 = arith.constant 0 : index
    %4 = vector.load %arg3[%c0_2, %c0_3] : memref<128x128xbf16, #tpu.memory_space<vmem>>, vector<128x128xbf16>
    %c0_4 = arith.constant 0 : index
    %c0_5 = arith.constant 0 : index
    %5 = vector.load %arg4[%c0_4, %c0_5] : memref<128x128xbf16, #tpu.memory_space<vmem>>, vector<128x128xbf16>
    %cst = arith.constant dense<0.000000e+00> : vector<128x128xf32>
    %6 = tpu.matmul %4, %5, %cst {dimension_numbers = #tpu.dot_dimension_numbers<[1], [0], [0], [1], [0, 0, 1, 1], [], []>} : vector<128x128xbf16>, vector<128x128xbf16>, vector<128x128xf32> -> vector<128x128xf32>
    %7 = arith.addf %3, %6 : vector<128x128xf32>
    %c0_6 = arith.constant 0 : index
    %c0_7 = arith.constant 0 : index
    %8 = vector.load %arg7[%c0_6, %c0_7] : memref<128x128xf32, #tpu.memory_space<vmem>>, vector<128x128xf32>
    tpu.vector_store %arg7[%c0_6, %c0_7], %7 {strides = array<i32>} : memref<128x128xf32, #tpu.memory_space<vmem>>, vector<128x128xf32>,
    %c4_i32 = arith.constant 4 : i32
    %9 = arith.cmpi eq, %arg2, %c4_i32 : i32
    %10 = arith.extui %9 : i1 to i32
    %c0_i32_8 = arith.constant 0 : i32
    %11 = arith.cmpi ne, %10, %c0_i32_8 : i32
    scf.if %11 {
      %c0_9 = arith.constant 0 : index
      %c0_10 = arith.constant 0 : index
      %12 = vector.load %arg7[%c0_9, %c0_10] : memref<128x128xf32, #tpu.memory_space<vmem>>, vector<128x128xf32>
      %c0_11 = arith.constant 0 : index
      %c0_12 = arith.constant 0 : index
      %13 = vector.load %arg5[%c0_11, %c0_12] : memref<1x128xf32, #tpu.memory_space<vmem>>, vector<1x128xf32>
      %14 = vector.broadcast %13 : vector<1x128xf32> to vector<128x128xf32>
      %15 = arith.addf %12, %14 : vector<128x128xf32>
      %cst_13 = arith.constant 0.000000e+00 : f32
      %16 = vector.broadcast %cst_13 : f32 to vector<128x128xf32>
      %17 = arith.maximumf %15, %16 : vector<128x128xf32>
      %c0_14 = arith.constant 0 : index
      %c0_15 = arith.constant 0 : index
      %18 = vector.load %arg6[%c0_14, %c0_15] : memref<128x128xf32, #tpu.memory_space<vmem>>, vector<128x128xf32>
      tpu.vector_store %arg6[%c0_14, %c0_15], %17 {strides = array<i32>} : memref<128x128xf32, #tpu.memory_space<vmem>>, vector<128x128xf32>,
    } else {
    }
    return
  }
  func.func @transform_0(%arg0: i32, %arg1: i32, %arg2: i32) -> (i32, i32) {
    %c0_i32 = arith.constant 0 : i32
    return %arg0, %arg2 : i32, i32
  }
  func.func @transform_1(%arg0: i32, %arg1: i32, %arg2: i32) -> (i32, i32) {
    %c0_i32 = arith.constant 0 : i32
    return %arg2, %arg1 : i32, i32
  }
  func.func @transform_2(%arg0: i32, %arg1: i32, %arg2: i32) -> (i32, i32) {
    %c0_i32 = arith.constant 0 : i32
    %c0_i32_0 = arith.constant 0 : i32
    return %c0_i32, %arg1 : i32, i32
  }
  func.func @transform_3(%arg0: i32, %arg1: i32, %arg2: i32) -> (i32, i32) {
    %c0_i32 = arith.constant 0 : i32
    return %arg0, %arg1 : i32, i32
  }
}

module attributes {stable_mosaic.version = 11 : i64} {
  func.func @_mm_kernel(%arg0: i32, %arg1: i32, %arg2: i32, %arg3: memref<128x512xbf16, #tpu.memory_space<vmem>>, %arg4: memref<512x128xbf16, #tpu.memory_space<vmem>>, %arg5: memref<1x128xf32, #tpu.memory_space<vmem>>, %arg6: memref<128x128xf32, #tpu.memory_space<vmem>>, %arg7: memref<128x128xf32, #tpu.memory_space<vmem>>) attributes {dimension_semantics = [#tpu.dimension_semantics<parallel>, #tpu.dimension_semantics<parallel>, #tpu.dimension_semantics<arbitrary>], iteration_bounds = array<i64: 1, 1, 1>, scalar_prefetch = 0 : i64, scratch_operands = 1 : i64, tpu.core_type = #tpu.core_type<tc>, window_params = [{transform_indices = @transform_0, window_bounds = array<i64: 128, 512>}, {transform_indices = @transform_1, window_bounds = array<i64: 512, 128>}, {transform_indices = @transform_2, window_bounds = array<i64: 1, 128>}, {transform_indices = @transform_3, window_bounds = array<i64: 128, 128>}]} {
    %c0_i32 = arith.constant 0 : i32
    %0 = arith.cmpi eq, %arg2, %c0_i32 : i32
    %1 = arith.extui %0 : i1 to i32
    %c0_i32_0 = arith.constant 0 : i32
    %2 = arith.cmpi ne, %1, %c0_i32_0 : i32
    scf.if %2 {
      %cst_10 = arith.constant 0.000000e+00 : f32
      %12 = vector.broadcast %cst_10 : f32 to vector<128x128xf32>
      %c0_11 = arith.constant 0 : index
      %c0_12 = arith.constant 0 : index
      %13 = vector.load %arg7[%c0_11, %c0_12] : memref<128x128xf32, #tpu.memory_space<vmem>>, vector<128x128xf32>
      tpu.vector_store %arg7[%c0_11, %c0_12], %12 {strides = array<i32>} : memref<128x128xf32, #tpu.memory_space<vmem>>, vector<128x128xf32>,
    } else {
    }
    %c0 = arith.constant 0 : index
    %c0_1 = arith.constant 0 : index
    %3 = vector.load %arg7[%c0, %c0_1] : memref<128x128xf32, #tpu.memory_space<vmem>>, vector<128x128xf32>
    %c0_2 = arith.constant 0 : index
    %c0_3 = arith.constant 0 : index
    %4 = vector.load %arg3[%c0_2, %c0_3] : memref<128x512xbf16, #tpu.memory_space<vmem>>, vector<128x512xbf16>
    %c0_4 = arith.constant 0 : index
    %c0_5 = arith.constant 0 : index
    %5 = vector.load %arg4[%c0_4, %c0_5] : memref<512x128xbf16, #tpu.memory_space<vmem>>, vector<512x128xbf16>
    %cst = arith.constant dense<0.000000e+00> : vector<128x128xf32>
    %6 = tpu.matmul %4, %5, %cst {dimension_numbers = #tpu.dot_dimension_numbers<[1], [0], [0], [1], [0, 0, 1, 1], [], []>} : vector<128x512xbf16>, vector<512x128xbf16>, vector<128x128xf32> -> vector<128x128xf32>
    %7 = arith.addf %3, %6 : vector<128x128xf32>
    %c0_6 = arith.constant 0 : index
    %c0_7 = arith.constant 0 : index
    %8 = vector.load %arg7[%c0_6, %c0_7] : memref<128x128xf32, #tpu.memory_space<vmem>>, vector<128x128xf32>
    tpu.vector_store %arg7[%c0_6, %c0_7], %7 {strides = array<i32>} : memref<128x128xf32, #tpu.memory_space<vmem>>, vector<128x128xf32>,
    %c0_i32_8 = arith.constant 0 : i32
    %9 = arith.cmpi eq, %arg2, %c0_i32_8 : i32
    %10 = arith.extui %9 : i1 to i32
    %c0_i32_9 = arith.constant 0 : i32
    %11 = arith.cmpi ne, %10, %c0_i32_9 : i32
    scf.if %11 {
      %c0_10 = arith.constant 0 : index
      %c0_11 = arith.constant 0 : index
      %12 = vector.load %arg7[%c0_10, %c0_11] : memref<128x128xf32, #tpu.memory_space<vmem>>, vector<128x128xf32>
      %c0_12 = arith.constant 0 : index
      %c0_13 = arith.constant 0 : index
      %13 = vector.load %arg5[%c0_12, %c0_13] : memref<1x128xf32, #tpu.memory_space<vmem>>, vector<1x128xf32>
      %14 = vector.broadcast %13 : vector<1x128xf32> to vector<128x128xf32>
      %15 = arith.addf %12, %14 : vector<128x128xf32>
      %cst_14 = arith.constant 0.000000e+00 : f32
      %16 = vector.broadcast %cst_14 : f32 to vector<128x128xf32>
      %17 = arith.maximumf %15, %16 : vector<128x128xf32>
      %c0_15 = arith.constant 0 : index
      %c0_16 = arith.constant 0 : index
      %18 = vector.load %arg6[%c0_15, %c0_16] : memref<128x128xf32, #tpu.memory_space<vmem>>, vector<128x128xf32>
      tpu.vector_store %arg6[%c0_15, %c0_16], %17 {strides = array<i32>} : memref<128x128xf32, #tpu.memory_space<vmem>>, vector<128x128xf32>,
    } else {
    }
    return
  }
  func.func @transform_0(%arg0: i32, %arg1: i32, %arg2: i32) -> (i32, i32) {
    %c0_i32 = arith.constant 0 : i32
    return %arg0, %arg2 : i32, i32
  }
  func.func @transform_1(%arg0: i32, %arg1: i32, %arg2: i32) -> (i32, i32) {
    %c0_i32 = arith.constant 0 : i32
    return %arg2, %arg1 : i32, i32
  }
  func.func @transform_2(%arg0: i32, %arg1: i32, %arg2: i32) -> (i32, i32) {
    %c0_i32 = arith.constant 0 : i32
    %c0_i32_0 = arith.constant 0 : i32
    return %c0_i32, %arg1 : i32, i32
  }
  func.func @transform_3(%arg0: i32, %arg1: i32, %arg2: i32) -> (i32, i32) {
    %c0_i32 = arith.constant 0 : i32
    return %arg0, %arg1 : i32, i32
  }
}

module attributes {stable_mosaic.version = 11 : i64} {
  func.func @_mm_kernel(%arg0: i32, %arg1: i32, %arg2: i32, %arg3: memref<128x256xbf16, #tpu.memory_space<vmem>>, %arg4: memref<256x128xbf16, #tpu.memory_space<vmem>>, %arg5: memref<1x128xf32, #tpu.memory_space<vmem>>, %arg6: memref<128x128xf32, #tpu.memory_space<vmem>>, %arg7: memref<128x128xf32, #tpu.memory_space<vmem>>) attributes {dimension_semantics = [#tpu.dimension_semantics<parallel>, #tpu.dimension_semantics<parallel>, #tpu.dimension_semantics<arbitrary>], iteration_bounds = array<i64: 1, 1, 1>, scalar_prefetch = 0 : i64, scratch_operands = 1 : i64, tpu.core_type = #tpu.core_type<tc>, window_params = [{transform_indices = @transform_0, window_bounds = array<i64: 128, 256>}, {transform_indices = @transform_1, window_bounds = array<i64: 256, 128>}, {transform_indices = @transform_2, window_bounds = array<i64: 1, 128>}, {transform_indices = @transform_3, window_bounds = array<i64: 128, 128>}]} {
    %c0_i32 = arith.constant 0 : i32
    %0 = arith.cmpi eq, %arg2, %c0_i32 : i32
    %1 = arith.extui %0 : i1 to i32
    %c0_i32_0 = arith.constant 0 : i32
    %2 = arith.cmpi ne, %1, %c0_i32_0 : i32
    scf.if %2 {
      %cst_10 = arith.constant 0.000000e+00 : f32
      %12 = vector.broadcast %cst_10 : f32 to vector<128x128xf32>
      %c0_11 = arith.constant 0 : index
      %c0_12 = arith.constant 0 : index
      %13 = vector.load %arg7[%c0_11, %c0_12] : memref<128x128xf32, #tpu.memory_space<vmem>>, vector<128x128xf32>
      tpu.vector_store %arg7[%c0_11, %c0_12], %12 {strides = array<i32>} : memref<128x128xf32, #tpu.memory_space<vmem>>, vector<128x128xf32>,
    } else {
    }
    %c0 = arith.constant 0 : index
    %c0_1 = arith.constant 0 : index
    %3 = vector.load %arg7[%c0, %c0_1] : memref<128x128xf32, #tpu.memory_space<vmem>>, vector<128x128xf32>
    %c0_2 = arith.constant 0 : index
    %c0_3 = arith.constant 0 : index
    %4 = vector.load %arg3[%c0_2, %c0_3] : memref<128x256xbf16, #tpu.memory_space<vmem>>, vector<128x256xbf16>
    %c0_4 = arith.constant 0 : index
    %c0_5 = arith.constant 0 : index
    %5 = vector.load %arg4[%c0_4, %c0_5] : memref<256x128xbf16, #tpu.memory_space<vmem>>, vector<256x128xbf16>
    %cst = arith.constant dense<0.000000e+00> : vector<128x128xf32>
    %6 = tpu.matmul %4, %5, %cst {dimension_numbers = #tpu.dot_dimension_numbers<[1], [0], [0], [1], [0, 0, 1, 1], [], []>} : vector<128x256xbf16>, vector<256x128xbf16>, vector<128x128xf32> -> vector<128x128xf32>
    %7 = arith.addf %3, %6 : vector<128x128xf32>
    %c0_6 = arith.constant 0 : index
    %c0_7 = arith.constant 0 : index
    %8 = vector.load %arg7[%c0_6, %c0_7] : memref<128x128xf32, #tpu.memory_space<vmem>>, vector<128x128xf32>
    tpu.vector_store %arg7[%c0_6, %c0_7], %7 {strides = array<i32>} : memref<128x128xf32, #tpu.memory_space<vmem>>, vector<128x128xf32>,
    %c0_i32_8 = arith.constant 0 : i32
    %9 = arith.cmpi eq, %arg2, %c0_i32_8 : i32
    %10 = arith.extui %9 : i1 to i32
    %c0_i32_9 = arith.constant 0 : i32
    %11 = arith.cmpi ne, %10, %c0_i32_9 : i32
    scf.if %11 {
      %c0_10 = arith.constant 0 : index
      %c0_11 = arith.constant 0 : index
      %12 = vector.load %arg7[%c0_10, %c0_11] : memref<128x128xf32, #tpu.memory_space<vmem>>, vector<128x128xf32>
      %c0_12 = arith.constant 0 : index
      %c0_13 = arith.constant 0 : index
      %13 = vector.load %arg5[%c0_12, %c0_13] : memref<1x128xf32, #tpu.memory_space<vmem>>, vector<1x128xf32>
      %14 = vector.broadcast %13 : vector<1x128xf32> to vector<128x128xf32>
      %15 = arith.addf %12, %14 : vector<128x128xf32>
      %c0_14 = arith.constant 0 : index
      %c0_15 = arith.constant 0 : index
      %16 = vector.load %arg6[%c0_14, %c0_15] : memref<128x128xf32, #tpu.memory_space<vmem>>, vector<128x128xf32>
      tpu.vector_store %arg6[%c0_14, %c0_15], %15 {strides = array<i32>} : memref<128x128xf32, #tpu.memory_space<vmem>>, vector<128x128xf32>,
    } else {
    }
    return
  }
  func.func @transform_0(%arg0: i32, %arg1: i32, %arg2: i32) -> (i32, i32) {
    %c0_i32 = arith.constant 0 : i32
    return %arg0, %arg2 : i32, i32
  }
  func.func @transform_1(%arg0: i32, %arg1: i32, %arg2: i32) -> (i32, i32) {
    %c0_i32 = arith.constant 0 : i32
    return %arg2, %arg1 : i32, i32
  }
  func.func @transform_2(%arg0: i32, %arg1: i32, %arg2: i32) -> (i32, i32) {
    %c0_i32 = arith.constant 0 : i32
    %c0_i32_0 = arith.constant 0 : i32
    return %c0_i32, %arg1 : i32, i32
  }
  func.func @transform_3(%arg0: i32, %arg1: i32, %arg2: i32) -> (i32, i32) {
    %c0_i32 = arith.constant 0 : i32
    return %arg0, %arg1 : i32, i32
  }
}

</mosaic_0001>

<bundles_post_ra>
// kernel: model_forward.21
= control target key start
LH: loop header
LB: loop body
LE: loop exit
PB: predicated region body
PF: predicated region fallthrough
CT: control target
= control target key end

     0   :  { %s602_s1 = inlined_call_operand.vmem [shape: bf16[128,128], index: 1, kind: input, shape index: {}]   ;;  %s603_s0 = inlined_call_operand.vmem [shape: bf16[128,128], index: 0, kind: input, shape index: {}]   ;;  %s604_s2 = inlined_call_operand.vmem [shape: f32[1,128], index: 2, kind: input, shape index: {}]   ;;  %s605_s3 = inlined_call_operand.vmem [shape: f32[128,128], index: 3, kind: output, shape index: {}]  }
   0x1   :  { %v467_v0 = vld [vmem:[%s602_s1 + $0x38] sm:$0xff]   ;;  %v468_v1 = vld [vmem:[%s602_s1 + $0x30] sm:$0xff]   ;;  %v469_v2 = vld [vmem:[%s602_s1 + $0x28] sm:$0xff]  }
   0x2   :  { %419 = vmatprep.subr.bf16.mxu0 %v467_v0  ;;  %451 = vmatprep.subr.bf16.mxu1 %v467_v0  ;;  %v470_v3 = vld [vmem:[%s602_s1 + $0x20] sm:$0xff]   ;;  %v471_v6 = vld [vmem:[%s602_s1 + $0x18] sm:$0xff]   ;;  %v472_v7 = vld [vmem:[%s602_s1 + $0x10] sm:$0xff]  }
   0x3   :  { %420 = vmatpush3.bf16.msra.mxu0 %v467_v0  ;;  %459 = vmatpush3.bf16.msra.mxu1 %v467_v0  ;;  %v475_v4 = vld [vmem:[%s603_s0] sm:$0xff]   ;;  %v473_v8 = vld [vmem:[%s602_s1 + $0x8] sm:$0xff]   ;;  %v479_v12 = vld [vmem:[%s603_s0 + $0x10] sm:$0xff]  }
   0x4   :  { %421 = vmatprep.subr.bf16.mxu0 %v468_v1  ;;  %452 = vmatprep.subr.bf16.mxu1 %v468_v1  ;;  %v476_v5 = vld [vmem:[%s603_s0 + $0x20] sm:$0xff]   ;;  %v477_v10 = vld [vmem:[%s603_s0 + $0x8] sm:$0xff]   ;;  %v480_v13 = vld [vmem:[%s603_s0 + $0x30] sm:$0xff]  }
   0x5   :  { %435 = vmatprep.mubr.bf16.mxu0 %v475_v4  ;;  %443 = vmatprep.mubr.bf16.mxu1 %v476_v5  ;;  %v474_v9 = vld [vmem:[%s602_s1] sm:$0xff]   ;;  %v478_v11 = vld [vmem:[%s603_s0 + $0x28] sm:$0xff]   ;;  %v481_v14 = vld [vmem:[%s603_s0 + $0x18] sm:$0xff]  }
   0x6   :  { %v482_v15 = vld [vmem:[%s603_s0 + $0x38] sm:$0xff]   ;;  %v402_v16 = vld [vmem:[%s604_s2] ss:$0 sm:$0xff] }
   0x7   :  { %422 = vmatpush3.bf16.msra.mxu0 %v468_v1  ;;  %460 = vmatpush3.bf16.msra.mxu1 %v468_v1 }
   0x8   :  { %423 = vmatprep.subr.bf16.mxu0 %v469_v2  ;;  %453 = vmatprep.subr.bf16.mxu1 %v469_v2 }
   0xb   :  { %424 = vmatpush3.bf16.msra.mxu0 %v469_v2  ;;  %461 = vmatpush3.bf16.msra.mxu1 %v469_v2 }
   0xc   :  { %425 = vmatprep.subr.bf16.mxu0 %v470_v3  ;;  %454 = vmatprep.subr.bf16.mxu1 %v470_v3 }
   0xf   :  { %426 = vmatpush3.bf16.msra.mxu0 %v470_v3  ;;  %462 = vmatpush3.bf16.msra.mxu1 %v470_v3 }
  0x10   :  { %427 = vmatprep.subr.bf16.mxu0 %v471_v6  ;;  %455 = vmatprep.subr.bf16.mxu1 %v471_v6 }
  0x13   :  { %428 = vmatpush3.bf16.msra.mxu0 %v471_v6  ;;  %463 = vmatpush3.bf16.msra.mxu1 %v471_v6 }
  0x14   :  { %429 = vmatprep.subr.bf16.mxu0 %v472_v7  ;;  %456 = vmatprep.subr.bf16.mxu1 %v472_v7 }
  0x17   :  { %430 = vmatpush3.bf16.msra.mxu0 %v472_v7  ;;  %464 = vmatpush3.bf16.msra.mxu1 %v472_v7 }
  0x18   :  { %431 = vmatprep.subr.bf16.mxu0 %v473_v8  ;;  %457 = vmatprep.subr.bf16.mxu1 %v473_v8 }
  0x1b   :  { %432 = vmatpush3.bf16.msra.mxu0 %v473_v8  ;;  %465 = vmatpush3.bf16.msra.mxu1 %v473_v8 }
  0x1c   :  { %433 = vmatprep.subr.bf16.mxu0 %v474_v9  ;;  %458 = vmatprep.subr.bf16.mxu1 %v474_v9 }
  0x1f   :  { %434 = vmatpush3.bf16.msra.mxu0 %v474_v9  ;;  %466 = vmatpush3.bf16.msra.mxu1 %v474_v9 }
  0x22   :  { %436 = vmatmul.mubr.bf16.vlgmr.msra.gmra.mxu0 %v477_v10  ;;  %444 = vmatmul.mubr.bf16.vlgmr.msra.gmra.mxu1 %v478_v11 }
  0x23   :  { %439 = vmatprep.mubr.bf16.mxu0 %v479_v12  ;;  %447 = vmatprep.mubr.bf16.mxu1 %v480_v13 }
  0x2a   :  { %440 = vmatmul.mubr.bf16.gmra.mxu0 %v481_v14  ;;  %448 = vmatmul.mubr.bf16.gmra.mxu1 %v482_v15 }
  0xe2   :  { %v437_v17 = vpop.f32.mrf.mxu0  ;;  %v445_v18 = vpop.f32.mrf.mxu1 }
  0xe3   :  { %v336_v19 = vadd.f32 %v437_v17, %v402_v16  ;;  %v344_v20 = vadd.f32 %v445_v18, %v402_v16 }
  0xe4   :  { %v213_v21 = vpop.f32.mrf.mxu0  ;;  %v245_v22 = vpop.f32.mrf.mxu1 }
  0xe5   :  { %v352_v23 = vmax.f32 %v336_v19, 0.0  ;;  %v360_v24 = vmax.f32 %v344_v20, 0.0  ;;  %v334_v25 = vadd.f32 %v402_v16, %v213_v21  ;;  %v342_v26 = vadd.f32 %v402_v16, %v245_v22 }
  0xe6   :  { %v438_v27 = vpop.f32.mrf.mxu0  ;;  %v446_v28 = vpop.f32.mrf.mxu1 }
  0xe7   :  { %368 = vst [vmem:[%s605_s3 + $0x10] sm:$0xff] %v352_v23  ;;  %376 = vst [vmem:[%s605_s3 + $0x50] sm:$0xff] %v360_v24  ;;  %v350_v29 = vmax.f32 %v334_v25, 0.0  ;;  %v358_v30 = vmax.f32 %v342_v26, 0.0  ;;  %v337_v31 = vadd.f32 %v438_v27, %v402_v16  ;;  %v345_v32 = vadd.f32 %v446_v28, %v402_v16 }
  0xe8   :  { %v216_v33 = vpop.f32.mrf.mxu0  ;;  %v248_v34 = vpop.f32.mrf.mxu1 }
  0xe9   :  { %366 = vst [vmem:[%s605_s3] sm:$0xff] %v350_v29  ;;  %374 = vst [vmem:[%s605_s3 + $0x40] sm:$0xff] %v358_v30  ;;  %v353_v35 = vmax.f32 %v337_v31, 0.0  ;;  %v361_v36 = vmax.f32 %v345_v32, 0.0  ;;  %v335_v37 = vadd.f32 %v402_v16, %v216_v33  ;;  %v343_v38 = vadd.f32 %v402_v16, %v248_v34 }
  0xea   :  { %v441_v39 = vpop.f32.mrf.mxu0  ;;  %v449_v40 = vpop.f32.mrf.mxu1 }
  0xeb   :  { %369 = vst [vmem:[%s605_s3 + $0x18] sm:$0xff] %v353_v35  ;;  %377 = vst [vmem:[%s605_s3 + $0x58] sm:$0xff] %v361_v36  ;;  %v351_v41 = vmax.f32 %v335_v37, 0.0  ;;  %v359_v42 = vmax.f32 %v343_v38, 0.0  ;;  %v340_v43 = vadd.f32 %v441_v39, %v402_v16  ;;  %v348_v44 = vadd.f32 %v449_v40, %v402_v16 }
  0xec   :  { %v229_v45 = vpop.f32.mrf.mxu0  ;;  %v261_v46 = vpop.f32.mrf.mxu1 }
  0xed   :  { %367 = vst [vmem:[%s605_s3 + $0x8] sm:$0xff] %v351_v41  ;;  %375 = vst [vmem:[%s605_s3 + $0x48] sm:$0xff] %v359_v42  ;;  %v356_v47 = vmax.f32 %v340_v43, 0.0  ;;  %v364_v48 = vmax.f32 %v348_v44, 0.0  ;;  %v338_v49 = vadd.f32 %v402_v16, %v229_v45  ;;  %v346_v50 = vadd.f32 %v402_v16, %v261_v46 }
  0xee   :  { %v442_v51 = vpop.f32.mrf.mxu0  ;;  %v450_v52 = vpop.f32.mrf.mxu1 }
  0xef   :  { %372 = vst [vmem:[%s605_s3 + $0x30] sm:$0xff] %v356_v47  ;;  %380 = vst [vmem:[%s605_s3 + $0x70] sm:$0xff] %v364_v48  ;;  %v354_v53 = vmax.f32 %v338_v49, 0.0  ;;  %v362_v54 = vmax.f32 %v346_v50, 0.0  ;;  %v341_v55 = vadd.f32 %v442_v51, %v402_v16  ;;  %v349_v56 = vadd.f32 %v450_v52, %v402_v16 }
  0xf0   :  { %v232_v57 = vpop.f32.mrf.mxu0  ;;  %v264_v58 = vpop.f32.mrf.mxu1 }
  0xf1   :  { %370 = vst [vmem:[%s605_s3 + $0x20] sm:$0xff] %v354_v53  ;;  %378 = vst [vmem:[%s605_s3 + $0x60] sm:$0xff] %v362_v54  ;;  %v357_v59 = vmax.f32 %v341_v55, 0.0  ;;  %v365_v60 = vmax.f32 %v349_v56, 0.0  ;;  %v339_v61 = vadd.f32 %v402_v16, %v232_v57  ;;  %v347_v62 = vadd.f32 %v402_v16, %v264_v58 }
  0xf3   :  { %373 = vst [vmem:[%s605_s3 + $0x38] sm:$0xff] %v357_v59  ;;  %381 = vst [vmem:[%s605_s3 + $0x78] sm:$0xff] %v365_v60  ;;  %v355_v63 = vmax.f32 %v339_v61, 0.0  ;;  %v363_v0 = vmax.f32 %v347_v62, 0.0 }
  0xf5   :  { %371 = vst [vmem:[%s605_s3 + $0x28] sm:$0xff] %v355_v63  ;;  %379 = vst [vmem:[%s605_s3 + $0x68] sm:$0xff] %v363_v0 }

// kernel: model_forward.22
= control target key start
LH: loop header
LB: loop body
LE: loop exit
PB: predicated region body
PF: predicated region fallthrough
CT: control target
= control target key end

     0   :  { %s1625_s12 = smov 0   ;;  %s1627_s13 = smov 0   ;;  %s1879_s0 = inlined_call_operand.vmem [shape: bf16[128,1024], index: 0, kind: input, shape index: {}]   ;;  %s1880_s1 = inlined_call_operand.vmem [shape: bf16[1024,128], index: 1, kind: input, shape index: {}]   ;;  %s1881_s2 = inlined_call_operand.vmem [shape: f32[1,128], index: 2, kind: input, shape index: {}]   ;;  %s1882_s3 = inlined_call_operand.vmem [shape: f32[128,128], index: 3, kind: output, shape index: {}]  }
   0x1   :  { %s1629_s14 = smov 0   ;;  %s1631_s15 = smov 0  }
   0x2   :  { %s1633_s16 = smov 0  }
   0x3 LB: > { %s25_s17 = sadd.s32 1, %s1598_s15  ;;  %p48_p1 = scmp.ne.s32.totalorder %s1590_s13, %s1586_s12  ;;  %s1602_s16 = sphi %s1633_s16, %s13_s16   ;;  %s1598_s15 = sphi %s1631_s15, %s1886_s15   ;;  %s1594_s14 = sphi %s1629_s14, %s1885_s14   ;;  %s1590_s13 = sphi %s1627_s13, %s1884_s13   ;;  %s1586_s12 = sphi %s1625_s12, %s1883_s12  }
   0x4   : > { %p26_p0 = scmp.ge.s32.totalorder %s25_s17, 2  ;;  %p49_p2 = scmp.eq.s32.totalorder %s1602_s16, 0 }
   0x5   : > { %s41_s19 = sadd.s32 1, %s1590_s13  ;;  %p1235_p5 = scmp.ge.s32.totalorder %s1602_s16, 2 }
   0x6   : > { %s1888_s17 = smov (%p26_p0, %s25_s17), 0  ;;  %p50_p3 = por %p49_p2, %p48_p1 }
   0x7   : > { %s37_s18 = ssub.s32 %s1598_s15, %s1888_s17  ;;  %162 = sbr.rel (%p1235_p5) target bundleno = 32 (0x20), region = 20 }
   0x8   : > { %p39_p4 = scmp.eq.s32.totalorder %s37_s18, 0 }
   0xa   : > { %s1660_s20 = scalar_select %p39_p4, %s1590_s13, %s41_s19  }
   0xc   : > { %165 = sbr.rel (!%p50_p3) target bundleno = 32 (0x20), region = 24  ;;  %s167_s21 = sand.u32 (%p50_p3), 1, %s1590_s13  }
   0xd   : > { %s1314_s22 = sshll.u32 (%p50_p3), %s1598_s15, 4  ;;  %s1236_s23 = sshll.u32 (%p50_p3), %s167_s21, 8 }
   0xe   : > { %s1668_s26 = scalar_lea.vmem (%p50_p3), %s1879_s0, %s1314_s22  ;;  %s1673_s27 = scalar_lea.vmem (%p50_p3), [#allocation3], %s1236_s23 }
   0xf   : > { %v188_v0 = vld [vmem:[%s1668_s26] sm:$0xff] (%p50_p3)  ;;  %v190_v1 = vld [vmem:[%s1668_s26 + $0x8] sm:$0xff] (%p50_p3) }
  0x10   : > { %v192_v2 = vld [vmem:[%s1668_s26 + $0x20] sm:$0xff] (%p50_p3)  ;;  %189 = vst [vmem:[%s1673_s27] sm:$0xff] (%p50_p3), %v188_v0  ;;  %191 = vst [vmem:[%s1673_s27 + $0x8] sm:$0xff] (%p50_p3), %v190_v1  ;;  %v194_v3 = vld [vmem:[%s1668_s26 + $0x28] sm:$0xff] (%p50_p3) }
  0x11   : > { %193 = vst [vmem:[%s1673_s27 + $0x10] sm:$0xff] %v192_v2  ;;  %v196_v4 = vld [vmem:[%s1668_s26 + $0x40] sm:$0xff]  ;;  %v198_v5 = vld [vmem:[%s1668_s26 + $0x48] sm:$0xff]  ;;  %195 = vst [vmem:[%s1673_s27 + $0x18] sm:$0xff] %v194_v3 }
  0x12   : > { %197 = vst [vmem:[%s1673_s27 + $0x20] sm:$0xff] %v196_v4  ;;  %199 = vst [vmem:[%s1673_s27 + $0x28] sm:$0xff] %v198_v5  ;;  %v200_v6 = vld [vmem:[%s1668_s26 + $0x60] sm:$0xff]  ;;  %v202_v7 = vld [vmem:[%s1668_s26 + $0x68] sm:$0xff] }
  0x13   : > { %v204_v8 = vld [vmem:[%s1668_s26 + $0x80] sm:$0xff]  ;;  %201 = vst [vmem:[%s1673_s27 + $0x30] sm:$0xff] %v200_v6  ;;  %203 = vst [vmem:[%s1673_s27 + $0x38] sm:$0xff] %v202_v7  ;;  %v206_v9 = vld [vmem:[%s1668_s26 + $0x88] sm:$0xff] }
  0x14   : > { %205 = vst [vmem:[%s1673_s27 + $0x40] sm:$0xff] %v204_v8  ;;  %v208_v10 = vld [vmem:[%s1668_s26 + $0xa0] sm:$0xff]  ;;  %v210_v11 = vld [vmem:[%s1668_s26 + $0xa8] sm:$0xff]  ;;  %207 = vst [vmem:[%s1673_s27 + $0x48] sm:$0xff] %v206_v9 }
  0x15   : > { %209 = vst [vmem:[%s1673_s27 + $0x50] sm:$0xff] %v208_v10  ;;  %211 = vst [vmem:[%s1673_s27 + $0x58] sm:$0xff] %v210_v11  ;;  %v212_v12 = vld [vmem:[%s1668_s26 + $0xc0] sm:$0xff]  ;;  %v214_v13 = vld [vmem:[%s1668_s26 + $0xc8] sm:$0xff] }
  0x16   : > { %v216_v14 = vld [vmem:[%s1668_s26 + $0xe0] sm:$0xff]  ;;  %213 = vst [vmem:[%s1673_s27 + $0x60] sm:$0xff] %v212_v12  ;;  %215 = vst [vmem:[%s1673_s27 + $0x68] sm:$0xff] %v214_v13  ;;  %v218_v15 = vld [vmem:[%s1668_s26 + $0xe8] sm:$0xff] }
  0x17   : > { %217 = vst [vmem:[%s1673_s27 + $0x70] sm:$0xff] %v216_v14  ;;  %v220_v16 = vld [vmem:[%s1668_s26 + $0x100] sm:$0xff]  ;;  %v222_v17 = vld [vmem:[%s1668_s26 + $0x108] sm:$0xff]  ;;  %219 = vst [vmem:[%s1673_s27 + $0x78] sm:$0xff] %v218_v15 }
  0x18   : > { %221 = vst [vmem:[%s1673_s27 + $0x80] sm:$0xff] %v220_v16  ;;  %223 = vst [vmem:[%s1673_s27 + $0x88] sm:$0xff] %v222_v17  ;;  %v224_v18 = vld [vmem:[%s1668_s26 + $0x120] sm:$0xff]  ;;  %v226_v19 = vld [vmem:[%s1668_s26 + $0x128] sm:$0xff] }
  0x19   : > { %v228_v20 = vld [vmem:[%s1668_s26 + $0x140] sm:$0xff]  ;;  %225 = vst [vmem:[%s1673_s27 + $0x90] sm:$0xff] %v224_v18  ;;  %227 = vst [vmem:[%s1673_s27 + $0x98] sm:$0xff] %v226_v19  ;;  %v230_v21 = vld [vmem:[%s1668_s26 + $0x148] sm:$0xff] }
  0x1a   : > { %229 = vst [vmem:[%s1673_s27 + $0xa0] sm:$0xff] %v228_v20  ;;  %v232_v22 = vld [vmem:[%s1668_s26 + $0x160] sm:$0xff]  ;;  %v234_v23 = vld [vmem:[%s1668_s26 + $0x168] sm:$0xff]  ;;  %231 = vst [vmem:[%s1673_s27 + $0xa8] sm:$0xff] %v230_v21 }
  0x1b   : > { %233 = vst [vmem:[%s1673_s27 + $0xb0] sm:$0xff] %v232_v22  ;;  %235 = vst [vmem:[%s1673_s27 + $0xb8] sm:$0xff] %v234_v23  ;;  %v236_v24 = vld [vmem:[%s1668_s26 + $0x180] sm:$0xff]  ;;  %v238_v25 = vld [vmem:[%s1668_s26 + $0x188] sm:$0xff] }
  0x1c   : > { %v240_v26 = vld [vmem:[%s1668_s26 + $0x1a0] sm:$0xff]  ;;  %237 = vst [vmem:[%s1673_s27 + $0xc0] sm:$0xff] %v236_v24  ;;  %239 = vst [vmem:[%s1673_s27 + $0xc8] sm:$0xff] %v238_v25  ;;  %v242_v27 = vld [vmem:[%s1668_s26 + $0x1a8] sm:$0xff] }
  0x1d   : > { %241 = vst [vmem:[%s1673_s27 + $0xd0] sm:$0xff] %v240_v26  ;;  %v244_v28 = vld [vmem:[%s1668_s26 + $0x1c0] sm:$0xff]  ;;  %v246_v29 = vld [vmem:[%s1668_s26 + $0x1c8] sm:$0xff]  ;;  %243 = vst [vmem:[%s1673_s27 + $0xd8] sm:$0xff] %v242_v27 }
  0x1e   : > { %245 = vst [vmem:[%s1673_s27 + $0xe0] sm:$0xff] %v244_v28  ;;  %247 = vst [vmem:[%s1673_s27 + $0xe8] sm:$0xff] %v246_v29  ;;  %v248_v30 = vld [vmem:[%s1668_s26 + $0x1e0] sm:$0xff]  ;;  %v250_v31 = vld [vmem:[%s1668_s26 + $0x1e8] sm:$0xff] }
  0x1f   : > { %249 = vst [vmem:[%s1673_s27 + $0xf0] sm:$0xff] %v248_v30  ;;  %251 = vst [vmem:[%s1673_s27 + $0xf8] sm:$0xff] %v250_v31 }
  0x20 PF: > { %p1239_p6 = scmp.ge.s32.totalorder %s1602_s16, 1  ;;  %p268_p7 = scmp.lt.s32.totalorder %s1602_s16, 3 }
  0x22   : > { %p269_p8 = pnand %p1239_p6, %p268_p7 }
  0x23   : > { %s275_s28 = sand.u32 (!%p269_p8), 1, %s1586_s12   ;;  %s1241_s29 = sshll.u32 (!%p269_p8), %s1594_s14, 6 }
  0x24   : > { %272 = sbr.rel (%p269_p8) target bundleno = 365 (0x16d), region = 51  ;;  %s1240_s30 = sshll.u32 (!%p269_p8), %s275_s28, 8 }
  0x25   : > { %p315_p9 = scmp.lt.s32.totalorder (!%p269_p8), %s1241_s29, 127  ;;  %s1745_s8 = scalar_lea.vmem (!%p269_p8), [#allocation3], %s1240_s30 }
  0x26   : > { %p1243_p10 = scmp.ne.s32.totalorder (!%p269_p8), %s1594_s14, 0 }
  0x29   : > { %s1890_s29 = smov (!%p315_p9, %s1241_s29), 127  ;;  %339 = sbr.rel (%p1243_p10) target bundleno = 55 (0x37), region = 59 }
  0x2a   : > { %s1242_s4 = sshll.u32 %s1890_s29, 2 }
  0x2b   : > { %s1743_s7 = scalar_lea.vmem %s1880_s1, %s1242_s4 }
  0x2e   : > { %v1604_v32 = vmov 0.0  }
  0x2f   : > { %340 = vst [vmem:[#allocation2 + $0x30] sm:$0xff] %v1604_v32  ;;  %341 = vst [vmem:[#allocation2] sm:$0xff] %v1604_v32 }
  0x30   : > { %342 = vst [vmem:[#allocation2 + $0x58] sm:$0xff] %v1604_v32  ;;  %343 = vst [vmem:[#allocation2 + $0x18] sm:$0xff] %v1604_v32 }
  0x31   : > { %344 = vst [vmem:[#allocation2 + $0x50] sm:$0xff] %v1604_v32  ;;  %345 = vst [vmem:[#allocation2 + $0x68] sm:$0xff] %v1604_v32 }
  0x32   : > { %346 = vst [vmem:[#allocation2 + $0x8] sm:$0xff] %v1604_v32  ;;  %347 = vst [vmem:[#allocation2 + $0x48] sm:$0xff] %v1604_v32 }
  0x33   : > { %348 = vst [vmem:[#allocation2 + $0x40] sm:$0xff] %v1604_v32  ;;  %349 = vst [vmem:[#allocation2 + $0x20] sm:$0xff] %v1604_v32 }
  0x34   : > { %350 = vst [vmem:[#allocation2 + $0x10] sm:$0xff] %v1604_v32  ;;  %351 = vst [vmem:[#allocation2 + $0x38] sm:$0xff] %v1604_v32 }
  0x35   : > { %352 = vst [vmem:[#allocation2 + $0x60] sm:$0xff] %v1604_v32  ;;  %353 = vst [vmem:[#allocation2 + $0x70] sm:$0xff] %v1604_v32 }
  0x36   : > { %354 = vst [vmem:[#allocation2 + $0x78] sm:$0xff] %v1604_v32  ;;  %355 = vst [vmem:[#allocation2 + $0x28] sm:$0xff] %v1604_v32 }
  0x37 PF: > { %v1484_v33 = vld [vmem:[%s1743_s7 + $0x78] sm:$0xff]   ;;  %v1488_v37 = vld [vmem:[%s1743_s7 + $0x70] sm:$0xff]   ;;  %v1492_v41 = vld [vmem:[%s1743_s7 + $0x68] sm:$0xff]   ;;  %p1308_p11 = scmp.ne.s32.totalorder %s1594_s14, 1 }
  0x38   : > { %v1485_v34 = vld [vmem:[%s1743_s7 + $0xf8] sm:$0xff]   ;;  %1315 = vmatprep.subr.bf16.mxu0 %v1484_v33  ;;  %v1489_v38 = vld [vmem:[%s1743_s7 + $0xf0] sm:$0xff]   ;;  %v1493_v42 = vld [vmem:[%s1743_s7 + $0xe8] sm:$0xff]  }
  0x39   : > { %v1486_v35 = vld [vmem:[%s1743_s7 + $0x38] sm:$0xff]   ;;  %1379 = vmatprep.subr.bf16.mxu1 %v1485_v34  ;;  %v1490_v39 = vld [vmem:[%s1743_s7 + $0x30] sm:$0xff]   ;;  %v1494_v43 = vld [vmem:[%s1743_s7 + $0x28] sm:$0xff]  }
  0x3a   : > { %v1487_v36 = vld [vmem:[%s1743_s7 + $0xb8] sm:$0xff]   ;;  %1316 = vmatpush3.bf16.msra.mxu0 %v1486_v35  ;;  %v1491_v40 = vld [vmem:[%s1743_s7 + $0xb0] sm:$0xff]   ;;  %v1495_v44 = vld [vmem:[%s1743_s7 + $0xa8] sm:$0xff]  }
  0x3b   : > { %1380 = vmatpush3.bf16.msra.mxu1 %v1487_v36  ;;  %1317 = vmatprep.subr.bf16.mxu0 %v1488_v37  ;;  %v1496_v45 = vld [vmem:[%s1743_s7 + $0x60] sm:$0xff]   ;;  %v1500_v49 = vld [vmem:[%s1743_s7 + $0x58] sm:$0xff]   ;;  %v1504_v53 = vld [vmem:[%s1743_s7 + $0x50] sm:$0xff]  }
  0x3c   : > { %1381 = vmatprep.subr.bf16.mxu1 %v1489_v38  ;;  %v1497_v46 = vld [vmem:[%s1743_s7 + $0xe0] sm:$0xff]   ;;  %v1501_v50 = vld [vmem:[%s1743_s7 + $0xd8] sm:$0xff]   ;;  %v1505_v54 = vld [vmem:[%s1743_s7 + $0xd0] sm:$0xff]  }
  0x3d   : > { %v1498_v47 = vld [vmem:[%s1743_s7 + $0x20] sm:$0xff]   ;;  %v1502_v51 = vld [vmem:[%s1743_s7 + $0x18] sm:$0xff]   ;;  %v1506_v55 = vld [vmem:[%s1743_s7 + $0x10] sm:$0xff]  }
  0x3e   : > { %1318 = vmatpush3.bf16.msra.mxu0 %v1490_v39  ;;  %v1499_v48 = vld [vmem:[%s1743_s7 + $0xa0] sm:$0xff]   ;;  %v1503_v52 = vld [vmem:[%s1743_s7 + $0x98] sm:$0xff]   ;;  %v1507_v56 = vld [vmem:[%s1743_s7 + $0x90] sm:$0xff]  }
  0x3f   : > { %1382 = vmatpush3.bf16.msra.mxu1 %v1491_v40  ;;  %1319 = vmatprep.subr.bf16.mxu0 %v1492_v41  ;;  %v1508_v57 = vld [vmem:[%s1743_s7 + $0x48] sm:$0xff]   ;;  %v1512_v61 = vld [vmem:[%s1743_s7 + $0x40] sm:$0xff]   ;;  %v356_v40 = vld [vmem:[#allocation2 + $0x30] sm:$0xff] }
  0x40   : > { %1383 = vmatprep.subr.bf16.mxu1 %v1493_v42  ;;  %v1509_v58 = vld [vmem:[%s1743_s7 + $0xc8] sm:$0xff]   ;;  %v1513_v62 = vld [vmem:[%s1743_s7 + $0xc0] sm:$0xff]  }
  0x41   : > { %v1510_v59 = vld [vmem:[%s1743_s7 + $0x8] sm:$0xff]   ;;  %v1514_v63 = vld [vmem:[%s1743_s7] sm:$0xff]  }
  0x42   : > { %1320 = vmatpush3.bf16.msra.mxu0 %v1494_v43  ;;  %v1511_v60 = vld [vmem:[%s1743_s7 + $0x88] sm:$0xff]   ;;  %v1515_v0 = vld [vmem:[%s1743_s7 + $0x80] sm:$0xff]  }
  0x43   : > { %1384 = vmatpush3.bf16.msra.mxu1 %v1495_v44  ;;  %1321 = vmatprep.subr.bf16.mxu0 %v1496_v45  ;;  %v1516_v1 = vld [vmem:[%s1745_s8] ss:$16 sps:$4 sm:$0xff]   ;;  %v1518_v2 = vld [vmem:[%s1745_s8 + $0x4] ss:$16 sps:$4 sm:$0xff]   ;;  %v1519_v3 = vld [vmem:[%s1745_s8 + $0x8] ss:$16 sps:$4 sm:$0xff]  }
  0x44   : > { %1385 = vmatprep.subr.bf16.mxu1 %v1497_v46  ;;  %v1521_v4 = vld [vmem:[%s1745_s8 + $0xc] ss:$16 sps:$4 sm:$0xff]   ;;  %852 = vmatprep.mubr.bf16.mxu0 %v1518_v2  ;;  %v1522_v5 = vld [vmem:[%s1745_s8 + $0x24] ss:$16 sps:$4 sm:$0xff]   ;;  %v1526_v7 = vld [vmem:[%s1745_s8 + $0x20] ss:$16 sps:$4 sm:$0xff]  }
  0x45   : > { %949 = vmatprep.mubr.bf16.mxu1 %v1521_v4  ;;  %v1524_v6 = vld [vmem:[%s1745_s8 + $0x2c] ss:$16 sps:$4 sm:$0xff]   ;;  %v1527_v8 = vld [vmem:[%s1745_s8 + $0x28] ss:$16 sps:$4 sm:$0xff]   ;;  %v1528_v9 = vld [vmem:[%s1745_s8 + $0x44] ss:$16 sps:$4 sm:$0xff]  }
  0x46   : > { %1322 = vmatpush3.bf16.msra.mxu0 %v1498_v47  ;;  %v1530_v10 = vld [vmem:[%s1745_s8 + $0x4c] ss:$16 sps:$4 sm:$0xff]   ;;  %v1532_v11 = vld [vmem:[%s1745_s8 + $0x40] ss:$16 sps:$4 sm:$0xff]   ;;  %v1533_v12 = vld [vmem:[%s1745_s8 + $0x48] ss:$16 sps:$4 sm:$0xff]  }
  0x47   : > { %1386 = vmatpush3.bf16.msra.mxu1 %v1499_v48  ;;  %1323 = vmatprep.subr.bf16.mxu0 %v1500_v49  ;;  %v1534_v13 = vld [vmem:[%s1745_s8 + $0x64] ss:$16 sps:$4 sm:$0xff]   ;;  %v1536_v14 = vld [vmem:[%s1745_s8 + $0x6c] ss:$16 sps:$4 sm:$0xff]   ;;  %v1538_v15 = vld [vmem:[%s1745_s8 + $0x60] ss:$16 sps:$4 sm:$0xff]  }
  0x48   : > { %1387 = vmatprep.subr.bf16.mxu1 %v1501_v50  ;;  %v1539_v16 = vld [vmem:[%s1745_s8 + $0x68] ss:$16 sps:$4 sm:$0xff]   ;;  %v1540_v17 = vld [vmem:[%s1745_s8 + $0x84] ss:$16 sps:$4 sm:$0xff]   ;;  %v1542_v18 = vld [vmem:[%s1745_s8 + $0x8c] ss:$16 sps:$4 sm:$0xff]  }
  0x49   : > { %v1544_v19 = vld [vmem:[%s1745_s8 + $0x80] ss:$16 sps:$4 sm:$0xff]   ;;  %v1545_v20 = vld [vmem:[%s1745_s8 + $0x88] ss:$16 sps:$4 sm:$0xff]   ;;  %v1546_v21 = vld [vmem:[%s1745_s8 + $0xa4] ss:$16 sps:$4 sm:$0xff]  }
  0x4a   : > { %1324 = vmatpush3.bf16.msra.mxu0 %v1502_v51  ;;  %v1548_v22 = vld [vmem:[%s1745_s8 + $0xac] ss:$16 sps:$4 sm:$0xff]   ;;  %v1550_v23 = vld [vmem:[%s1745_s8 + $0xa0] ss:$16 sps:$4 sm:$0xff]   ;;  %v1551_v24 = vld [vmem:[%s1745_s8 + $0xa8] ss:$16 sps:$4 sm:$0xff]  }
  0x4b   : > { %1388 = vmatpush3.bf16.msra.mxu1 %v1503_v52  ;;  %1325 = vmatprep.subr.bf16.mxu0 %v1504_v53  ;;  %v1552_v25 = vld [vmem:[%s1745_s8 + $0xc4] ss:$16 sps:$4 sm:$0xff]   ;;  %v1554_v26 = vld [vmem:[%s1745_s8 + $0xcc] ss:$16 sps:$4 sm:$0xff]   ;;  %v1556_v27 = vld [vmem:[%s1745_s8 + $0xc0] ss:$16 sps:$4 sm:$0xff]  }
  0x4c   : > { %1389 = vmatprep.subr.bf16.mxu1 %v1505_v54  ;;  %v1557_v28 = vld [vmem:[%s1745_s8 + $0xc8] ss:$16 sps:$4 sm:$0xff]   ;;  %v1558_v29 = vld [vmem:[%s1745_s8 + $0xe4] ss:$16 sps:$4 sm:$0xff]   ;;  %v1560_v30 = vld [vmem:[%s1745_s8 + $0xec] ss:$16 sps:$4 sm:$0xff]  }
  0x4d   : > { %v1562_v31 = vld [vmem:[%s1745_s8 + $0xe0] ss:$16 sps:$4 sm:$0xff]   ;;  %v1563_v32 = vld [vmem:[%s1745_s8 + $0xe8] ss:$16 sps:$4 sm:$0xff]  }
  0x4e   : > { %1326 = vmatpush3.bf16.msra.mxu0 %v1506_v55  ;;  %v357_v49 = vld [vmem:[#allocation2] sm:$0xff] }
  0x4f   : > { %1390 = vmatpush3.bf16.msra.mxu1 %v1507_v56  ;;  %1327 = vmatprep.subr.bf16.mxu0 %v1508_v57 }
  0x50   : > { %1391 = vmatprep.subr.bf16.mxu1 %v1509_v58  ;;  %v358_v58 = vld [vmem:[#allocation2 + $0x58] sm:$0xff] }
  0x52   : > { %1328 = vmatpush3.bf16.msra.mxu0 %v1510_v59 }
  0x53   : > { %1392 = vmatpush3.bf16.msra.mxu1 %v1511_v60  ;;  %1329 = vmatprep.subr.bf16.mxu0 %v1512_v61 }
  0x54   : > { %1393 = vmatprep.subr.bf16.mxu1 %v1513_v62 }
  0x56   : > { %1330 = vmatpush3.bf16.msra.mxu0 %v1514_v63 }
  0x57   : > { %1394 = vmatpush3.bf16.msra.mxu1 %v1515_v0 }
  0x59   : > { %853 = vmatmul.mubr.bf16.vlgmr.msra.gmra.mxu0 %v1516_v1 }
  0x5a   : > { %950 = vmatmul.mubr.bf16.vlgmr.msra.gmra.mxu1 %v1519_v3  ;;  %860 = vmatprep.mubr.bf16.mxu0 %v1522_v5  ;;  %v359_v3 = vld [vmem:[#allocation2 + $0x18] sm:$0xff] }
  0x5b   : > { %957 = vmatprep.mubr.bf16.mxu1 %v1524_v6 }
  0x61   : > { %861 = vmatmul.mubr.bf16.gmra.mxu0 %v1526_v7 }
  0x62   : > { %958 = vmatmul.mubr.bf16.gmra.mxu1 %v1527_v8  ;;  %868 = vmatprep.mubr.bf16.mxu0 %v1528_v9 }
  0x63   : > { %965 = vmatprep.mubr.bf16.mxu1 %v1530_v10 }
  0x69   : > { %869 = vmatmul.mubr.bf16.gmra.mxu0 %v1532_v11 }
  0x6a   : > { %966 = vmatmul.mubr.bf16.gmra.mxu1 %v1533_v12  ;;  %876 = vmatprep.mubr.bf16.mxu0 %v1534_v13  ;;  %v360_v12 = vld [vmem:[#allocation2 + $0x50] sm:$0xff] }
  0x6b   : > { %973 = vmatprep.mubr.bf16.mxu1 %v1536_v14 }
  0x71   : > { %877 = vmatmul.mubr.bf16.gmra.mxu0 %v1538_v15 }
  0x72   : > { %974 = vmatmul.mubr.bf16.gmra.mxu1 %v1539_v16  ;;  %884 = vmatprep.mubr.bf16.mxu0 %v1540_v17 }
  0x73   : > { %981 = vmatprep.mubr.bf16.mxu1 %v1542_v18 }
  0x79   : > { %885 = vmatmul.mubr.bf16.gmra.mxu0 %v1544_v19 }
  0x7a   : > { %982 = vmatmul.mubr.bf16.gmra.mxu1 %v1545_v20  ;;  %892 = vmatprep.mubr.bf16.mxu0 %v1546_v21  ;;  %v361_v21 = vld [vmem:[#allocation2 + $0x68] sm:$0xff] }
  0x7b   : > { %989 = vmatprep.mubr.bf16.mxu1 %v1548_v22 }
  0x81   : > { %893 = vmatmul.mubr.bf16.gmra.mxu0 %v1550_v23 }
  0x82   : > { %990 = vmatmul.mubr.bf16.gmra.mxu1 %v1551_v24  ;;  %900 = vmatprep.mubr.bf16.mxu0 %v1552_v25 }
  0x83   : > { %997 = vmatprep.mubr.bf16.mxu1 %v1554_v26 }
  0x89   : > { %901 = vmatmul.mubr.bf16.gmra.mxu0 %v1556_v27 }
  0x8a   : > { %998 = vmatmul.mubr.bf16.gmra.mxu1 %v1557_v28  ;;  %908 = vmatprep.mubr.bf16.mxu0 %v1558_v29 }
  0x8b   : > { %1005 = vmatprep.mubr.bf16.mxu1 %v1560_v30  ;;  %v362_v30 = vld [vmem:[#allocation2 + $0x8] sm:$0xff] }
  0x91   : > { %909 = vmatmul.mubr.bf16.gmra.mxu0 %v1562_v31 }
  0x92   : > { %1006 = vmatmul.mubr.bf16.gmra.mxu1 %v1563_v32 }
 0x119   : > { %v1331_v33 = vpop.f32.mrf.mxu0 }
 0x11a   : > { %v1395_v34 = vpop.f32.mrf.mxu1 }
 0x11b   : > { %v1332_v35 = vpop.f32.mrf.mxu0 }
 0x11c   : > { %v1333_v36 = vadd.f32 %v1332_v35, %v1331_v33  ;;  %v1396_v37 = vpop.f32.mrf.mxu1 }
 0x11d   : > { %v1397_v38 = vadd.f32 %v1396_v37, %v1395_v34  ;;  %v1334_v39 = vpop.f32.mrf.mxu0 }
 0x11e   : > { %v1398_v41 = vpop.f32.mrf.mxu1 }
 0x11f   : > { %v952_v42 = vadd.f32 %v1397_v38, %v1333_v36  ;;  %v1335_v43 = vpop.f32.mrf.mxu0 }
 0x120   : > { %v1336_v44 = vadd.f32 %v1335_v43, %v1334_v39  ;;  %v1399_v45 = vpop.f32.mrf.mxu1  ;;  %v363_v39 = vld [vmem:[#allocation2 + $0x48] sm:$0xff] }
 0x121   : > { %v1014_v46 = vadd.f32 %v952_v42, %v356_v40  ;;  %v1400_v47 = vadd.f32 %v1399_v45, %v1398_v41  ;;  %v1337_v48 = vpop.f32.mrf.mxu0 }
 0x122   : > { %v1401_v50 = vpop.f32.mrf.mxu1 }
 0x123   : > { %1030 = vst [vmem:[#allocation2 + $0x30] sm:$0xff] %v1014_v46  ;;  %v955_v51 = vadd.f32 %v1400_v47, %v1336_v44  ;;  %v1338_v52 = vpop.f32.mrf.mxu0 }
 0x124   : > { %v1339_v53 = vadd.f32 %v1338_v52, %v1337_v48  ;;  %v1402_v54 = vpop.f32.mrf.mxu1  ;;  %v364_v48 = vld [vmem:[#allocation2 + $0x40] sm:$0xff] }
 0x125   : > { %v1015_v55 = vadd.f32 %v955_v51, %v357_v49  ;;  %v1403_v56 = vadd.f32 %v1402_v54, %v1401_v50  ;;  %v1340_v57 = vpop.f32.mrf.mxu0 }
 0x126   : > { %v1404_v59 = vpop.f32.mrf.mxu1 }
 0x127   : > { %1031 = vst [vmem:[#allocation2] sm:$0xff] %v1015_v55  ;;  %v960_v60 = vadd.f32 %v1403_v56, %v1339_v53  ;;  %v1341_v61 = vpop.f32.mrf.mxu0 }
 0x128   : > { %v1342_v62 = vadd.f32 %v1341_v61, %v1340_v57  ;;  %v1405_v63 = vpop.f32.mrf.mxu1  ;;  %v365_v57 = vld [vmem:[#allocation2 + $0x20] sm:$0xff] }
 0x129   : > { %v1016_v0 = vadd.f32 %v960_v60, %v358_v58  ;;  %v1406_v1 = vadd.f32 %v1405_v63, %v1404_v59  ;;  %v1343_v2 = vpop.f32.mrf.mxu0 }
 0x12a   : > { %v1407_v4 = vpop.f32.mrf.mxu1 }
 0x12b   : > { %1032 = vst [vmem:[#allocation2 + $0x58] sm:$0xff] %v1016_v0  ;;  %v963_v5 = vadd.f32 %v1406_v1, %v1342_v62  ;;  %v1344_v6 = vpop.f32.mrf.mxu0 }
 0x12c   : > { %v1345_v7 = vadd.f32 %v1344_v6, %v1343_v2  ;;  %v1408_v8 = vpop.f32.mrf.mxu1  ;;  %v366_v2 = vld [vmem:[#allocation2 + $0x10] sm:$0xff] }
 0x12d   : > { %v1017_v9 = vadd.f32 %v963_v5, %v359_v3  ;;  %v1409_v10 = vadd.f32 %v1408_v8, %v1407_v4  ;;  %v1346_v11 = vpop.f32.mrf.mxu0 }
 0x12e   : > { %v1410_v13 = vpop.f32.mrf.mxu1 }
 0x12f   : > { %1033 = vst [vmem:[#allocation2 + $0x18] sm:$0xff] %v1017_v9  ;;  %v968_v14 = vadd.f32 %v1409_v10, %v1345_v7  ;;  %v1347_v15 = vpop.f32.mrf.mxu0 }
 0x130   : > { %v1348_v16 = vadd.f32 %v1347_v15, %v1346_v11  ;;  %v1411_v17 = vpop.f32.mrf.mxu1  ;;  %v367_v11 = vld [vmem:[#allocation2 + $0x38] sm:$0xff] }
 0x131   : > { %v1018_v18 = vadd.f32 %v968_v14, %v360_v12  ;;  %v1412_v19 = vadd.f32 %v1411_v17, %v1410_v13  ;;  %v1349_v20 = vpop.f32.mrf.mxu0 }
 0x132   : > { %v1413_v22 = vpop.f32.mrf.mxu1 }
 0x133   : > { %1034 = vst [vmem:[#allocation2 + $0x50] sm:$0xff] %v1018_v18  ;;  %v971_v23 = vadd.f32 %v1412_v19, %v1348_v16  ;;  %v1350_v24 = vpop.f32.mrf.mxu0 }
 0x134   : > { %v1351_v25 = vadd.f32 %v1350_v24, %v1349_v20  ;;  %v1414_v26 = vpop.f32.mrf.mxu1  ;;  %v368_v20 = vld [vmem:[#allocation2 + $0x60] sm:$0xff] }
 0x135   : > { %v1019_v27 = vadd.f32 %v971_v23, %v361_v21  ;;  %v1415_v28 = vadd.f32 %v1414_v26, %v1413_v22  ;;  %v1352_v29 = vpop.f32.mrf.mxu0 }
 0x136   : > { %v1416_v31 = vpop.f32.mrf.mxu1 }
 0x137   : > { %1035 = vst [vmem:[#allocation2 + $0x68] sm:$0xff] %v1019_v27  ;;  %v976_v32 = vadd.f32 %v1415_v28, %v1351_v25  ;;  %v1353_v33 = vpop.f32.mrf.mxu0 }
 0x138   : > { %v1354_v34 = vadd.f32 %v1353_v33, %v1352_v29  ;;  %v1417_v35 = vpop.f32.mrf.mxu1  ;;  %v369_v29 = vld [vmem:[#allocation2 + $0x70] sm:$0xff] }
 0x139   : > { %v1020_v36 = vadd.f32 %v976_v32, %v362_v30  ;;  %v1418_v37 = vadd.f32 %v1417_v35, %v1416_v31  ;;  %v1355_v38 = vpop.f32.mrf.mxu0 }
 0x13a   : > { %v1419_v40 = vpop.f32.mrf.mxu1 }
 0x13b   : > { %1036 = vst [vmem:[#allocation2 + $0x8] sm:$0xff] %v1020_v36  ;;  %v979_v41 = vadd.f32 %v1418_v37, %v1354_v34  ;;  %v1356_v42 = vpop.f32.mrf.mxu0 }
 0x13c   : > { %v1357_v43 = vadd.f32 %v1356_v42, %v1355_v38  ;;  %v1420_v44 = vpop.f32.mrf.mxu1  ;;  %v370_v38 = vld [vmem:[#allocation2 + $0x78] sm:$0xff] }
 0x13d   : > { %v1021_v45 = vadd.f32 %v979_v41, %v363_v39  ;;  %v1421_v46 = vadd.f32 %v1420_v44, %v1419_v40  ;;  %v1358_v47 = vpop.f32.mrf.mxu0 }
 0x13e   : > { %v1422_v49 = vpop.f32.mrf.mxu1 }
 0x13f   : > { %1037 = vst [vmem:[#allocation2 + $0x48] sm:$0xff] %v1021_v45  ;;  %v984_v50 = vadd.f32 %v1421_v46, %v1357_v43  ;;  %v1359_v51 = vpop.f32.mrf.mxu0  ;;  %v371_v46 = vld [vmem:[#allocation2 + $0x28] sm:$0xff] }
 0x140   : > { %v1360_v52 = vadd.f32 %v1359_v51, %v1358_v47  ;;  %v1423_v53 = vpop.f32.mrf.mxu1 }
 0x141   : > { %v1022_v54 = vadd.f32 %v984_v50, %v364_v48  ;;  %v1424_v55 = vadd.f32 %v1423_v53, %v1422_v49  ;;  %v1361_v56 = vpop.f32.mrf.mxu0 }
 0x142   : > { %v1425_v58 = vpop.f32.mrf.mxu1 }
 0x143   : > { %1038 = vst [vmem:[#allocation2 + $0x40] sm:$0xff] %v1022_v54  ;;  %v987_v59 = vadd.f32 %v1424_v55, %v1360_v52  ;;  %v1362_v60 = vpop.f32.mrf.mxu0 }
 0x144   : > { %v1363_v61 = vadd.f32 %v1362_v60, %v1361_v56  ;;  %v1426_v62 = vpop.f32.mrf.mxu1 }
 0x145   : > { %v1023_v63 = vadd.f32 %v987_v59, %v365_v57  ;;  %v1427_v0 = vadd.f32 %v1426_v62, %v1425_v58  ;;  %v1364_v1 = vpop.f32.mrf.mxu0 }
 0x146   : > { %v1428_v3 = vpop.f32.mrf.mxu1 }
 0x147   : > { %1039 = vst [vmem:[#allocation2 + $0x20] sm:$0xff] %v1023_v63  ;;  %v992_v4 = vadd.f32 %v1427_v0, %v1363_v61  ;;  %v1365_v5 = vpop.f32.mrf.mxu0 }
 0x148   : > { %v1366_v6 = vadd.f32 %v1365_v5, %v1364_v1  ;;  %v1429_v7 = vpop.f32.mrf.mxu1 }
 0x149   : > { %v1024_v8 = vadd.f32 %v992_v4, %v366_v2  ;;  %v1430_v9 = vadd.f32 %v1429_v7, %v1428_v3  ;;  %v1367_v10 = vpop.f32.mrf.mxu0 }
 0x14a   : > { %v1431_v12 = vpop.f32.mrf.mxu1 }
 0x14b   : > { %1040 = vst [vmem:[#allocation2 + $0x10] sm:$0xff] %v1024_v8  ;;  %v995_v13 = vadd.f32 %v1430_v9, %v1366_v6  ;;  %v1368_v14 = vpop.f32.mrf.mxu0 }
 0x14c   : > { %v1369_v15 = vadd.f32 %v1368_v14, %v1367_v10  ;;  %v1432_v16 = vpop.f32.mrf.mxu1 }
 0x14d   : > { %v1025_v17 = vadd.f32 %v995_v13, %v367_v11  ;;  %v1433_v18 = vadd.f32 %v1432_v16, %v1431_v12  ;;  %v1370_v19 = vpop.f32.mrf.mxu0 }
 0x14e   : > { %v1434_v21 = vpop.f32.mrf.mxu1 }
 0x14f   : > { %1041 = vst [vmem:[#allocation2 + $0x38] sm:$0xff] %v1025_v17  ;;  %v1000_v22 = vadd.f32 %v1433_v18, %v1369_v15  ;;  %v1371_v23 = vpop.f32.mrf.mxu0 }
 0x150   : > { %v1372_v24 = vadd.f32 %v1371_v23, %v1370_v19  ;;  %v1435_v25 = vpop.f32.mrf.mxu1 }
 0x151   : > { %v1026_v26 = vadd.f32 %v1000_v22, %v368_v20  ;;  %v1436_v27 = vadd.f32 %v1435_v25, %v1434_v21  ;;  %v1373_v28 = vpop.f32.mrf.mxu0 }
 0x152   : > { %v1437_v30 = vpop.f32.mrf.mxu1 }
 0x153   : > { %1042 = vst [vmem:[#allocation2 + $0x60] sm:$0xff] %v1026_v26  ;;  %v1003_v31 = vadd.f32 %v1436_v27, %v1372_v24  ;;  %v1374_v32 = vpop.f32.mrf.mxu0 }
 0x154   : > { %v1375_v33 = vadd.f32 %v1374_v32, %v1373_v28  ;;  %v1438_v34 = vpop.f32.mrf.mxu1 }
 0x155   : > { %v1027_v35 = vadd.f32 %v1003_v31, %v369_v29  ;;  %v1439_v36 = vadd.f32 %v1438_v34, %v1437_v30  ;;  %v1376_v37 = vpop.f32.mrf.mxu0 }
 0x156   : > { %v1440_v39 = vpop.f32.mrf.mxu1 }
 0x157   : > { %1043 = vst [vmem:[#allocation2 + $0x70] sm:$0xff] %v1027_v35  ;;  %v1008_v40 = vadd.f32 %v1439_v36, %v1375_v33  ;;  %v1377_v41 = vpop.f32.mrf.mxu0 }
 0x158   : > { %v1378_v42 = vadd.f32 %v1377_v41, %v1376_v37  ;;  %v1441_v43 = vpop.f32.mrf.mxu1 }
 0x159   : > { %v1028_v44 = vadd.f32 %v1008_v40, %v370_v38  ;;  %v1442_v45 = vadd.f32 %v1441_v43, %v1440_v39 }
 0x15b   : > { %1044 = vst [vmem:[#allocation2 + $0x78] sm:$0xff] %v1028_v44  ;;  %v1011_v47 = vadd.f32 %v1442_v45, %v1378_v42  ;;  %1049 = sbr.rel (%p1308_p11) target bundleno = 365 (0x16d), region = 63 }
 0x15d   : > { %v1029_v48 = vadd.f32 %v1011_v47, %v371_v46 }
 0x15f   : > { %1045 = vst [vmem:[#allocation2 + $0x28] sm:$0xff] %v1029_v48 }
 0x160   : > { %v1050_v49 = vld [vmem:[#allocation2 + $0x30] sm:$0xff]  ;;  %v1309_v50 = vld [vmem:[%s1881_s2] ss:$0 sm:$0xff]  ;;  %v1052_v54 = vld [vmem:[#allocation2 + $0x58] sm:$0xff] }
 0x161   : > { %v1051_v51 = vld [vmem:[#allocation2] sm:$0xff]  ;;  %v1073_v52 = vadd.f32 %v1309_v50, %v1050_v49  ;;  %v1053_v55 = vld [vmem:[#allocation2 + $0x18] sm:$0xff]  ;;  %v1054_v56 = vld [vmem:[#allocation2 + $0x50] sm:$0xff]  ;;  %v1075_v57 = vadd.f32 %v1309_v50, %v1052_v54 }
 0x162   : > { %v1074_v53 = vadd.f32 %v1309_v50, %v1051_v51  ;;  %v1076_v58 = vadd.f32 %v1309_v50, %v1053_v55  ;;  %v1077_v59 = vadd.f32 %v1309_v50, %v1054_v56  ;;  %v1055_v60 = vld [vmem:[#allocation2 + $0x68] sm:$0xff]  ;;  %v1058_v3 = vld [vmem:[#allocation2 + $0x40] sm:$0xff]  ;;  %v1060_v5 = vld [vmem:[#allocation2 + $0x10] sm:$0xff] }
 0x163   : > { %v1056_v61 = vld [vmem:[#allocation2 + $0x8] sm:$0xff]  ;;  %v1089_v63 = vmax.f32 %v1073_v52, 0.0  ;;  %v1078_v1 = vadd.f32 %v1309_v50, %v1055_v60  ;;  %v1059_v4 = vld [vmem:[#allocation2 + $0x20] sm:$0xff]  ;;  %v1091_v6 = vmax.f32 %v1075_v57, 0.0  ;;  %v1061_v10 = vld [vmem:[#allocation2 + $0x38] sm:$0xff]  ;;  %v1081_v15 = vadd.f32 %v1309_v50, %v1058_v3 }
 0x164   : > { %v1057_v62 = vld [vmem:[#allocation2 + $0x48] sm:$0xff]  ;;  %v1090_v0 = vmax.f32 %v1074_v53, 0.0  ;;  %v1079_v2 = vadd.f32 %v1309_v50, %v1056_v61  ;;  %v1092_v7 = vmax.f32 %v1076_v58, 0.0  ;;  %v1093_v8 = vmax.f32 %v1077_v59, 0.0  ;;  %v1062_v11 = vld [vmem:[#allocation2 + $0x60] sm:$0xff]  ;;  %v1063_v12 = vld [vmem:[#allocation2 + $0x70] sm:$0xff] }
 0x165   : > { %v1080_v9 = vadd.f32 %v1309_v50, %v1057_v62  ;;  %1105 = vst [vmem:[%s1882_s3] sm:$0xff] %v1089_v63  ;;  %v1094_v13 = vmax.f32 %v1078_v1, 0.0  ;;  %v1082_v16 = vadd.f32 %v1309_v50, %v1059_v4  ;;  %v1064_v17 = vld [vmem:[#allocation2 + $0x78] sm:$0xff]  ;;  %1107 = vst [vmem:[%s1882_s3 + $0x10] sm:$0xff] %v1091_v6  ;;  %v1083_v20 = vadd.f32 %v1309_v50, %v1060_v5 }
 0x166   : > { %1106 = vst [vmem:[%s1882_s3 + $0x8] sm:$0xff] %v1090_v0  ;;  %v1095_v14 = vmax.f32 %v1079_v2, 0.0  ;;  %v1065_v18 = vld [vmem:[#allocation2 + $0x28] sm:$0xff]  ;;  %1108 = vst [vmem:[%s1882_s3 + $0x18] sm:$0xff] %v1092_v7  ;;  %v1084_v21 = vadd.f32 %v1309_v50, %v1061_v10  ;;  %v1085_v22 = vadd.f32 %v1309_v50, %v1062_v11  ;;  %v1097_v23 = vmax.f32 %v1081_v15, 0.0 }
 0x167   : > { %1109 = vst [vmem:[%s1882_s3 + $0x20] sm:$0xff] %v1093_v8  ;;  %v1096_v19 = vmax.f32 %v1080_v9, 0.0  ;;  %1110 = vst [vmem:[%s1882_s3 + $0x28] sm:$0xff] %v1094_v13  ;;  %v1098_v24 = vmax.f32 %v1082_v16, 0.0  ;;  %v1086_v25 = vadd.f32 %v1309_v50, %v1063_v12  ;;  %v1087_v26 = vadd.f32 %v1309_v50, %v1064_v17 }
 0x168   : > { %1111 = vst [vmem:[%s1882_s3 + $0x30] sm:$0xff] %v1095_v14  ;;  %v1099_v27 = vmax.f32 %v1083_v20, 0.0  ;;  %v1100_v28 = vmax.f32 %v1084_v21, 0.0  ;;  %v1101_v29 = vmax.f32 %v1085_v22, 0.0  ;;  %v1088_v30 = vadd.f32 %v1309_v50, %v1065_v18  ;;  %1113 = vst [vmem:[%s1882_s3 + $0x40] sm:$0xff] %v1097_v23 }
 0x169   : > { %1112 = vst [vmem:[%s1882_s3 + $0x38] sm:$0xff] %v1096_v19  ;;  %1114 = vst [vmem:[%s1882_s3 + $0x48] sm:$0xff] %v1098_v24  ;;  %v1102_v31 = vmax.f32 %v1086_v25, 0.0  ;;  %v1103_v32 = vmax.f32 %v1087_v26, 0.0 }
 0x16a   : > { %1115 = vst [vmem:[%s1882_s3 + $0x50] sm:$0xff] %v1099_v27  ;;  %1116 = vst [vmem:[%s1882_s3 + $0x58] sm:$0xff] %v1100_v28  ;;  %v1104_v33 = vmax.f32 %v1088_v30, 0.0 }
 0x16b   : > { %1117 = vst [vmem:[%s1882_s3 + $0x60] sm:$0xff] %v1101_v29  ;;  %1118 = vst [vmem:[%s1882_s3 + $0x68] sm:$0xff] %v1102_v31 }
 0x16c   : > { %1119 = vst [vmem:[%s1882_s3 + $0x70] sm:$0xff] %v1103_v32  ;;  %1120 = vst [vmem:[%s1882_s3 + $0x78] sm:$0xff] %v1104_v33 }
 0x16d PF: > { %s13_s16 = sadd.s32 1, %s1602_s16   ;;  %s1883_s12 = smov %s1590_s13 }
 0x16e   : > { %p10_p12 = scmp.ge.s32.totalorder %s13_s16, 4   ;;  %s1884_s13 = smov %s1660_s20 }
 0x16f   : > { %s1885_s14 = smov %s1598_s15  ;;  %s1886_s15 = smov %s1888_s17 }
 0x170   :  { %12 = sbr.rel (!%p10_p12) target bundleno = 3 (0x3), region = 104 }

// kernel: model_forward.23
= control target key start
LH: loop header
LB: loop body
LE: loop exit
PB: predicated region body
PF: predicated region fallthrough
CT: control target
= control target key end

     0   :  { %s1517_s12 = smov 0   ;;  %s1519_s13 = smov 0   ;;  %s1755_s0 = inlined_call_operand.vmem [shape: bf16[128,1152], index: 0, kind: input, shape index: {}]   ;;  %s1756_s1 = inlined_call_operand.vmem [shape: bf16[1152,128], index: 1, kind: input, shape index: {}]   ;;  %s1757_s2 = inlined_call_operand.vmem [shape: f32[1,128], index: 2, kind: input, shape index: {}]   ;;  %s1758_s3 = inlined_call_operand.vmem [shape: f32[128,128], index: 3, kind: output, shape index: {}]  }
   0x1   :  { %s1521_s14 = smov 0   ;;  %s1523_s15 = smov 0  }
   0x2   :  { %s1525_s16 = smov 0  }
   0x3 LB: > { %s25_s17 = sadd.s32 1, %s1490_s15  ;;  %p48_p1 = scmp.ne.s32.totalorder %s1482_s13, %s1478_s12  ;;  %s1494_s16 = sphi %s1525_s16, %s13_s16   ;;  %s1490_s15 = sphi %s1523_s15, %s1762_s15   ;;  %s1486_s14 = sphi %s1521_s14, %s1761_s14   ;;  %s1482_s13 = sphi %s1519_s13, %s1760_s13   ;;  %s1478_s12 = sphi %s1517_s12, %s1759_s12  }
   0x4   : > { %p26_p0 = scmp.ge.s32.totalorder %s25_s17, 3  ;;  %p49_p2 = scmp.eq.s32.totalorder %s1494_s16, 0 }
   0x5   : > { %s41_s19 = sadd.s32 1, %s1482_s13  ;;  %p1153_p5 = scmp.ge.s32.totalorder %s1494_s16, 3 }
   0x6   : > { %s1764_s17 = smov (%p26_p0, %s25_s17), 0  ;;  %p50_p3 = por %p49_p2, %p48_p1 }
   0x7   : > { %s37_s18 = ssub.s32 %s1490_s15, %s1764_s17  ;;  %162 = sbr.rel (%p1153_p5) target bundleno = 35 (0x23), region = 20 }
   0x8   : > { %p39_p4 = scmp.eq.s32.totalorder %s37_s18, 0 }
   0xa   : > { %s1552_s20 = scalar_select %p39_p4, %s1482_s13, %s41_s19  }
   0xc   : > { %165 = sbr.rel (!%p50_p3) target bundleno = 35 (0x23), region = 24  ;;  %s167_s21 = sand.u32 (%p50_p3), 1, %s1482_s13  }
   0xd   : > { %s1244_s22 = smul.u32 (%p50_p3), 12, %s1490_s15 }
   0xe   : > { %s1357_s23 = smul.u32 (%p50_p3), 192, %s167_s21 }
   0xf   : > { %s1560_s26 = scalar_lea.vmem (%p50_p3), %s1755_s0, %s1244_s22 }
  0x10   : > { %v190_v0 = vld [vmem:[%s1560_s26] sm:$0xff] (%p50_p3)  ;;  %v194_v2 = vld [vmem:[%s1560_s26 + $0x48] sm:$0xff] (%p50_p3)  ;;  %s1565_s27 = scalar_lea.vmem (%p50_p3), [#allocation3], %s1357_s23  ;;  %v198_v4 = vld [vmem:[%s1560_s26 + $0x90] sm:$0xff] (%p50_p3) }
  0x11   : > { %v192_v1 = vld [vmem:[%s1560_s26 + $0x24] sm:$0xff]  ;;  %191 = vst [vmem:[%s1565_s27] sm:$0xff] %v190_v0  ;;  %195 = vst [vmem:[%s1565_s27 + $0x18] sm:$0xff] %v194_v2  ;;  %v196_v3 = vld [vmem:[%s1560_s26 + $0x6c] sm:$0xff] }
  0x12   : > { %193 = vst [vmem:[%s1565_s27 + $0xc] sm:$0xff] %v192_v1  ;;  %v200_v5 = vld [vmem:[%s1560_s26 + $0xb4] sm:$0xff]  ;;  %197 = vst [vmem:[%s1565_s27 + $0x24] sm:$0xff] %v196_v3  ;;  %v204_v7 = vld [vmem:[%s1560_s26 + $0xfc] sm:$0xff] }
  0x13   : > { %199 = vst [vmem:[%s1565_s27 + $0x30] sm:$0xff] %v198_v4  ;;  %201 = vst [vmem:[%s1565_s27 + $0x3c] sm:$0xff] %v200_v5  ;;  %v202_v6 = vld [vmem:[%s1560_s26 + $0xd8] sm:$0xff]  ;;  %v206_v8 = vld [vmem:[%s1560_s26 + $0x120] sm:$0xff] }
  0x14   : > { %203 = vst [vmem:[%s1565_s27 + $0x48] sm:$0xff] %v202_v6  ;;  %205 = vst [vmem:[%s1565_s27 + $0x54] sm:$0xff] %v204_v7  ;;  %v208_v9 = vld [vmem:[%s1560_s26 + $0x144] sm:$0xff]  ;;  %v212_v11 = vld [vmem:[%s1560_s26 + $0x18c] sm:$0xff] }
  0x15   : > { %207 = vst [vmem:[%s1565_s27 + $0x60] sm:$0xff] %v206_v8  ;;  %v210_v10 = vld [vmem:[%s1560_s26 + $0x168] sm:$0xff]  ;;  %209 = vst [vmem:[%s1565_s27 + $0x6c] sm:$0xff] %v208_v9  ;;  %v214_v12 = vld [vmem:[%s1560_s26 + $0x1b0] sm:$0xff] }
  0x16   : > { %211 = vst [vmem:[%s1565_s27 + $0x78] sm:$0xff] %v210_v10  ;;  %213 = vst [vmem:[%s1565_s27 + $0x84] sm:$0xff] %v212_v11  ;;  %v216_v13 = vld [vmem:[%s1560_s26 + $0x1d4] sm:$0xff]  ;;  %v220_v15 = vld [vmem:[%s1560_s26 + $0x21c] sm:$0xff] }
  0x17   : > { %v218_v14 = vld [vmem:[%s1560_s26 + $0x1f8] sm:$0xff]  ;;  %215 = vst [vmem:[%s1565_s27 + $0x90] sm:$0xff] %v214_v12  ;;  %217 = vst [vmem:[%s1565_s27 + $0x9c] sm:$0xff] %v216_v13  ;;  %v1155_v16 = vld [vmem:[%s1560_s26 + $0x8] sm:$0xf] }
  0x18   : > { %219 = vst [vmem:[%s1565_s27 + $0xa8] sm:$0xff] %v218_v14  ;;  %v1157_v17 = vld [vmem:[%s1560_s26 + $0x2c] sm:$0xf]  ;;  %221 = vst [vmem:[%s1565_s27 + $0xb4] sm:$0xff] %v220_v15  ;;  %v1159_v18 = vld [vmem:[%s1560_s26 + $0x50] sm:$0xf] }
  0x19   : > { %1156 = vst [vmem:[%s1565_s27 + $0x8] sm:$0xf] %v1155_v16  ;;  %1158 = vst [vmem:[%s1565_s27 + $0x14] sm:$0xf] %v1157_v17  ;;  %v1161_v19 = vld [vmem:[%s1560_s26 + $0x74] sm:$0xf] }
  0x1a   : > { %v1163_v20 = vld [vmem:[%s1560_s26 + $0x98] sm:$0xf]  ;;  %1160 = vst [vmem:[%s1565_s27 + $0x20] sm:$0xf] %v1159_v18  ;;  %1162 = vst [vmem:[%s1565_s27 + $0x2c] sm:$0xf] %v1161_v19 }
  0x1b   : > { %1164 = vst [vmem:[%s1565_s27 + $0x38] sm:$0xf] %v1163_v20  ;;  %v1165_v21 = vld [vmem:[%s1560_s26 + $0xbc] sm:$0xf]  ;;  %v1167_v22 = vld [vmem:[%s1560_s26 + $0xe0] sm:$0xf] }
  0x1c   : > { %v1169_v23 = vld [vmem:[%s1560_s26 + $0x104] sm:$0xf]  ;;  %1166 = vst [vmem:[%s1565_s27 + $0x44] sm:$0xf] %v1165_v21  ;;  %1168 = vst [vmem:[%s1565_s27 + $0x50] sm:$0xf] %v1167_v22 }
  0x1d   : > { %1170 = vst [vmem:[%s1565_s27 + $0x5c] sm:$0xf] %v1169_v23  ;;  %v1171_v24 = vld [vmem:[%s1560_s26 + $0x128] sm:$0xf]  ;;  %v1173_v25 = vld [vmem:[%s1560_s26 + $0x14c] sm:$0xf] }
  0x1e   : > { %v1175_v26 = vld [vmem:[%s1560_s26 + $0x170] sm:$0xf]  ;;  %1172 = vst [vmem:[%s1565_s27 + $0x68] sm:$0xf] %v1171_v24  ;;  %1174 = vst [vmem:[%s1565_s27 + $0x74] sm:$0xf] %v1173_v25 }
  0x1f   : > { %1176 = vst [vmem:[%s1565_s27 + $0x80] sm:$0xf] %v1175_v26  ;;  %v1177_v27 = vld [vmem:[%s1560_s26 + $0x194] sm:$0xf]  ;;  %v1179_v28 = vld [vmem:[%s1560_s26 + $0x1b8] sm:$0xf] }
  0x20   : > { %v1181_v29 = vld [vmem:[%s1560_s26 + $0x1dc] sm:$0xf]  ;;  %1178 = vst [vmem:[%s1565_s27 + $0x8c] sm:$0xf] %v1177_v27  ;;  %1180 = vst [vmem:[%s1565_s27 + $0x98] sm:$0xf] %v1179_v28 }
  0x21   : > { %1182 = vst [vmem:[%s1565_s27 + $0xa4] sm:$0xf] %v1181_v29  ;;  %v1183_v30 = vld [vmem:[%s1560_s26 + $0x200] sm:$0xf]  ;;  %v1185_v31 = vld [vmem:[%s1560_s26 + $0x224] sm:$0xf] }
  0x22   : > { %1184 = vst [vmem:[%s1565_s27 + $0xb0] sm:$0xf] %v1183_v30  ;;  %1186 = vst [vmem:[%s1565_s27 + $0xbc] sm:$0xf] %v1185_v31 }
  0x23 PF: > { %p1187_p6 = scmp.ge.s32.totalorder %s1494_s16, 1  ;;  %p278_p7 = scmp.lt.s32.totalorder %s1494_s16, 4 }
  0x25   : > { %p279_p8 = pnand %p1187_p6, %p278_p7 }
  0x26   : > { %s285_s28 = sand.u32 (!%p279_p8), 1, %s1478_s12   ;;  %s324_s29 = smul.u32 (!%p279_p8), 48, %s1486_s14 }
  0x27   : > { %282 = sbr.rel (%p279_p8) target bundleno = 366 (0x16e), region = 54  ;;  %p1189_p10 = scmp.ne.s32.totalorder (!%p279_p8), %s1486_s14, 0 }
  0x28   : > { %s1358_s30 = smul.u32 (!%p279_p8), 192, %s285_s28  ;;  %p325_p9 = scmp.lt.s32.totalorder (!%p279_p8), %s324_s29, 143 }
  0x2a   : > { %s1637_s8 = scalar_lea.vmem (!%p279_p8), [#allocation3], %s1358_s30 }
  0x2c   : > { %s1766_s29 = smov (!%p325_p9, %s324_s29), 143  ;;  %349 = sbr.rel (%p1189_p10) target bundleno = 58 (0x3a), region = 62 }
  0x2d   : > { %s1188_s4 = sshll.u32 %s1766_s29, 2 }
  0x2e   : > { %s1635_s7 = scalar_lea.vmem %s1756_s1, %s1188_s4 }
  0x31   : > { %v1496_v32 = vmov 0.0  }
  0x32   : > { %350 = vst [vmem:[#allocation2 + $0x30] sm:$0xff] %v1496_v32  ;;  %351 = vst [vmem:[#allocation2] sm:$0xff] %v1496_v32 }
  0x33   : > { %352 = vst [vmem:[#allocation2 + $0x58] sm:$0xff] %v1496_v32  ;;  %353 = vst [vmem:[#allocation2 + $0x18] sm:$0xff] %v1496_v32 }
  0x34   : > { %354 = vst [vmem:[#allocation2 + $0x50] sm:$0xff] %v1496_v32  ;;  %355 = vst [vmem:[#allocation2 + $0x68] sm:$0xff] %v1496_v32 }
  0x35   : > { %356 = vst [vmem:[#allocation2 + $0x8] sm:$0xff] %v1496_v32  ;;  %357 = vst [vmem:[#allocation2 + $0x48] sm:$0xff] %v1496_v32 }
  0x36   : > { %358 = vst [vmem:[#allocation2 + $0x40] sm:$0xff] %v1496_v32  ;;  %359 = vst [vmem:[#allocation2 + $0x20] sm:$0xff] %v1496_v32 }
  0x37   : > { %360 = vst [vmem:[#allocation2 + $0x10] sm:$0xff] %v1496_v32  ;;  %361 = vst [vmem:[#allocation2 + $0x38] sm:$0xff] %v1496_v32 }
  0x38   : > { %362 = vst [vmem:[#allocation2 + $0x60] sm:$0xff] %v1496_v32  ;;  %363 = vst [vmem:[#allocation2 + $0x70] sm:$0xff] %v1496_v32 }
  0x39   : > { %364 = vst [vmem:[#allocation2 + $0x78] sm:$0xff] %v1496_v32  ;;  %365 = vst [vmem:[#allocation2 + $0x28] sm:$0xff] %v1496_v32 }
  0x3a PF: > { %v1400_v33 = vld [vmem:[%s1635_s7 + $0x78] sm:$0xff]   ;;  %v1403_v36 = vld [vmem:[%s1635_s7 + $0x70] sm:$0xff]   ;;  %v1406_v39 = vld [vmem:[%s1635_s7 + $0x68] sm:$0xff]   ;;  %p1238_p11 = scmp.ne.s32.totalorder %s1486_s14, 2 }
  0x3b   : > { %v1401_v34 = vld [vmem:[%s1635_s7 + $0x38] sm:$0xff]   ;;  %1245 = vmatprep.subr.bf16.mxu0 %v1400_v33  ;;  %v1404_v37 = vld [vmem:[%s1635_s7 + $0x30] sm:$0xff]   ;;  %v1407_v40 = vld [vmem:[%s1635_s7 + $0x28] sm:$0xff]  }
  0x3c   : > { %v1402_v35 = vld [vmem:[%s1635_s7 + $0xb8] sm:$0xff]   ;;  %1246 = vmatpush3.bf16.msra.mxu0 %v1401_v34  ;;  %v1405_v38 = vld [vmem:[%s1635_s7 + $0xb0] sm:$0xff]   ;;  %v1408_v41 = vld [vmem:[%s1635_s7 + $0xa8] sm:$0xff]  }
  0x3d   : > { %1325 = vmatprep.subr.bf16.mxu1 %v1402_v35  ;;  %1247 = vmatprep.subr.bf16.mxu0 %v1403_v36  ;;  %v1409_v42 = vld [vmem:[%s1635_s7 + $0x60] sm:$0xff]   ;;  %v1412_v45 = vld [vmem:[%s1635_s7 + $0x58] sm:$0xff]   ;;  %v1415_v48 = vld [vmem:[%s1635_s7 + $0x50] sm:$0xff]  }
  0x3e   : > { %1326 = vmatpush3.bf16.msra.mxu1 %v1402_v35  ;;  %v1410_v43 = vld [vmem:[%s1635_s7 + $0x20] sm:$0xff]   ;;  %v1414_v46 = vld [vmem:[%s1635_s7 + $0x98] sm:$0xff]   ;;  %v1417_v49 = vld [vmem:[%s1635_s7 + $0x90] sm:$0xff]  }
  0x3f   : > { %1327 = vmatprep.subr.bf16.mxu1 %v1405_v38  ;;  %v1411_v44 = vld [vmem:[%s1635_s7 + $0xa0] sm:$0xff]   ;;  %v1413_v47 = vld [vmem:[%s1635_s7 + $0x18] sm:$0xff]   ;;  %v1416_v50 = vld [vmem:[%s1635_s7 + $0x10] sm:$0xff]  }
  0x40   : > { %1248 = vmatpush3.bf16.msra.mxu0 %v1404_v37  ;;  %v1418_v51 = vld [vmem:[%s1635_s7 + $0x48] sm:$0xff]   ;;  %v1421_v54 = vld [vmem:[%s1635_s7 + $0x40] sm:$0xff]   ;;  %v1436_v1 = vld [vmem:[%s1637_s8 + $0x50] ss:$12 sps:$4 sm:$0xff]  }
  0x41   : > { %1249 = vmatprep.subr.bf16.mxu0 %v1406_v39  ;;  %v1419_v52 = vld [vmem:[%s1635_s7 + $0x8] sm:$0xff]   ;;  %v1423_v55 = vld [vmem:[%s1635_s7 + $0x80] sm:$0xff]   ;;  %v1434_v3 = vld [vmem:[%s1637_s8 + $0x30] ss:$12 sps:$4 sm:$0xff]  }
  0x42   : > { %1328 = vmatpush3.bf16.msra.mxu1 %v1405_v38  ;;  %v1420_v53 = vld [vmem:[%s1635_s7 + $0x88] sm:$0xff]   ;;  %v1426_v56 = vld [vmem:[%s1637_s8 + $0x4] ss:$12 sps:$4 sm:$0xff]   ;;  %v1432_v0 = vld [vmem:[%s1637_s8 + $0x34] ss:$12 sps:$4 sm:$0xff]  }
  0x43   : > { %1329 = vmatprep.subr.bf16.mxu1 %v1408_v41  ;;  %v1427_v57 = vld [vmem:[%s1637_s8 + $0x8] ss:$12 sps:$4 sm:$0xff]   ;;  %v1422_v58 = vld [vmem:[%s1635_s7] sm:$0xff]   ;;  %766 = vmatprep.mubr.bf16.mxu0 %v1426_v56  ;;  %v1437_v4 = vld [vmem:[%s1637_s8 + $0x4c] ss:$12 sps:$4 sm:$0xff]  }
  0x44   : > { %1250 = vmatpush3.bf16.msra.mxu0 %v1407_v40  ;;  %1341 = vmatprep.mubr.bf16.mxu1 %v1427_v57  ;;  %v1424_v59 = vld [vmem:[%s1637_s8] ss:$12 sps:$4 sm:$0xff]   ;;  %v1429_v60 = vld [vmem:[%s1637_s8 + $0x1c] ss:$12 sps:$4 sm:$0xff]   ;;  %v1435_v62 = vld [vmem:[%s1637_s8 + $0x38] ss:$12 sps:$4 sm:$0xff]  }
  0x45   : > { %1251 = vmatprep.subr.bf16.mxu0 %v1409_v42  ;;  %v1428_v61 = vld [vmem:[%s1637_s8 + $0x20] ss:$12 sps:$4 sm:$0xff]   ;;  %v1431_v63 = vld [vmem:[%s1637_s8 + $0x18] ss:$12 sps:$4 sm:$0xff]   ;;  %v1443_v2 = vld [vmem:[%s1637_s8 + $0x68] ss:$12 sps:$4 sm:$0xff]  }
  0x46   : > { %1330 = vmatpush3.bf16.msra.mxu1 %v1408_v41  ;;  %v1444_v5 = vld [vmem:[%s1637_s8 + $0x80] ss:$12 sps:$4 sm:$0xff]   ;;  %v1451_v6 = vld [vmem:[%s1637_s8 + $0x98] ss:$12 sps:$4 sm:$0xff]   ;;  %v1439_v7 = vld [vmem:[%s1637_s8 + $0x48] ss:$12 sps:$4 sm:$0xff]  }
  0x47   : > { %1331 = vmatprep.subr.bf16.mxu1 %v1411_v44  ;;  %v1440_v8 = vld [vmem:[%s1637_s8 + $0x64] ss:$12 sps:$4 sm:$0xff]   ;;  %v1442_v10 = vld [vmem:[%s1637_s8 + $0x60] ss:$12 sps:$4 sm:$0xff]   ;;  %v1445_v11 = vld [vmem:[%s1637_s8 + $0x7c] ss:$12 sps:$4 sm:$0xff]  }
  0x48   : > { %1252 = vmatpush3.bf16.msra.mxu0 %v1410_v43  ;;  %v1452_v9 = vld [vmem:[%s1637_s8 + $0xb0] ss:$12 sps:$4 sm:$0xff]   ;;  %v1447_v12 = vld [vmem:[%s1637_s8 + $0x78] ss:$12 sps:$4 sm:$0xff]   ;;  %v1448_v13 = vld [vmem:[%s1637_s8 + $0x94] ss:$12 sps:$4 sm:$0xff]  }
  0x49   : > { %1253 = vmatprep.subr.bf16.mxu0 %v1412_v45  ;;  %v1450_v14 = vld [vmem:[%s1637_s8 + $0x90] ss:$12 sps:$4 sm:$0xff]   ;;  %v1453_v15 = vld [vmem:[%s1637_s8 + $0xac] ss:$12 sps:$4 sm:$0xff]   ;;  %v1455_v16 = vld [vmem:[%s1637_s8 + $0xa8] ss:$12 sps:$4 sm:$0xff]  }
  0x4a   : > { %1332 = vmatpush3.bf16.msra.mxu1 %v1411_v44  ;;  %v366_v22 = vld [vmem:[#allocation2 + $0x30] sm:$0xff]  ;;  %v367_v30 = vld [vmem:[#allocation2] sm:$0xff]  ;;  %v368_v37 = vld [vmem:[#allocation2 + $0x58] sm:$0xff] }
  0x4b   : > { %1333 = vmatprep.subr.bf16.mxu1 %v1414_v46  ;;  %v369_v44 = vld [vmem:[#allocation2 + $0x18] sm:$0xff] }
  0x4c   : > { %1254 = vmatpush3.bf16.msra.mxu0 %v1413_v47 }
  0x4d   : > { %1255 = vmatprep.subr.bf16.mxu0 %v1415_v48 }
  0x4e   : > { %1334 = vmatpush3.bf16.msra.mxu1 %v1414_v46 }
  0x4f   : > { %1335 = vmatprep.subr.bf16.mxu1 %v1417_v49 }
  0x50   : > { %1256 = vmatpush3.bf16.msra.mxu0 %v1416_v50 }
  0x51   : > { %1257 = vmatprep.subr.bf16.mxu0 %v1418_v51 }
  0x52   : > { %1336 = vmatpush3.bf16.msra.mxu1 %v1417_v49 }
  0x53   : > { %1337 = vmatprep.subr.bf16.mxu1 %v1420_v53 }
  0x54   : > { %1258 = vmatpush3.bf16.msra.mxu0 %v1419_v52  ;;  %v370_v52 = vld [vmem:[#allocation2 + $0x50] sm:$0xff] }
  0x55   : > { %1259 = vmatprep.subr.bf16.mxu0 %v1421_v54 }
  0x56   : > { %1338 = vmatpush3.bf16.msra.mxu1 %v1420_v53 }
  0x57   : > { %1339 = vmatprep.subr.bf16.mxu1 %v1423_v55 }
  0x58   : > { %1260 = vmatpush3.bf16.msra.mxu0 %v1422_v58 }
  0x5a   : > { %1340 = vmatpush3.bf16.msra.mxu1 %v1423_v55 }
  0x5b   : > { %767 = vmatmul.mubr.bf16.vlgmr.msra.gmra.mxu0 %v1424_v59  ;;  %v371_v59 = vld [vmem:[#allocation2 + $0x68] sm:$0xff] }
  0x5c   : > { %774 = vmatprep.mubr.bf16.mxu0 %v1429_v60 }
  0x5d   : > { %1342 = vmatmul.mubr.bf16.vlgmr.msra.gmra.mxu1 %v1428_v61 }
  0x5e   : > { %1345 = vmatprep.mubr.bf16.mxu1 %v1435_v62 }
  0x63   : > { %775 = vmatmul.mubr.bf16.gmra.mxu0 %v1431_v63 }
  0x64   : > { %782 = vmatprep.mubr.bf16.mxu0 %v1432_v0 }
  0x65   : > { %1346 = vmatmul.mubr.bf16.gmra.mxu1 %v1436_v1  ;;  %v372_v1 = vld [vmem:[#allocation2 + $0x8] sm:$0xff] }
  0x66   : > { %1349 = vmatprep.mubr.bf16.mxu1 %v1443_v2 }
  0x6b   : > { %783 = vmatmul.mubr.bf16.gmra.mxu0 %v1434_v3 }
  0x6c   : > { %790 = vmatprep.mubr.bf16.mxu0 %v1437_v4 }
  0x6d   : > { %1350 = vmatmul.mubr.bf16.gmra.mxu1 %v1444_v5 }
  0x6e   : > { %1353 = vmatprep.mubr.bf16.mxu1 %v1451_v6 }
  0x73   : > { %791 = vmatmul.mubr.bf16.gmra.mxu0 %v1439_v7 }
  0x74   : > { %798 = vmatprep.mubr.bf16.mxu0 %v1440_v8  ;;  %v373_v8 = vld [vmem:[#allocation2 + $0x48] sm:$0xff] }
  0x75   : > { %1354 = vmatmul.mubr.bf16.gmra.mxu1 %v1452_v9 }
  0x7b   : > { %799 = vmatmul.mubr.bf16.gmra.mxu0 %v1442_v10 }
  0x7c   : > { %806 = vmatprep.mubr.bf16.mxu0 %v1445_v11 }
  0x83   : > { %807 = vmatmul.mubr.bf16.gmra.mxu0 %v1447_v12 }
  0x84   : > { %814 = vmatprep.mubr.bf16.mxu0 %v1448_v13 }
  0x8b   : > { %815 = vmatmul.mubr.bf16.gmra.mxu0 %v1450_v14 }
  0x8c   : > { %822 = vmatprep.mubr.bf16.mxu0 %v1453_v15 }
  0x93   : > { %823 = vmatmul.mubr.bf16.gmra.mxu0 %v1455_v16  ;;  %v374_v16 = vld [vmem:[#allocation2 + $0x40] sm:$0xff] }
 0x11b   : > { %v1261_v17 = vpop.f32.mrf.mxu0 }
 0x11d   : > { %v1262_v18 = vpop.f32.mrf.mxu0  ;;  %v1343_v19 = vpop.f32.mrf.mxu1 }
 0x11e   : > { %v1263_v20 = vadd.f32 %v1262_v18, %v1261_v17 }
 0x11f   : > { %v1264_v21 = vpop.f32.mrf.mxu0  ;;  %v865_v23 = vpop.f32.mrf.mxu1 }
 0x120   : > { %v866_v24 = vadd.f32 %v1263_v20, %v865_v23  ;;  %v375_v23 = vld [vmem:[#allocation2 + $0x20] sm:$0xff] }
 0x121   : > { %v1265_v25 = vpop.f32.mrf.mxu0  ;;  %v1344_v26 = vpop.f32.mrf.mxu1 }
 0x122   : > { %v928_v27 = vadd.f32 %v866_v24, %v366_v22  ;;  %v1266_v28 = vadd.f32 %v1265_v25, %v1264_v21 }
 0x123   : > { %v1267_v29 = vpop.f32.mrf.mxu0  ;;  %v868_v31 = vpop.f32.mrf.mxu1 }
 0x124   : > { %944 = vst [vmem:[#allocation2 + $0x30] sm:$0xff] %v928_v27  ;;  %v869_v32 = vadd.f32 %v1266_v28, %v868_v31 }
 0x125   : > { %v1268_v33 = vpop.f32.mrf.mxu0  ;;  %v1347_v34 = vpop.f32.mrf.mxu1 }
 0x126   : > { %v929_v35 = vadd.f32 %v869_v32, %v367_v30  ;;  %v1269_v36 = vadd.f32 %v1268_v33, %v1267_v29  ;;  %v376_v29 = vld [vmem:[#allocation2 + $0x10] sm:$0xff] }
 0x127   : > { %v1270_v38 = vpop.f32.mrf.mxu0  ;;  %v881_v41 = vpop.f32.mrf.mxu1 }
 0x128   : > { %945 = vst [vmem:[#allocation2] sm:$0xff] %v929_v35  ;;  %v874_v39 = vadd.f32 %v1343_v19, %v1269_v36  ;;  %v377_v36 = vld [vmem:[#allocation2 + $0x38] sm:$0xff] }
 0x129   : > { %v1271_v40 = vpop.f32.mrf.mxu0  ;;  %v1348_v48 = vpop.f32.mrf.mxu1 }
 0x12a   : > { %v930_v42 = vadd.f32 %v874_v39, %v368_v37  ;;  %v1272_v43 = vadd.f32 %v1271_v40, %v1270_v38 }
 0x12b   : > { %v1273_v45 = vpop.f32.mrf.mxu0  ;;  %v884_v55 = vpop.f32.mrf.mxu1 }
 0x12c   : > { %946 = vst [vmem:[#allocation2 + $0x58] sm:$0xff] %v930_v42  ;;  %v877_v46 = vadd.f32 %v1344_v26, %v1272_v43 }
 0x12d   : > { %v1274_v47 = vpop.f32.mrf.mxu0  ;;  %v1351_v62 = vpop.f32.mrf.mxu1 }
 0x12e   : > { %v931_v49 = vadd.f32 %v877_v46, %v369_v44  ;;  %v1275_v50 = vadd.f32 %v1274_v47, %v1273_v45  ;;  %v378_v44 = vld [vmem:[#allocation2 + $0x60] sm:$0xff] }
 0x12f   : > { %v1276_v51 = vpop.f32.mrf.mxu0  ;;  %v897_v5 = vpop.f32.mrf.mxu1 }
 0x130   : > { %947 = vst [vmem:[#allocation2 + $0x18] sm:$0xff] %v931_v49  ;;  %v882_v53 = vadd.f32 %v1275_v50, %v881_v41 }
 0x131   : > { %v1277_v54 = vpop.f32.mrf.mxu0  ;;  %v1352_v12 = vpop.f32.mrf.mxu1 }
 0x132   : > { %v932_v56 = vadd.f32 %v882_v53, %v370_v52  ;;  %v1278_v57 = vadd.f32 %v1277_v54, %v1276_v51  ;;  %v379_v51 = vld [vmem:[#allocation2 + $0x70] sm:$0xff] }
 0x133   : > { %v1279_v58 = vpop.f32.mrf.mxu0  ;;  %v900_v19 = vpop.f32.mrf.mxu1 }
 0x134   : > { %948 = vst [vmem:[#allocation2 + $0x50] sm:$0xff] %v932_v56  ;;  %v885_v60 = vadd.f32 %v1278_v57, %v884_v55  ;;  %v380_v56 = vld [vmem:[#allocation2 + $0x78] sm:$0xff] }
 0x135   : > { %v1280_v61 = vpop.f32.mrf.mxu0  ;;  %v1355_v26 = vpop.f32.mrf.mxu1 }
 0x136   : > { %v933_v63 = vadd.f32 %v885_v60, %v371_v59  ;;  %v1281_v0 = vadd.f32 %v1280_v61, %v1279_v58 }
 0x137   : > { %v1282_v2 = vpop.f32.mrf.mxu0  ;;  %v913_v33 = vpop.f32.mrf.mxu1 }
 0x138   : > { %949 = vst [vmem:[#allocation2 + $0x68] sm:$0xff] %v933_v63  ;;  %v890_v3 = vadd.f32 %v1347_v34, %v1281_v0 }
 0x139   : > { %v1283_v4 = vpop.f32.mrf.mxu0  ;;  %v1356_v40 = vpop.f32.mrf.mxu1 }
 0x13a   : > { %v934_v6 = vadd.f32 %v890_v3, %v372_v1  ;;  %v1284_v7 = vadd.f32 %v1283_v4, %v1282_v2 }
 0x13b   : > { %v1285_v9 = vpop.f32.mrf.mxu0  ;;  %v916_v47 = vpop.f32.mrf.mxu1 }
 0x13c   : > { %950 = vst [vmem:[#allocation2 + $0x8] sm:$0xff] %v934_v6  ;;  %v893_v10 = vadd.f32 %v1348_v48, %v1284_v7 }
 0x13d   : > { %v1286_v11 = vpop.f32.mrf.mxu0 }
 0x13e   : > { %v935_v13 = vadd.f32 %v893_v10, %v373_v8  ;;  %v1287_v14 = vadd.f32 %v1286_v11, %v1285_v9 }
 0x13f   : > { %v1288_v15 = vpop.f32.mrf.mxu0 }
 0x140   : > { %951 = vst [vmem:[#allocation2 + $0x48] sm:$0xff] %v935_v13  ;;  %v898_v17 = vadd.f32 %v1287_v14, %v897_v5 }
 0x141   : > { %v1289_v18 = vpop.f32.mrf.mxu0 }
 0x142   : > { %v936_v20 = vadd.f32 %v898_v17, %v374_v16  ;;  %v1290_v21 = vadd.f32 %v1289_v18, %v1288_v15 }
 0x143   : > { %v1291_v22 = vpop.f32.mrf.mxu0 }
 0x144   : > { %952 = vst [vmem:[#allocation2 + $0x40] sm:$0xff] %v936_v20  ;;  %v901_v24 = vadd.f32 %v1290_v21, %v900_v19 }
 0x145   : > { %v1292_v25 = vpop.f32.mrf.mxu0 }
 0x146   : > { %v937_v27 = vadd.f32 %v901_v24, %v375_v23  ;;  %v1293_v28 = vadd.f32 %v1292_v25, %v1291_v22 }
 0x147   : > { %v1294_v30 = vpop.f32.mrf.mxu0 }
 0x148   : > { %953 = vst [vmem:[#allocation2 + $0x20] sm:$0xff] %v937_v27  ;;  %v906_v31 = vadd.f32 %v1351_v62, %v1293_v28  ;;  %v381_v62 = vld [vmem:[#allocation2 + $0x28] sm:$0xff] }
 0x149   : > { %v1295_v32 = vpop.f32.mrf.mxu0 }
 0x14a   : > { %v938_v34 = vadd.f32 %v906_v31, %v376_v29  ;;  %v1296_v35 = vadd.f32 %v1295_v32, %v1294_v30 }
 0x14b   : > { %v1297_v37 = vpop.f32.mrf.mxu0 }
 0x14c   : > { %954 = vst [vmem:[#allocation2 + $0x10] sm:$0xff] %v938_v34  ;;  %v909_v38 = vadd.f32 %v1352_v12, %v1296_v35 }
 0x14d   : > { %v1298_v39 = vpop.f32.mrf.mxu0 }
 0x14e   : > { %v939_v41 = vadd.f32 %v909_v38, %v377_v36  ;;  %v1299_v42 = vadd.f32 %v1298_v39, %v1297_v37 }
 0x14f   : > { %v1300_v43 = vpop.f32.mrf.mxu0 }
 0x150   : > { %955 = vst [vmem:[#allocation2 + $0x38] sm:$0xff] %v939_v41  ;;  %v914_v45 = vadd.f32 %v1299_v42, %v913_v33 }
 0x151   : > { %v1301_v46 = vpop.f32.mrf.mxu0 }
 0x152   : > { %v940_v48 = vadd.f32 %v914_v45, %v378_v44  ;;  %v1302_v49 = vadd.f32 %v1301_v46, %v1300_v43 }
 0x153   : > { %v1303_v50 = vpop.f32.mrf.mxu0 }
 0x154   : > { %956 = vst [vmem:[#allocation2 + $0x60] sm:$0xff] %v940_v48  ;;  %v917_v52 = vadd.f32 %v1302_v49, %v916_v47 }
 0x155   : > { %v1304_v53 = vpop.f32.mrf.mxu0 }
 0x156   : > { %v941_v54 = vadd.f32 %v917_v52, %v379_v51  ;;  %v1305_v55 = vadd.f32 %v1304_v53, %v1303_v50 }
 0x157   : > { %v1306_v57 = vpop.f32.mrf.mxu0 }
 0x158   : > { %957 = vst [vmem:[#allocation2 + $0x70] sm:$0xff] %v941_v54  ;;  %v922_v58 = vadd.f32 %v1355_v26, %v1305_v55 }
 0x159   : > { %v1307_v59 = vpop.f32.mrf.mxu0 }
 0x15a   : > { %v942_v60 = vadd.f32 %v922_v58, %v380_v56  ;;  %v1308_v61 = vadd.f32 %v1307_v59, %v1306_v57 }
 0x15c   : > { %958 = vst [vmem:[#allocation2 + $0x78] sm:$0xff] %v942_v60  ;;  %v925_v63 = vadd.f32 %v1356_v40, %v1308_v61  ;;  %963 = sbr.rel (%p1238_p11) target bundleno = 366 (0x16e), region = 66 }
 0x15e   : > { %v943_v0 = vadd.f32 %v925_v63, %v381_v62 }
 0x160   : > { %959 = vst [vmem:[#allocation2 + $0x28] sm:$0xff] %v943_v0 }
 0x161   : > { %v964_v1 = vld [vmem:[#allocation2 + $0x30] sm:$0xff]  ;;  %v1239_v2 = vld [vmem:[%s1757_s2] ss:$0 sm:$0xff]  ;;  %v966_v6 = vld [vmem:[#allocation2 + $0x58] sm:$0xff] }
 0x162   : > { %v965_v3 = vld [vmem:[#allocation2] sm:$0xff]  ;;  %v987_v4 = vadd.f32 %v1239_v2, %v964_v1  ;;  %v967_v7 = vld [vmem:[#allocation2 + $0x18] sm:$0xff]  ;;  %v968_v8 = vld [vmem:[#allocation2 + $0x50] sm:$0xff]  ;;  %v989_v9 = vadd.f32 %v1239_v2, %v966_v6 }
 0x163   : > { %v988_v5 = vadd.f32 %v1239_v2, %v965_v3  ;;  %v990_v10 = vadd.f32 %v1239_v2, %v967_v7  ;;  %v991_v11 = vadd.f32 %v1239_v2, %v968_v8  ;;  %v969_v12 = vld [vmem:[#allocation2 + $0x68] sm:$0xff]  ;;  %v972_v19 = vld [vmem:[#allocation2 + $0x40] sm:$0xff]  ;;  %v974_v21 = vld [vmem:[#allocation2 + $0x10] sm:$0xff] }
 0x164   : > { %v970_v13 = vld [vmem:[#allocation2 + $0x8] sm:$0xff]  ;;  %v1003_v15 = vmax.f32 %v987_v4, 0.0  ;;  %v992_v17 = vadd.f32 %v1239_v2, %v969_v12  ;;  %v973_v20 = vld [vmem:[#allocation2 + $0x20] sm:$0xff]  ;;  %v1005_v22 = vmax.f32 %v989_v9, 0.0  ;;  %v975_v26 = vld [vmem:[#allocation2 + $0x38] sm:$0xff]  ;;  %v995_v31 = vadd.f32 %v1239_v2, %v972_v19 }
 0x165   : > { %v971_v14 = vld [vmem:[#allocation2 + $0x48] sm:$0xff]  ;;  %v1004_v16 = vmax.f32 %v988_v5, 0.0  ;;  %v993_v18 = vadd.f32 %v1239_v2, %v970_v13  ;;  %v1006_v23 = vmax.f32 %v990_v10, 0.0  ;;  %v1007_v24 = vmax.f32 %v991_v11, 0.0  ;;  %v976_v27 = vld [vmem:[#allocation2 + $0x60] sm:$0xff]  ;;  %v977_v28 = vld [vmem:[#allocation2 + $0x70] sm:$0xff] }
 0x166   : > { %v994_v25 = vadd.f32 %v1239_v2, %v971_v14  ;;  %1019 = vst [vmem:[%s1758_s3] sm:$0xff] %v1003_v15  ;;  %v1008_v29 = vmax.f32 %v992_v17, 0.0  ;;  %v996_v32 = vadd.f32 %v1239_v2, %v973_v20  ;;  %v978_v33 = vld [vmem:[#allocation2 + $0x78] sm:$0xff]  ;;  %1021 = vst [vmem:[%s1758_s3 + $0x10] sm:$0xff] %v1005_v22  ;;  %v997_v36 = vadd.f32 %v1239_v2, %v974_v21 }
 0x167   : > { %1020 = vst [vmem:[%s1758_s3 + $0x8] sm:$0xff] %v1004_v16  ;;  %v1009_v30 = vmax.f32 %v993_v18, 0.0  ;;  %v979_v34 = vld [vmem:[#allocation2 + $0x28] sm:$0xff]  ;;  %1022 = vst [vmem:[%s1758_s3 + $0x18] sm:$0xff] %v1006_v23  ;;  %v998_v37 = vadd.f32 %v1239_v2, %v975_v26  ;;  %v999_v38 = vadd.f32 %v1239_v2, %v976_v27  ;;  %v1011_v39 = vmax.f32 %v995_v31, 0.0 }
 0x168   : > { %1023 = vst [vmem:[%s1758_s3 + $0x20] sm:$0xff] %v1007_v24  ;;  %v1010_v35 = vmax.f32 %v994_v25, 0.0  ;;  %1024 = vst [vmem:[%s1758_s3 + $0x28] sm:$0xff] %v1008_v29  ;;  %v1012_v40 = vmax.f32 %v996_v32, 0.0  ;;  %v1000_v41 = vadd.f32 %v1239_v2, %v977_v28  ;;  %v1001_v42 = vadd.f32 %v1239_v2, %v978_v33 }
 0x169   : > { %1025 = vst [vmem:[%s1758_s3 + $0x30] sm:$0xff] %v1009_v30  ;;  %v1013_v43 = vmax.f32 %v997_v36, 0.0  ;;  %v1014_v44 = vmax.f32 %v998_v37, 0.0  ;;  %v1015_v45 = vmax.f32 %v999_v38, 0.0  ;;  %v1002_v46 = vadd.f32 %v1239_v2, %v979_v34  ;;  %1027 = vst [vmem:[%s1758_s3 + $0x40] sm:$0xff] %v1011_v39 }
 0x16a   : > { %1026 = vst [vmem:[%s1758_s3 + $0x38] sm:$0xff] %v1010_v35  ;;  %1028 = vst [vmem:[%s1758_s3 + $0x48] sm:$0xff] %v1012_v40  ;;  %v1016_v47 = vmax.f32 %v1000_v41, 0.0  ;;  %v1017_v48 = vmax.f32 %v1001_v42, 0.0 }
 0x16b   : > { %1029 = vst [vmem:[%s1758_s3 + $0x50] sm:$0xff] %v1013_v43  ;;  %1030 = vst [vmem:[%s1758_s3 + $0x58] sm:$0xff] %v1014_v44  ;;  %v1018_v49 = vmax.f32 %v1002_v46, 0.0 }
 0x16c   : > { %1031 = vst [vmem:[%s1758_s3 + $0x60] sm:$0xff] %v1015_v45  ;;  %1032 = vst [vmem:[%s1758_s3 + $0x68] sm:$0xff] %v1016_v47 }
 0x16d   : > { %1033 = vst [vmem:[%s1758_s3 + $0x70] sm:$0xff] %v1017_v48  ;;  %1034 = vst [vmem:[%s1758_s3 + $0x78] sm:$0xff] %v1018_v49 }
 0x16e PF: > { %s13_s16 = sadd.s32 1, %s1494_s16   ;;  %s1759_s12 = smov %s1482_s13 }
 0x16f   : > { %p10_p12 = scmp.ge.s32.totalorder %s13_s16, 5   ;;  %s1760_s13 = smov %s1552_s20 }
 0x170   : > { %s1761_s14 = smov %s1490_s15  ;;  %s1762_s15 = smov %s1764_s17 }
 0x171   :  { %12 = sbr.rel (!%p10_p12) target bundleno = 3 (0x3), region = 113 }

// kernel: model_forward.25
= control target key start
LH: loop header
LB: loop body
LE: loop exit
PB: predicated region body
PF: predicated region fallthrough
CT: control target
= control target key end

     0   :  { %s708_s1 = inlined_call_operand.vmem [shape: bf16[128,128], index: 1, kind: input, shape index: {}]   ;;  %s709_s0 = inlined_call_operand.vmem [shape: bf16[128,128], index: 0, kind: input, shape index: {}]   ;;  %s710_s2 = inlined_call_operand.vmem [shape: f32[1,128], index: 2, kind: input, shape index: {}]   ;;  %s711_s3 = inlined_call_operand.vmem [shape: f32[128,128], index: 3, kind: input, shape index: {}]   ;;  %s712_s4 = inlined_call_operand.vmem [shape: f32[128,128], index: 4, kind: output, shape index: {}]  }
   0x1   :  { %v502_v0 = vld [vmem:[%s708_s1 + $0x38] sm:$0xff]   ;;  %v503_v1 = vld [vmem:[%s708_s1 + $0x30] sm:$0xff]   ;;  %v504_v2 = vld [vmem:[%s708_s1 + $0x28] sm:$0xff]  }
   0x2   :  { %454 = vmatprep.subr.bf16.mxu0 %v502_v0  ;;  %486 = vmatprep.subr.bf16.mxu1 %v502_v0  ;;  %v505_v3 = vld [vmem:[%s708_s1 + $0x20] sm:$0xff]   ;;  %v506_v6 = vld [vmem:[%s708_s1 + $0x18] sm:$0xff]   ;;  %v507_v7 = vld [vmem:[%s708_s1 + $0x10] sm:$0xff]  }
   0x3   :  { %455 = vmatpush3.bf16.msra.mxu0 %v502_v0  ;;  %494 = vmatpush3.bf16.msra.mxu1 %v502_v0  ;;  %v510_v4 = vld [vmem:[%s709_s0] sm:$0xff]   ;;  %v508_v8 = vld [vmem:[%s708_s1 + $0x8] sm:$0xff]   ;;  %v514_v12 = vld [vmem:[%s709_s0 + $0x10] sm:$0xff]  }
   0x4   :  { %456 = vmatprep.subr.bf16.mxu0 %v503_v1  ;;  %487 = vmatprep.subr.bf16.mxu1 %v503_v1  ;;  %v511_v5 = vld [vmem:[%s709_s0 + $0x20] sm:$0xff]   ;;  %v512_v10 = vld [vmem:[%s709_s0 + $0x8] sm:$0xff]   ;;  %v515_v13 = vld [vmem:[%s709_s0 + $0x30] sm:$0xff]  }
   0x5   :  { %470 = vmatprep.mubr.bf16.mxu0 %v510_v4  ;;  %478 = vmatprep.mubr.bf16.mxu1 %v511_v5  ;;  %v509_v9 = vld [vmem:[%s708_s1] sm:$0xff]   ;;  %v513_v11 = vld [vmem:[%s709_s0 + $0x28] sm:$0xff]   ;;  %v516_v14 = vld [vmem:[%s709_s0 + $0x18] sm:$0xff]  }
   0x6   :  { %v517_v15 = vld [vmem:[%s709_s0 + $0x38] sm:$0xff]   ;;  %v594_v16 = vld [vmem:[%s710_s2] ss:$0 sm:$0xff]  ;;  %v355_v18 = vld [vmem:[%s711_s3 + $0x10] sm:$0xff] }
   0x7   :  { %457 = vmatpush3.bf16.msra.mxu0 %v503_v1  ;;  %495 = vmatpush3.bf16.msra.mxu1 %v503_v1  ;;  %v363_v20 = vld [vmem:[%s711_s3 + $0x50] sm:$0xff]  ;;  %v353_v24 = vld [vmem:[%s711_s3] sm:$0xff]  ;;  %v356_v37 = vld [vmem:[%s711_s3 + $0x18] sm:$0xff] }
   0x8   :  { %458 = vmatprep.subr.bf16.mxu0 %v504_v2  ;;  %488 = vmatprep.subr.bf16.mxu1 %v504_v2  ;;  %v361_v26 = vld [vmem:[%s711_s3 + $0x40] sm:$0xff]  ;;  %v364_v38 = vld [vmem:[%s711_s3 + $0x58] sm:$0xff]  ;;  %v354_v42 = vld [vmem:[%s711_s3 + $0x8] sm:$0xff] }
   0x9   :  { %v362_v44 = vld [vmem:[%s711_s3 + $0x48] sm:$0xff]  ;;  %v359_v52 = vld [vmem:[%s711_s3 + $0x30] sm:$0xff]  ;;  %v365_v4 = vld [vmem:[%s711_s3 + $0x60] sm:$0xff] }
   0xa   :  { %v367_v54 = vld [vmem:[%s711_s3 + $0x70] sm:$0xff] }
   0xb   :  { %459 = vmatpush3.bf16.msra.mxu0 %v504_v2  ;;  %496 = vmatpush3.bf16.msra.mxu1 %v504_v2 }
   0xc   :  { %460 = vmatprep.subr.bf16.mxu0 %v505_v3  ;;  %489 = vmatprep.subr.bf16.mxu1 %v505_v3 }
   0xf   :  { %461 = vmatpush3.bf16.msra.mxu0 %v505_v3  ;;  %497 = vmatpush3.bf16.msra.mxu1 %v505_v3  ;;  %v357_v3 = vld [vmem:[%s711_s3 + $0x20] sm:$0xff] }
  0x10   :  { %462 = vmatprep.subr.bf16.mxu0 %v506_v6  ;;  %490 = vmatprep.subr.bf16.mxu1 %v506_v6 }
  0x13   :  { %463 = vmatpush3.bf16.msra.mxu0 %v506_v6  ;;  %498 = vmatpush3.bf16.msra.mxu1 %v506_v6 }
  0x14   :  { %464 = vmatprep.subr.bf16.mxu0 %v507_v7  ;;  %491 = vmatprep.subr.bf16.mxu1 %v507_v7 }
  0x17   :  { %465 = vmatpush3.bf16.msra.mxu0 %v507_v7  ;;  %499 = vmatpush3.bf16.msra.mxu1 %v507_v7 }
  0x18   :  { %466 = vmatprep.subr.bf16.mxu0 %v508_v8  ;;  %492 = vmatprep.subr.bf16.mxu1 %v508_v8 }
  0x1b   :  { %467 = vmatpush3.bf16.msra.mxu0 %v508_v8  ;;  %500 = vmatpush3.bf16.msra.mxu1 %v508_v8  ;;  %v360_v8 = vld [vmem:[%s711_s3 + $0x38] sm:$0xff] }
  0x1c   :  { %468 = vmatprep.subr.bf16.mxu0 %v509_v9  ;;  %493 = vmatprep.subr.bf16.mxu1 %v509_v9 }
  0x1f   :  { %469 = vmatpush3.bf16.msra.mxu0 %v509_v9  ;;  %501 = vmatpush3.bf16.msra.mxu1 %v509_v9 }
  0x22   :  { %471 = vmatmul.mubr.bf16.vlgmr.msra.gmra.mxu0 %v512_v10  ;;  %479 = vmatmul.mubr.bf16.vlgmr.msra.gmra.mxu1 %v513_v11  ;;  %v368_v10 = vld [vmem:[%s711_s3 + $0x78] sm:$0xff] }
  0x23   :  { %474 = vmatprep.mubr.bf16.mxu0 %v514_v12  ;;  %482 = vmatprep.mubr.bf16.mxu1 %v515_v13 }
  0x2a   :  { %475 = vmatmul.mubr.bf16.gmra.mxu0 %v516_v14  ;;  %483 = vmatmul.mubr.bf16.gmra.mxu1 %v517_v15 }
  0xe2   :  { %v472_v17 = vpop.f32.mrf.mxu0  ;;  %v480_v19 = vpop.f32.mrf.mxu1 }
  0xe3   :  { %v339_v21 = vadd.f32 %v472_v17, %v594_v16  ;;  %v347_v22 = vadd.f32 %v480_v19, %v594_v16  ;;  %v358_v19 = vld [vmem:[%s711_s3 + $0x28] sm:$0xff] }
  0xe4   :  { %v216_v23 = vpop.f32.mrf.mxu0  ;;  %v248_v25 = vpop.f32.mrf.mxu1 }
  0xe5   :  { %v371_v27 = vadd.f32 %v355_v18, %v339_v21  ;;  %v379_v28 = vadd.f32 %v363_v20, %v347_v22  ;;  %v337_v29 = vadd.f32 %v594_v16, %v216_v23  ;;  %v345_v30 = vadd.f32 %v594_v16, %v248_v25  ;;  %v366_v21 = vld [vmem:[%s711_s3 + $0x68] sm:$0xff] }
  0xe6   :  { %v473_v31 = vpop.f32.mrf.mxu0  ;;  %v481_v32 = vpop.f32.mrf.mxu1 }
  0xe7   :  { %v387_v33 = vmax.f32 %v371_v27, 0.0  ;;  %v395_v34 = vmax.f32 %v379_v28, 0.0  ;;  %v369_v35 = vadd.f32 %v353_v24, %v337_v29  ;;  %v377_v36 = vadd.f32 %v361_v26, %v345_v30 }
  0xe8   :  { %v340_v39 = vadd.f32 %v473_v31, %v594_v16  ;;  %v348_v40 = vadd.f32 %v481_v32, %v594_v16  ;;  %v219_v41 = vpop.f32.mrf.mxu0  ;;  %v251_v43 = vpop.f32.mrf.mxu1 }
  0xe9   :  { %403 = vst [vmem:[%s712_s4 + $0x10] sm:$0xff] %v387_v33  ;;  %411 = vst [vmem:[%s712_s4 + $0x50] sm:$0xff] %v395_v34  ;;  %v385_v45 = vmax.f32 %v369_v35, 0.0  ;;  %v393_v46 = vmax.f32 %v377_v36, 0.0  ;;  %v338_v47 = vadd.f32 %v594_v16, %v219_v41  ;;  %v346_v48 = vadd.f32 %v594_v16, %v251_v43 }
  0xea   :  { %v372_v49 = vadd.f32 %v356_v37, %v340_v39  ;;  %v380_v50 = vadd.f32 %v364_v38, %v348_v40  ;;  %v476_v51 = vpop.f32.mrf.mxu0  ;;  %v484_v53 = vpop.f32.mrf.mxu1 }
  0xeb   :  { %401 = vst [vmem:[%s712_s4] sm:$0xff] %v385_v45  ;;  %409 = vst [vmem:[%s712_s4 + $0x40] sm:$0xff] %v393_v46  ;;  %v370_v55 = vadd.f32 %v354_v42, %v338_v47  ;;  %v378_v56 = vadd.f32 %v362_v44, %v346_v48  ;;  %v343_v57 = vadd.f32 %v476_v51, %v594_v16 }
  0xec   :  { %v351_v58 = vadd.f32 %v484_v53, %v594_v16  ;;  %v388_v59 = vmax.f32 %v372_v49, 0.0  ;;  %v396_v60 = vmax.f32 %v380_v50, 0.0  ;;  %v232_v61 = vpop.f32.mrf.mxu0  ;;  %v264_v62 = vpop.f32.mrf.mxu1 }
  0xed   :  { %v386_v63 = vmax.f32 %v370_v55, 0.0  ;;  %v394_v0 = vmax.f32 %v378_v56, 0.0  ;;  %v375_v1 = vadd.f32 %v359_v52, %v343_v57  ;;  %v341_v5 = vadd.f32 %v594_v16, %v232_v61 }
  0xee   :  { %v383_v2 = vadd.f32 %v367_v54, %v351_v58  ;;  %404 = vst [vmem:[%s712_s4 + $0x18] sm:$0xff] %v388_v59  ;;  %412 = vst [vmem:[%s712_s4 + $0x58] sm:$0xff] %v396_v60  ;;  %v349_v6 = vadd.f32 %v594_v16, %v264_v62  ;;  %v477_v7 = vpop.f32.mrf.mxu0  ;;  %v485_v9 = vpop.f32.mrf.mxu1 }
  0xef   :  { %402 = vst [vmem:[%s712_s4 + $0x8] sm:$0xff] %v386_v63  ;;  %410 = vst [vmem:[%s712_s4 + $0x48] sm:$0xff] %v394_v0  ;;  %v391_v11 = vmax.f32 %v375_v1, 0.0  ;;  %v344_v13 = vadd.f32 %v477_v7, %v594_v16  ;;  %v352_v14 = vadd.f32 %v485_v9, %v594_v16  ;;  %v373_v15 = vadd.f32 %v357_v3, %v341_v5 }
  0xf0   :  { %v399_v12 = vmax.f32 %v383_v2, 0.0  ;;  %v381_v17 = vadd.f32 %v365_v4, %v349_v6  ;;  %v235_v18 = vpop.f32.mrf.mxu0  ;;  %v267_v20 = vpop.f32.mrf.mxu1 }
  0xf1   :  { %407 = vst [vmem:[%s712_s4 + $0x30] sm:$0xff] %v391_v11  ;;  %v376_v22 = vadd.f32 %v360_v8, %v344_v13  ;;  %v384_v23 = vadd.f32 %v368_v10, %v352_v14  ;;  %v342_v24 = vadd.f32 %v594_v16, %v235_v18  ;;  %v350_v25 = vadd.f32 %v594_v16, %v267_v20 }
  0xf2   :  { %415 = vst [vmem:[%s712_s4 + $0x70] sm:$0xff] %v399_v12  ;;  %v389_v26 = vmax.f32 %v373_v15, 0.0  ;;  %v397_v27 = vmax.f32 %v381_v17, 0.0 }
  0xf3   :  { %v392_v28 = vmax.f32 %v376_v22, 0.0  ;;  %v400_v29 = vmax.f32 %v384_v23, 0.0  ;;  %v374_v30 = vadd.f32 %v358_v19, %v342_v24  ;;  %v382_v31 = vadd.f32 %v366_v21, %v350_v25 }
  0xf4   :  { %405 = vst [vmem:[%s712_s4 + $0x20] sm:$0xff] %v389_v26  ;;  %413 = vst [vmem:[%s712_s4 + $0x60] sm:$0xff] %v397_v27 }
  0xf5   :  { %408 = vst [vmem:[%s712_s4 + $0x38] sm:$0xff] %v392_v28  ;;  %416 = vst [vmem:[%s712_s4 + $0x78] sm:$0xff] %v400_v29  ;;  %v390_v16 = vmax.f32 %v374_v30, 0.0  ;;  %v398_v32 = vmax.f32 %v382_v31, 0.0 }
  0xf7   :  { %406 = vst [vmem:[%s712_s4 + $0x28] sm:$0xff] %v390_v16  ;;  %414 = vst [vmem:[%s712_s4 + $0x68] sm:$0xff] %v398_v32 }

// kernel: model_forward.28
= control target key start
LH: loop header
LB: loop body
LE: loop exit
PB: predicated region body
PF: predicated region fallthrough
CT: control target
= control target key end

     0   :  { %16 = vsyncpa [#allocation5], 0  ;;  %s2110_s0 = inlined_call_operand.vmem [shape: f32[32,128], index: 0, kind: input, shape index: {}]   ;;  %s2111_s1 = inlined_call_operand.vmem [shape: f32[128,64], index: 1, kind: input, shape index: {}]   ;;  %s2112_s2 = inlined_call_operand.vmem [shape: f32[1,64], index: 2, kind: input, shape index: {}]   ;;  %s2113_s3 = inlined_call_operand.vmem [shape: f32[512,64], index: 3, kind: input, shape index: {}]   ;;  %s2114_s4 = inlined_call_operand.vmem [shape: f32[64,512], index: 4, kind: input, shape index: {}]   ;;  %s2115_s5 = inlined_call_operand.vmem [shape: f32[1,512], index: 5, kind: input, shape index: {}]   ;;  %s2116_s6 = inlined_call_operand.vmem [shape: f32[32,64], index: 6, kind: output, shape index: {0}]   ;;  %s2117_s7 = inlined_call_operand.hbm [shape: f32[32,512], index: 7, kind: output, shape index: {1}]   ;;  %s2118_s8 = inlined_call_operand.vmem [shape: s32[32,1], index: 8, kind: output, shape index: {2}]   ;;  %s2119_s9 = inlined_call_operand.hbm [shape: f32[1,1], index: 9, kind: output, shape index: {3}]   ;;  %s2120_s10 = inlined_call_operand.hbm [shape: f32[1,1], index: 10, kind: output, shape index: {4}]  }
   0x1   :  { %v60_v0 = vld [vmem:[%s2111_s1 + $0x78] sm:$0xff]  ;;  %v59_v1 = vld [vmem:[%s2111_s1 + $0x70] sm:$0xff]  ;;  %v58_v2 = vld [vmem:[%s2111_s1 + $0x68] sm:$0xff] }
   0x2   :  { %1263 = vmatprep.subr.mxu0 %v60_v0  ;;  %v57_v3 = vld [vmem:[%s2111_s1 + $0x60] sm:$0xff]  ;;  %v56_v5 = vld [vmem:[%s2111_s1 + $0x58] sm:$0xff]  ;;  %v199_v6 = vld [vmem:[%s2114_s4 + $0xe8] sm:$0xff] }
   0x3   :  { %1264 = vmatpush3.msra.mxu0 %v60_v0  ;;  %v41_v4 = vld [vmem:[%s2110_s0] sm:$0xff]  ;;  %230 = vmatprep.subr.mxu1 %v199_v6  ;;  %v195_v8 = vld [vmem:[%s2114_s4 + $0xc8] sm:$0xff]  ;;  %v55_v10 = vld [vmem:[%s2111_s1 + $0x50] sm:$0xff] }
   0x4   :  { %1265 = vmatprep.subr.mxu0 %v59_v1  ;;  %1295 = vmatprep.mubr.f32.mxu0 %v41_v4  ;;  %v198_v7 = vld [vmem:[%s2114_s4 + $0xe0] sm:$0xff]  ;;  %v191_v11 = vld [vmem:[%s2114_s4 + $0xa8] sm:$0xff] }
   0x5   :  { %1266 = vmatpush3.msra.mxu0 %v59_v1  ;;  %v194_v9 = vld [vmem:[%s2114_s4 + $0xc0] sm:$0xff]  ;;  %231 = vmatpush1.msra.mxu1 %v198_v7  ;;  %v54_v13 = vld [vmem:[%s2111_s1 + $0x48] sm:$0xff] }
   0x6   :  { %1267 = vmatprep.subr.mxu0 %v58_v2  ;;  %232 = vmatprep.subr.mxu1 %v195_v8  ;;  %v190_v12 = vld [vmem:[%s2114_s4 + $0xa0] sm:$0xff]  ;;  %v187_v14 = vld [vmem:[%s2114_s4 + $0x88] sm:$0xff] }
   0x7   :  { %1268 = vmatpush3.msra.mxu0 %v58_v2  ;;  %233 = vmatpush1.msra.mxu1 %v194_v9 }
   0x8   :  { %1269 = vmatprep.subr.mxu0 %v57_v3 }
   0x9   :  { %1270 = vmatpush3.msra.mxu0 %v57_v3 }
   0xa   :  { %1271 = vmatprep.subr.mxu0 %v56_v5 }
   0xb   :  { %1272 = vmatpush3.msra.mxu0 %v56_v5 }
   0xc   :  { %17 = vsyncpa [#allocation7], 0  ;;  %1273 = vmatprep.subr.mxu0 %v55_v10  ;;  %234 = vmatprep.subr.mxu1 %v191_v11  ;;  %v186_v15 = vld [vmem:[%s2114_s4 + $0x80] sm:$0xff]  ;;  %v183_v17 = vld [vmem:[%s2114_s4 + $0x68] sm:$0xff]  ;;  %v1381_v36 = vmov 0.0   ;;  %vm157_vm0 = vcmask 523264   ;;  %v36_v6 = vlaneseq }
   0xd   :  { %1274 = vmatpush3.msra.mxu0 %v55_v10  ;;  %v53_v16 = vld [vmem:[%s2111_s1 + $0x40] sm:$0xff]  ;;  %235 = vmatpush1.msra.mxu1 %v190_v12  ;;  %v52_v19 = vld [vmem:[%s2111_s1 + $0x38] sm:$0xff]  ;;  %v179_v20 = vld [vmem:[%s2114_s4 + $0x48] sm:$0xff]  ;;  %s1384_s28 = smov [#allocation4]  }
   0xe   :  { %1275 = vmatprep.subr.mxu0 %v54_v13  ;;  %236 = vmatprep.subr.mxu1 %v187_v14  ;;  %v182_v18 = vld [vmem:[%s2114_s4 + $0x60] sm:$0xff]  ;;  %v51_v22 = vld [vmem:[%s2111_s1 + $0x30] sm:$0xff]  ;;  %v50_v23 = vld [vmem:[%s2111_s1 + $0x28] sm:$0xff]  ;;  %v1648_v8 = vshrl.u32 %v36_v6, 7  ;;  %s1070_s29 = sshll.u32 %s1384_s28, 4  ;;  %s1071_s29 = int_to_ptr.vmem [resolvable:$true] %s1070_s29 }
   0xf   :  { %1276 = vmatpush3.msra.mxu0 %v54_v13  ;;  %237 = vmatpush1.msra.mxu1 %v186_v15  ;;  %v178_v21 = vld [vmem:[%s2114_s4 + $0x40] sm:$0xff]  ;;  %v48_v25 = vld [vmem:[%s2111_s1 + $0x18] sm:$0xff]  ;;  %v47_v26 = vld [vmem:[%s2111_s1 + $0x10] sm:$0xff]  ;;  %p1322_p1 = scmp.lt.s32.totalorder %s1071_s29, %s1071_s29 }
  0x10   :  { %1277 = vmatprep.subr.mxu0 %v53_v16  ;;  %238 = vmatprep.subr.mxu1 %v183_v17  ;;  %v49_v24 = vld [vmem:[%s2111_s1 + $0x20] sm:$0xff]  ;;  %v46_v27 = vld [vmem:[%s2111_s1 + $0x8] sm:$0xff]  ;;  %v43_v30 = vld [vmem:[%s2110_s0 + $0x10] sm:$0xff]  ;;  %v400_v11 = vsub.s32 1, %v1648_v8  ;;  %v396_v15 = vsub.s32 0, %v1648_v8 }
  0x11   :  { %1278 = vmatpush3.msra.mxu0 %v53_v16  ;;  %239 = vmatpush1.msra.mxu1 %v182_v18  ;;  %v45_v28 = vld [vmem:[%s2111_s1] sm:$0xff]  ;;  %v42_v29 = vld [vmem:[%s2110_s0 + $0x8] sm:$0xff]  ;;  %v44_v31 = vld [vmem:[%s2110_s0 + $0x18] sm:$0xff]  ;;  %v404_v18 = vsub.s32 2, %v1648_v8 }
  0x12   :  { %1279 = vmatprep.subr.mxu0 %v52_v19  ;;  %240 = vmatprep.subr.mxu1 %v179_v20  ;;  %v175_v32 = vld [vmem:[%s2114_s4 + $0x28] sm:$0xff]  ;;  %v174_v33 = vld [vmem:[%s2114_s4 + $0x20] sm:$0xff]  ;;  %v201_v37 = vld [vmem:[%s2114_s4 + $0xf8] sm:$0xff] }
  0x13   :  { %1280 = vmatpush3.msra.mxu0 %v52_v19  ;;  %241 = vmatpush1.msra.mxu1 %v178_v21  ;;  %v171_v34 = vld [vmem:[%s2114_s4 + $0x8] sm:$0xff]  ;;  %v170_v35 = vld [vmem:[%s2114_s4] sm:$0xff]  ;;  %v200_v42 = vld [vmem:[%s2114_s4 + $0xf0] sm:$0xff] }
  0x14   :  { %1281 = vmatprep.subr.mxu0 %v51_v22  ;;  %242 = vmatprep.subr.mxu1 %v175_v32  ;;  %v1114_v39 = vld [vmem:[%s2112_s2] ss:$0 sm:$0xff]  ;;  %v197_v45 = vld [vmem:[%s2114_s4 + $0xd8] sm:$0xff]  ;;  %v196_v46 = vld [vmem:[%s2114_s4 + $0xd0] sm:$0xff] }
  0x15   :  { %1282 = vmatpush3.msra.mxu0 %v51_v22  ;;  %243 = vmatpush1.msra.mxu1 %v174_v33  ;;  %v193_v49 = vld [vmem:[%s2114_s4 + $0xb8] sm:$0xff]  ;;  %v192_v53 = vld [vmem:[%s2114_s4 + $0xb0] sm:$0xff]  ;;  %v392_v13 = vld [vmem:[%s2115_s5] sm:$0xf]  ;;  %v408_v22 = vsub.s32 3, %v1648_v8 }
  0x16   :  { %1283 = vmatprep.subr.mxu0 %v50_v23  ;;  %244 = vmatprep.subr.mxu1 %v171_v34  ;;  %v189_v54 = vld [vmem:[%s2114_s4 + $0x98] sm:$0xff]  ;;  %v188_v56 = vld [vmem:[%s2114_s4 + $0x90] sm:$0xff]  ;;  %v401_v17 = vrot.slane %v392_v13, %v400_v11  ;;  %v397_v20 = vrot.slane %v392_v13, %v396_v15 }
  0x17   :  { %1284 = vmatpush3.msra.mxu0 %v50_v23  ;;  %245 = vmatpush1.msra.mxu1 %v170_v35  ;;  %v185_v58 = vld [vmem:[%s2114_s4 + $0x78] sm:$0xff]  ;;  %v184_v62 = vld [vmem:[%s2114_s4 + $0x70] sm:$0xff]  ;;  %v409_v33 = vrot.slane %v392_v13, %v408_v22 }
  0x18   :  { %1285 = vmatprep.subr.mxu0 %v49_v24  ;;  %278 = vmatprep.mubr.f32.mxu1 %v1381_v36  ;;  %v181_v63 = vld [vmem:[%s2114_s4 + $0x58] sm:$0xff]  ;;  %v180_v0 = vld [vmem:[%s2114_s4 + $0x50] sm:$0xff] }
  0x19   :  { %1286 = vmatpush3.msra.mxu0 %v49_v24  ;;  %319 = vmatprep.subr.mxu1 %v201_v37  ;;  %v177_v2 = vld [vmem:[%s2114_s4 + $0x38] sm:$0xff]  ;;  %v176_v3 = vld [vmem:[%s2114_s4 + $0x30] sm:$0xff] }
  0x1a   :  { %1287 = vmatprep.subr.mxu0 %v48_v25  ;;  %v173_v4 = vld [vmem:[%s2114_s4 + $0x18] sm:$0xff]  ;;  %v172_v5 = vld [vmem:[%s2114_s4 + $0x10] sm:$0xff] }
  0x1b   :  { %1288 = vmatpush3.msra.mxu0 %v48_v25 }
  0x1c   :  { %1289 = vmatprep.subr.mxu0 %v47_v26 }
  0x1d   :  { %1290 = vmatpush3.msra.mxu0 %v47_v26 }
  0x1e   :  { %1291 = vmatprep.subr.mxu0 %v46_v27 }
  0x1f   :  { %1292 = vmatpush3.msra.mxu0 %v46_v27  ;;  %v405_v27 = vrot.slane %v392_v13, %v404_v18 }
  0x20   :  { %1293 = vmatprep.subr.mxu0 %v45_v28 }
  0x21   :  { %1294 = vmatpush3.msra.mxu0 %v45_v28 }
  0x22   :  { %1296 = vmatmul.mubr.f32.vlgmr.msra.gmra.mxu0 %v42_v29 }
  0x23   :  { %1298 = vmatprep.mubr.f32.mxu0 %v43_v30 }
  0x26   :  { %1299 = vmatmul.mubr.f32.gmra.mxu0 %v44_v31 }
  0xe2   :  { %v1297_v38 = vpop.f32.mrf.mxu0 }
  0xe3   :  { %v1564_v43 = vadd.f32 %v1297_v38, %v1114_v39 }
  0xe4   :  { %v134_v40 = vpop.f32.mrf.mxu0 }
  0xe5   :  { %v1559_v41 = vadd.f32 %v1114_v39, %v134_v40  ;;  %v154_v55 = vmul.f32 %v1564_v43, %v1564_v43 }
  0xe6   :  { %v1300_v44 = vpop.f32.mrf.mxu0 }
  0xe7   :  { %1115 = vmatmul.mubr.msk.f32.vlgmr.msra.gmra.mxu1 %vm157_vm0, %v1559_v41  ;;  %v153_v47 = vmul.f32 %v1559_v41, %v1559_v41  ;;  %v1580_v50 = vadd.f32 %v1300_v44, %v1114_v39  ;;  %v161_v61 = vsel %vm157_vm0, %v154_v55, 0.0 }
  0xe8   :  { %320 = vmatpush1.msra.mxu1 %v200_v42  ;;  %v144_v48 = vpop.f32.mrf.mxu0  ;;  %284 = vmatprep.mubr.f32.mxu1 %v1381_v36 }
  0xe9   :  { %v1582_v51 = vadd.f32 %v1114_v39, %v144_v48  ;;  %321 = vmatprep.subr.mxu1 %v197_v45  ;;  %v158_v52 = vsel %vm157_vm0, %v153_v47, 0.0  ;;  %v156_v60 = vmul.f32 %v1580_v50, %v1580_v50 }
  0xea   :  { %322 = vmatpush1.msra.mxu1 %v196_v46  ;;  %159 = vadd.xlane.f32.xlu0 %v158_v52 }
  0xeb   :  { %323 = vmatprep.subr.mxu1 %v193_v49  ;;  %1116 = vmatmul.mubr.msk.f32.gmra.mxu1 %vm157_vm0, %v1564_v43  ;;  %v155_v57 = vmul.f32 %v1582_v51, %v1582_v51  ;;  %v167_v1 = vsel %vm157_vm0, %v156_v60, 0.0 }
  0xec   :  { %324 = vmatpush1.msra.mxu1 %v192_v53  ;;  %290 = vmatprep.mubr.f32.mxu1 %v1381_v36 }
  0xed   :  { %325 = vmatprep.subr.mxu1 %v189_v54  ;;  %v164_v59 = vsel %vm157_vm0, %v155_v57, 0.0 }
  0xee   :  { %326 = vmatpush1.msra.mxu1 %v188_v56  ;;  %165 = vadd.xlane.f32.xlu1 %v164_v59 }
  0xef   :  { %162 = vadd.xlane.f32.xlu0 %v161_v61  ;;  %327 = vmatprep.subr.mxu1 %v185_v58 }
  0xf0   :  { %1117 = vmatmul.mubr.msk.f32.gmra.mxu1 %vm157_vm0, %v1582_v51 }
  0xf1   :  { %328 = vmatpush1.msra.mxu1 %v184_v62  ;;  %296 = vmatprep.mubr.f32.mxu1 %v1381_v36 }
  0xf2   :  { %329 = vmatprep.subr.mxu1 %v181_v63  ;;  %168 = vadd.xlane.f32.xlu1 %v167_v1 }
  0xf3   :  { %330 = vmatpush1.msra.mxu1 %v180_v0 }
  0xf4   :  { %331 = vmatprep.subr.mxu1 %v177_v2  ;;  %1118 = vmatmul.mubr.msk.f32.gmra.mxu1 %vm157_vm0, %v1580_v50 }
  0xf5   :  { %332 = vmatpush1.msra.mxu1 %v176_v3  ;;  %367 = vmatprep.mubr.f32.mxu1 %v1381_v36 }
  0xf6   :  { %333 = vmatprep.subr.mxu1 %v173_v4 }
  0xf7   :  { %334 = vmatpush1.msra.mxu1 %v172_v5 }
  0xf8   :  { %1119 = vmatmul.mubr.msk.f32.vlgmr.msra.gmra.mxu1 %vm157_vm0, %v1559_v41 }
  0xf9   :  { %373 = vmatprep.mubr.f32.mxu1 %v1381_v36 }
  0xfc   :  { %1120 = vmatmul.mubr.msk.f32.gmra.mxu1 %vm157_vm0, %v1564_v43 }
  0xfd   :  { %379 = vmatprep.mubr.f32.mxu1 %v1381_v36 }
 0x100   :  { %1121 = vmatmul.mubr.msk.f32.gmra.mxu1 %vm157_vm0, %v1582_v51 }
 0x101   :  { %385 = vmatprep.mubr.f32.mxu1 %v1381_v36 }
 0x104   :  { %1122 = vmatmul.mubr.msk.f32.gmra.mxu1 %vm157_vm0, %v1580_v50 }
 0x173   :  { %v160_v14 = vpop.xlane.xlu0 %159 }
 0x174   :  { %v415_v26 = vadd.f32 %v401_v17, %v160_v14  ;;  %v414_v31 = vadd.f32 %v397_v20, %v160_v14  ;;  %v416_v39 = vadd.f32 %v405_v27, %v160_v14  ;;  %v417_v49 = vadd.f32 %v409_v33, %v160_v14 }
 0x177   :  { %v166_v30 = vpop.xlane.xlu1 %165 }
 0x178   :  { %v163_v24 = vpop.xlane.xlu0 %162  ;;  %v423_v55 = vadd.f32 %v401_v17, %v166_v30  ;;  %v422_v63 = vadd.f32 %v397_v20, %v166_v30  ;;  %v424_v13 = vadd.f32 %v405_v27, %v166_v30 }
 0x179   :  { %v419_v35 = vadd.f32 %v401_v17, %v163_v24  ;;  %v418_v42 = vadd.f32 %v397_v20, %v163_v24  ;;  %v420_v59 = vadd.f32 %v405_v27, %v163_v24  ;;  %v421_v2 = vadd.f32 %v409_v33, %v163_v24 }
 0x17b   :  { %v169_v57 = vpop.xlane.xlu1 %168 }
 0x1a7   :  { %v280_v7 = vpop.f32.mrf.mxu1 }
 0x1a8   :  { %v430_v25 = vmul.f32 2.0, %v280_v7 }
 0x1a9   :  { %v282_v9 = vpop.f32.mrf.mxu1 }
 0x1aa   :  { %v431_v21 = vmul.f32 2.0, %v282_v9  ;;  %v1667_v38 = vsub.f32 %v414_v31, %v430_v25  ;;  %v426_v25 = vadd.f32 %v397_v20, %v169_v57 }
 0x1ab   :  { %v286_v10 = vpop.f32.mrf.mxu1 }
 0x1ac   :  { %v1663_v32 = vsub.f32 %v415_v26, %v431_v21  ;;  %v434_v34 = vmul.f32 2.0, %v286_v10  ;;  %v427_v10 = vadd.f32 %v401_v17, %v169_v57 }
 0x1ad   :  { %v288_v12 = vpop.f32.mrf.mxu1 }
 0x1ae   :  { %v435_v28 = vmul.f32 2.0, %v288_v12  ;;  %v462_v47 = vmin.f32 %v1667_v38, %v1663_v32  ;;  %v1675_v53 = vsub.f32 %v418_v42, %v434_v34 }
 0x1b0   :  { %v292_v16 = vpop.f32.mrf.mxu1  ;;  %v1669_v44 = vsub.f32 %v419_v35, %v435_v28  ;;  %v425_v28 = vadd.f32 %v409_v33, %v166_v30  ;;  %v428_v35 = vadd.f32 %v405_v27, %v169_v57 }
 0x1b1   :  { %v438_v54 = vmul.f32 2.0, %v292_v16 }
 0x1b2   :  { %v294_v19 = vpop.f32.mrf.mxu1  ;;  %v467_v62 = vmin.f32 %v1675_v53, %v1669_v44 }
 0x1b3   :  { %v439_v45 = vmul.f32 2.0, %v294_v19  ;;  %v1687_v9 = vsub.f32 %v422_v63, %v438_v54 }
 0x1b4   :  { %v298_v23 = vpop.f32.mrf.mxu1 }
 0x1b5   :  { %v1682_v0 = vsub.f32 %v423_v55, %v439_v45  ;;  %v442_v14 = vmul.f32 2.0, %v298_v23  ;;  %v429_v45 = vadd.f32 %v409_v33, %v169_v57  ;;  %v1714_v55 = vand.u32 127, %v36_v6 }
 0x1b6   :  { %v300_v29 = vpop.f32.mrf.mxu1 }
 0x1b7   :  { %v443_v3 = vmul.f32 2.0, %v300_v29  ;;  %v472_v24 = vmin.f32 %v1687_v9, %v1682_v0  ;;  %v1717_v33 = vadd.s32 128, %v1714_v55  ;;  %v1720_v57 = vadd.s32 256, %v1714_v55 }
 0x1b8   :  { %v369_v37 = vpop.f32.mrf.mxu1 }
 0x1b9   :  { %v432_v40 = vmul.f32 2.0, %v369_v37  ;;  %v1694_v29 = vsub.f32 %v427_v10, %v443_v3  ;;  %v1699_v37 = vsub.f32 %v426_v25, %v442_v14 }
 0x1ba   :  { %v371_v46 = vpop.f32.mrf.mxu1 }
 0x1bb   :  { %v1673_v48 = vsub.f32 %v416_v39, %v432_v40  ;;  %v433_v52 = vmul.f32 2.0, %v371_v46  ;;  %v477_v30 = vmin.f32 %v1699_v37, %v1694_v29 }
 0x1bc   :  { %v375_v56 = vpop.f32.mrf.mxu1 }
 0x1bd   :  { %v1677_v58 = vsub.f32 %v417_v49, %v433_v52  ;;  %v436_v60 = vmul.f32 2.0, %v375_v56  ;;  %v463_v61 = vmin.f32 %v462_v47, %v1673_v48 }
 0x1be   :  { %v377_v1 = vpop.f32.mrf.mxu1 }
 0x1bf   :  { %v1684_v4 = vsub.f32 %v420_v59, %v436_v60  ;;  %v437_v5 = vmul.f32 2.0, %v377_v1  ;;  %v464_v7 = vmin.f32 %v463_v61, %v1677_v58  ;;  %v1728_v61 = vadd.s32 384, %v1714_v55 }
 0x1c0   :  { %v381_v12 = vpop.f32.mrf.mxu1 }
 0x1c1   :  { %v1689_v16 = vsub.f32 %v421_v2, %v437_v5  ;;  %v440_v19 = vmul.f32 2.0, %v381_v12  ;;  %465 = vmin.xlane.f32.xlu0 %v464_v7  ;;  %v468_v21 = vmin.f32 %v467_v62, %v1684_v4 }
 0x1c2   :  { %v383_v26 = vpop.f32.mrf.mxu1 }
 0x1c3   :  { %v1696_v31 = vsub.f32 %v424_v13, %v440_v19  ;;  %v441_v17 = vmul.f32 2.0, %v383_v26  ;;  %v469_v34 = vmin.f32 %v468_v21, %v1689_v16 }
 0x1c4   :  { %v387_v23 = vpop.f32.mrf.mxu1 }
 0x1c5   :  { %v1701_v39 = vsub.f32 %v425_v28, %v441_v17  ;;  %v444_v40 = vmul.f32 2.0, %v387_v23  ;;  %470 = vmin.xlane.f32.xlu1 %v469_v34  ;;  %v473_v42 = vmin.f32 %v472_v24, %v1696_v31 }
 0x1c6   :  { %v389_v20 = vpop.f32.mrf.mxu1 }
 0x1c7   :  { %v1706_v46 = vsub.f32 %v428_v35, %v444_v40  ;;  %v445_v47 = vmul.f32 2.0, %v389_v20  ;;  %v474_v49 = vmin.f32 %v473_v42, %v1701_v39  ;;  %v678_v20 = vld [vmem:[%s2113_s3 + $0xf8] sm:$0xff] }
 0x1c8   :  { %1175 = vmatprep.subr.mxu0 %v678_v20  ;;  %v700_v20 = vld [vmem:[%s2113_s3 + $0x1a8] sm:$0xff] }
 0x1c9   :  { %v1709_v52 = vsub.f32 %v429_v45, %v445_v47  ;;  %475 = vmin.xlane.f32.xlu0 %v474_v49  ;;  %v478_v27 = vmin.f32 %v477_v30, %v1706_v46  ;;  %v710_v45 = vld [vmem:[%s2113_s3 + $0x1f8] sm:$0xff]  ;;  %v677_v47 = vld [vmem:[%s2113_s3 + $0xf0] sm:$0xff] }
 0x1ca   :  { %v662_v30 = vld [vmem:[%s2113_s3 + $0x78] sm:$0xff]  ;;  %1219 = vmatprep.subr.mxu1 %v710_v45  ;;  %v709_v49 = vld [vmem:[%s2113_s3 + $0x1f0] sm:$0xff]  ;;  %v652_v45 = vld [vmem:[%s2113_s3 + $0x28] sm:$0xff] }
 0x1cb   :  { %v479_v54 = vmin.f32 %v478_v27, %v1709_v52  ;;  %1176 = vmatpush3.msra.mxu0 %v662_v30  ;;  %v693_v27 = vld [vmem:[%s2113_s3 + $0x170] sm:$0xff]  ;;  %v684_v30 = vld [vmem:[%s2113_s3 + $0x128] sm:$0xff] }
 0x1cc   :  { %1177 = vmatprep.subr.mxu0 %v677_v47  ;;  %v699_v47 = vld [vmem:[%s2113_s3 + $0x1a0] sm:$0xff] }
 0x1cd   :  { %480 = vmin.xlane.f32.xlu1 %v479_v54  ;;  %v676_v54 = vld [vmem:[%s2113_s3 + $0xe8] sm:$0xff] }
 0x24a   :  { %v466_v56 = vpop.xlane.xlu0 %465 }
 0x24b   :  { %vm487_vm1 = vcmp.le.f32.partialorder %v1667_v38, %v466_v56  ;;  %vm488_vm2 = vcmp.le.f32.partialorder %v1663_v32, %v466_v56  ;;  %vm489_vm3 = vcmp.le.f32.partialorder %v1673_v48, %v466_v56  ;;  %vm490_vm5 = vcmp.le.f32.partialorder %v1677_v58, %v466_v56  ;;  %v708_v56 = vld [vmem:[%s2113_s3 + $0x1e8] sm:$0xff] }
 0x24c   :  { %v503_v59 = vsel %vm487_vm1, %v1714_v55, 512  ;;  %v504_v60 = vsel %vm488_vm2, %v1717_v33, 512  ;;  %v505_v1 = vsel %vm489_vm3, %v1720_v57, 512  ;;  %v506_v48 = vsel %vm490_vm5, %v1728_v61, 512 }
 0x24d   :  { %vm519_vm4 = vcmp.lt.s32.totalorder %v503_v59, %v504_v60 }
 0x24e   :  { %v471_v62 = vpop.xlane.xlu1 %470  ;;  %v520_v63 = vsel %vm519_vm4, %v503_v59, %v504_v60  ;;  %v660_v59 = vld [vmem:[%s2113_s3 + $0x68] sm:$0xff] }
 0x24f   :  { %vm491_vm6 = vcmp.le.f32.partialorder %v1675_v53, %v471_v62  ;;  %vm492_vm7 = vcmp.le.f32.partialorder %v1669_v44, %v471_v62  ;;  %vm493_vm8 = vcmp.le.f32.partialorder %v1684_v4, %v471_v62  ;;  %vm521_vm9 = vcmp.lt.s32.totalorder %v520_v63, %v505_v1  ;;  %v692_v60 = vld [vmem:[%s2113_s3 + $0x168] sm:$0xff] }
 0x250   :  { %v507_v32 = vsel %vm491_vm6, %v1714_v55, 512  ;;  %v508_v38 = vsel %vm492_vm7, %v1717_v33, 512  ;;  %v522_v2 = vsel %vm521_vm9, %v520_v63, %v505_v1  ;;  %vm494_vm12 = vcmp.le.f32.partialorder %v1689_v16, %v471_v62  ;;  %v675_v62 = vld [vmem:[%s2113_s3 + $0xe0] sm:$0xff] }
 0x251   :  { %vm539_vm10 = vcmp.lt.s32.totalorder %v507_v32, %v508_v38  ;;  %vm523_vm11 = vcmp.lt.s32.totalorder %v522_v2, %v506_v48  ;;  %v509_v53 = vsel %vm493_vm8, %v1720_v57, 512  ;;  %v510_v12 = vsel %vm494_vm12, %v1728_v61, 512  ;;  %v707_v63 = vld [vmem:[%s2113_s3 + $0x1e0] sm:$0xff] }
 0x252   :  { %v476_v58 = vpop.xlane.xlu0 %475  ;;  %v540_v3 = vsel %vm539_vm10, %v507_v32, %v508_v38  ;;  %v1745_v5 = vsel %vm523_vm11, %v522_v2, %v506_v48  ;;  %v659_v1 = vld [vmem:[%s2113_s3 + $0x60] sm:$0xff]  ;;  %v674_v38 = vld [vmem:[%s2113_s3 + $0xd8] sm:$0xff] }
 0x253   :  { %vm495_vm13 = vcmp.le.f32.partialorder %v1687_v9, %v476_v58  ;;  %vm496_vm14 = vcmp.le.f32.partialorder %v1682_v0, %v476_v58  ;;  %vm497_vm15 = vcmp.le.f32.partialorder %v1696_v31, %v476_v58  ;;  %vm498_vm1 = vcmp.le.f32.partialorder %v1701_v39, %v476_v58  ;;  %v691_v32 = vld [vmem:[%s2113_s3 + $0x160] sm:$0xff]  ;;  %v706_v48 = vld [vmem:[%s2113_s3 + $0x1d8] sm:$0xff] }
 0x254   :  { %v511_v44 = vsel %vm495_vm13, %v1714_v55, 512  ;;  %v512_v4 = vsel %vm496_vm14, %v1717_v33, 512  ;;  %v526_v7 = vshra.s32 %v1745_v5, 16  ;;  %vm541_vm3 = vcmp.lt.s32.totalorder %v540_v3, %v509_v53  ;;  %v658_v2 = vld [vmem:[%s2113_s3 + $0x58] sm:$0xff] }
 0x255   :  { %vm559_vm2 = vcmp.lt.s32.totalorder %v511_v44, %v512_v4  ;;  %v542_v9 = vsel %vm541_vm3, %v540_v3, %v509_v53  ;;  %v513_v0 = vsel %vm497_vm15, %v1720_v57, 512  ;;  %v514_v21 = vsel %vm498_vm1, %v1728_v61, 512  ;;  %v690_v58 = vld [vmem:[%s2113_s3 + $0x158] sm:$0xff]  ;;  %v673_v3 = vld [vmem:[%s2113_s3 + $0xd0] sm:$0xff] }
 0x256   :  { %v481_v10 = vpop.xlane.xlu1 %480  ;;  %v560_v13 = vsel %vm559_vm2, %v511_v44, %v512_v4  ;;  %v1756_v19 = vcvt.s32.f32 %v526_v7  ;;  %vm543_vm9 = vcmp.lt.s32.totalorder %v542_v9, %v510_v12  ;;  %v705_v53 = vld [vmem:[%s2113_s3 + $0x1d0] sm:$0xff]  ;;  %v672_v7 = vld [vmem:[%s2113_s3 + $0xc8] sm:$0xff]  ;;  %vm1988_vm3 = vcmp.lt.s32.totalorder %v36_v6, 512 }
 0x257   :  { %vm499_vm4 = vcmp.le.f32.partialorder %v1699_v37, %v481_v10  ;;  %vm500_vm5 = vcmp.le.f32.partialorder %v1694_v29, %v481_v10  ;;  %vm501_vm6 = vcmp.le.f32.partialorder %v1706_v46, %v481_v10  ;;  %vm502_vm7 = vcmp.le.f32.partialorder %v1709_v52, %v481_v10  ;;  %v694_v46 = vld [vmem:[%s2113_s3 + $0x178] sm:$0xff]  ;;  %v661_v52 = vld [vmem:[%s2113_s3 + $0x70] sm:$0xff]  ;;  %v704_v10 = vld [vmem:[%s2113_s3 + $0x1c8] sm:$0xff]  ;;  %40 = vst.msk [vmem:[#allocation3] sm:$0xf] %vm1988_vm3, %v1381_v36 }
 0x258   :  { %v515_v14 = vsel %vm499_vm4, %v1714_v55, 512  ;;  %v516_v16 = vsel %vm500_vm5, %v1717_v33, 512  ;;  %vm561_vm10 = vcmp.lt.s32.totalorder %v560_v13, %v513_v0  ;;  %v517_v24 = vsel %vm501_vm6, %v1720_v57, 512  ;;  %529 = vmin.xlane.f32.xlu0 %v1756_v19  ;;  %1220 = vmatpush3.msra.mxu1 %v694_v46  ;;  %v657_v44 = vld [vmem:[%s2113_s3 + $0x50] sm:$0xff]  ;;  %v667_v46 = vld [vmem:[%s2113_s3 + $0xa0] sm:$0xff] }
 0x259   :  { %vm579_vm8 = vcmp.lt.s32.totalorder %v515_v14, %v516_v16  ;;  %v1762_v25 = vsel %vm543_vm9, %v542_v9, %v510_v12  ;;  %v562_v26 = vsel %vm561_vm10, %v560_v13, %v513_v0  ;;  %v518_v17 = vsel %vm502_vm7, %v1728_v61, 512  ;;  %1221 = vmatprep.subr.mxu1 %v709_v49  ;;  %1178 = vmatpush3.msra.mxu0 %v661_v52  ;;  %v689_v4 = vld [vmem:[%s2113_s3 + $0x150] sm:$0xff]  ;;  %v656_v12 = vld [vmem:[%s2113_s3 + $0x48] sm:$0xff]  ;;  %v671_v13 = vld [vmem:[%s2113_s3 + $0xc0] sm:$0xff] }
 0x25a   :  { %v580_v28 = vsel %vm579_vm8, %v515_v14, %v516_v16  ;;  %v546_v29 = vshra.s32 %v1762_v25, 16  ;;  %vm563_vm11 = vcmp.lt.s32.totalorder %v562_v26, %v514_v21  ;;  %1222 = vmatpush3.msra.mxu1 %v693_v27  ;;  %1179 = vmatprep.subr.mxu0 %v676_v54  ;;  %v688_v9 = vld [vmem:[%s2113_s3 + $0x148] sm:$0xff]  ;;  %v703_v0 = vld [vmem:[%s2113_s3 + $0x1c0] sm:$0xff]  ;;  %v666_v27 = vld [vmem:[%s2113_s3 + $0x98] sm:$0xff]  ;;  %vm901_vm4 = vcmask 7168  }
 0x25b   :  { %vm581_vm12 = vcmp.lt.s32.totalorder %v580_v28, %v517_v24  ;;  %v1765_v31 = vsel %vm563_vm11, %v562_v26, %v514_v21  ;;  %1223 = vmatprep.subr.mxu1 %v708_v56  ;;  %1180 = vmatpush3.msra.mxu0 %v660_v59  ;;  %v655_v14 = vld [vmem:[%s2113_s3 + $0x40] sm:$0xff]  ;;  %v670_v21 = vld [vmem:[%s2113_s3 + $0xb8] sm:$0xff] }
 0x25c   :  { %v582_v34 = vsel %vm581_vm12, %v580_v28, %v517_v24  ;;  %v1768_v23 = vcvt.s32.f32 %v546_v29  ;;  %v566_v35 = vshra.s32 %v1765_v31, 16  ;;  %1224 = vmatpush3.msra.mxu1 %v692_v60  ;;  %1181 = vmatprep.subr.mxu0 %v675_v62  ;;  %v687_v16 = vld [vmem:[%s2113_s3 + $0x140] sm:$0xff]  ;;  %v702_v24 = vld [vmem:[%s2113_s3 + $0x1b8] sm:$0xff]  ;;  %v669_v29 = vld [vmem:[%s2113_s3 + $0xb0] sm:$0xff]  ;;  %v525_v60 = vand.u32 65535, %v1745_v5 }
 0x25d   :  { %vm583_vm13 = vcmp.lt.s32.totalorder %v582_v34, %v518_v17  ;;  %1225 = vmatprep.subr.mxu1 %v707_v63  ;;  %1182 = vmatpush3.msra.mxu0 %v659_v1  ;;  %v654_v26 = vld [vmem:[%s2113_s3 + $0x38] sm:$0xff]  ;;  %v651_v49 = vld [vmem:[%s2113_s3 + $0x20] sm:$0xff]  ;;  %v545_v1 = vand.u32 65535, %v1762_v25 }
 0x25e   :  { %v1771_v37 = vsel %vm583_vm13, %v582_v34, %v518_v17  ;;  %549 = vmin.xlane.f32.xlu1 %v1768_v23  ;;  %v1774_v39 = vcvt.s32.f32 %v566_v35  ;;  %1226 = vmatpush3.msra.mxu1 %v691_v32  ;;  %v686_v28 = vld [vmem:[%s2113_s3 + $0x138] sm:$0xff]  ;;  %v701_v17 = vld [vmem:[%s2113_s3 + $0x1b0] sm:$0xff]  ;;  %v683_v52 = vld [vmem:[%s2113_s3 + $0x120] sm:$0xff]  ;;  %v527_v63 = vcvt.s32.f32 %v525_v60 }
 0x25f   :  { %v586_v40 = vshra.s32 %v1771_v37, 16  ;;  %1183 = vmatprep.subr.mxu0 %v674_v38  ;;  %1227 = vmatprep.subr.mxu1 %v706_v48  ;;  %v653_v34 = vld [vmem:[%s2113_s3 + $0x30] sm:$0xff]  ;;  %v698_v54 = vld [vmem:[%s2113_s3 + $0x198] sm:$0xff]  ;;  %v565_v38 = vand.u32 65535, %v1765_v31 }
 0x260   :  { %569 = vmin.xlane.f32.xlu0 %v1774_v39  ;;  %1184 = vmatpush3.msra.mxu0 %v658_v2  ;;  %v685_v35 = vld [vmem:[%s2113_s3 + $0x130] sm:$0xff]  ;;  %v650_v56 = vld [vmem:[%s2113_s3 + $0x18] sm:$0xff]  ;;  %v547_v2 = vcvt.s32.f32 %v545_v1 }
 0x261   :  { %v1778_v42 = vcvt.s32.f32 %v586_v40  ;;  %1228 = vmatpush3.msra.mxu1 %v690_v58  ;;  %1185 = vmatprep.subr.mxu0 %v673_v3  ;;  %v668_v40 = vld [vmem:[%s2113_s3 + $0xa8] sm:$0xff]  ;;  %v682_v59 = vld [vmem:[%s2113_s3 + $0x118] sm:$0xff]  ;;  %v585_v58 = vand.u32 65535, %v1771_v37  ;;  %v567_v5 = vcvt.s32.f32 %v565_v38  ;;  %v697_v37 = vld [vmem:[%s2113_s3 + $0x190] sm:$0xff] }
 0x262   :  { %1229 = vmatprep.subr.mxu1 %v705_v53  ;;  %1186 = vmatpush3.msra.mxu0 %v657_v44 }
 0x263   :  { %589 = vmin.xlane.f32.xlu1 %v1778_v42  ;;  %1230 = vmatpush3.msra.mxu1 %v689_v4  ;;  %v587_v44 = vcvt.s32.f32 %v585_v58  ;;  %v664_v4 = vld [vmem:[%s2113_s3 + $0x88] sm:$0xff] }
 0x264   :  { %1187 = vmatprep.subr.mxu0 %v672_v7  ;;  %1231 = vmatprep.subr.mxu1 %v704_v10  ;;  %v696_v7 = vld [vmem:[%s2113_s3 + $0x188] sm:$0xff] }
 0x265   :  { %1188 = vmatpush3.msra.mxu0 %v656_v12  ;;  %1232 = vmatpush3.msra.mxu1 %v688_v9  ;;  %v648_v10 = vld [vmem:[%s2113_s3 + $0x8] sm:$0xff]  ;;  %v663_v9 = vld [vmem:[%s2113_s3 + $0x80] sm:$0xff] }
 0x266   :  { %1189 = vmatprep.subr.mxu0 %v671_v13  ;;  %1233 = vmatprep.subr.mxu1 %v703_v0  ;;  %v680_v12 = vld [vmem:[%s2113_s3 + $0x108] sm:$0xff]  ;;  %v695_v13 = vld [vmem:[%s2113_s3 + $0x180] sm:$0xff] }
 0x267   :  { %1190 = vmatpush3.msra.mxu0 %v655_v14  ;;  %1234 = vmatpush3.msra.mxu1 %v687_v16  ;;  %v647_v0 = vld [vmem:[%s2113_s3] sm:$0xff] }
 0x268   :  { %1191 = vmatprep.subr.mxu0 %v670_v21  ;;  %1235 = vmatprep.subr.mxu1 %v702_v24  ;;  %v679_v14 = vld [vmem:[%s2113_s3 + $0x100] sm:$0xff] }
 0x269   :  { %1192 = vmatpush3.msra.mxu0 %v654_v26  ;;  %1236 = vmatpush3.msra.mxu1 %v686_v28 }
 0x26a   :  { %1193 = vmatprep.subr.mxu0 %v669_v29  ;;  %1237 = vmatprep.subr.mxu1 %v701_v17 }
 0x26b   :  { %1194 = vmatpush3.msra.mxu0 %v653_v34  ;;  %1238 = vmatpush3.msra.mxu1 %v685_v35 }
 0x26c   :  { %1195 = vmatprep.subr.mxu0 %v668_v40  ;;  %1239 = vmatprep.subr.mxu1 %v700_v20 }
 0x26d   :  { %1196 = vmatpush3.msra.mxu0 %v652_v45  ;;  %1240 = vmatpush3.msra.mxu1 %v684_v30  ;;  %v1382_v30 = vmov 1.0  }
 0x26e   :  { %1197 = vmatprep.subr.mxu0 %v667_v46  ;;  %1241 = vmatprep.subr.mxu1 %v699_v47 }
 0x26f   :  { %1198 = vmatpush3.msra.mxu0 %v651_v49  ;;  %1242 = vmatpush3.msra.mxu1 %v683_v52 }
 0x270   :  { %1199 = vmatprep.subr.mxu0 %v666_v27  ;;  %1243 = vmatprep.subr.mxu1 %v698_v54 }
 0x271   :  { %1200 = vmatpush3.msra.mxu0 %v650_v56  ;;  %1244 = vmatpush3.msra.mxu1 %v682_v59 }
 0x272   :  { %1245 = vmatprep.subr.mxu1 %v697_v37 }
 0x2e1   :  { %v530_v62 = vpop.xlane.xlu0 %529 }
 0x2e2   :  { %vm531_vm14 = vcmp.eq.f32.partialorder %v1756_v19, %v530_v62  ;;  %v536_v21 = vcvt.f32.s32 %v530_v62 }
 0x2e3   :  { %v532_v32 = vsel %vm531_vm14, %v527_v63, inf }
 0x2e4   :  { %533 = vmin.xlane.f32.xlu0 %v532_v32  ;;  %v537_v28 = vshll.u32 %v536_v21, 16 }
 0x2e7   :  { %v550_v48 = vpop.xlane.xlu1 %549 }
 0x2e8   :  { %vm551_vm15 = vcmp.eq.f32.partialorder %v1768_v23, %v550_v48  ;;  %v665_v23 = vld [vmem:[%s2113_s3 + $0x90] sm:$0xff]  ;;  %v556_v24 = vcvt.f32.s32 %v550_v48 }
 0x2e9   :  { %v552_v3 = vsel %vm551_vm15, %v547_v2, inf  ;;  %v1943_v53 = vpop.xlane.xlu0 %569  ;;  %1201 = vmatprep.subr.mxu0 %v665_v23 }
 0x2ea   :  { %553 = vmin.xlane.f32.xlu1 %v552_v3  ;;  %vm571_vm1 = vcmp.eq.f32.partialorder %v1774_v39, %v1943_v53  ;;  %v649_v39 = vld [vmem:[%s2113_s3 + $0x10] sm:$0xff]  ;;  %v557_v34 = vshll.u32 %v556_v24, 16  ;;  %v576_v35 = vcvt.f32.s32 %v1943_v53 }
 0x2eb   :  { %v572_v19 = vsel %vm571_vm1, %v567_v5, inf  ;;  %1202 = vmatpush3.msra.mxu0 %v649_v39 }
 0x2ec   :  { %v1947_v25 = vpop.xlane.xlu1 %589  ;;  %573 = vmin.xlane.f32.xlu0 %v572_v19  ;;  %1203 = vmatprep.subr.mxu0 %v664_v4  ;;  %v577_v27 = vshll.u32 %v576_v35, 16 }
 0x2ed   :  { %vm591_vm2 = vcmp.eq.f32.partialorder %v1778_v42, %v1947_v25  ;;  %v681_v42 = vld [vmem:[%s2113_s3 + $0x110] sm:$0xff]  ;;  %1204 = vmatpush3.msra.mxu0 %v648_v10  ;;  %v596_v40 = vcvt.f32.s32 %v1947_v25 }
 0x2ee   :  { %v592_v31 = vsel %vm591_vm2, %v587_v44, inf  ;;  %1246 = vmatpush3.msra.mxu1 %v681_v42  ;;  %1205 = vmatprep.subr.mxu0 %v663_v9 }
 0x2ef   :  { %593 = vmin.xlane.f32.xlu1 %v592_v31  ;;  %1247 = vmatprep.subr.mxu1 %v696_v7  ;;  %v597_v59 = vshll.u32 %v596_v40, 16 }
 0x2f0   :  { %1248 = vmatpush3.msra.mxu1 %v680_v12  ;;  %1206 = vmatpush3.msra.mxu0 %v647_v0 }
 0x2f1   :  { %1249 = vmatprep.subr.mxu1 %v695_v13 }
 0x2f2   :  { %1250 = vmatpush3.msra.mxu1 %v679_v14 }
 0x36d   :  { %v534_v26 = vpop.xlane.xlu0 %533 }
 0x36e   :  { %v535_v29 = vcvt.f32.s32 %v534_v26 }
 0x370   :  { %v538_v17 = vadd.s32 %v537_v28, %v535_v29  ;;  %v1383_v28 = vmov 1966171168  }
 0x371   :  { %v979_v29 = vunpack.c.l.s4 %v1383_v28 }
 0x372   :  { %902 = vst.msk [vmem:[%s2118_s8] sm:$0xff] %vm901_vm4, %v538_v17  ;;  %vm600_vm5 = vcmp.eq.s32.totalorder %v1717_v33, %v538_v17  ;;  %vm602_vm6 = vcmp.eq.s32.totalorder %v1728_v61, %v538_v17  ;;  %vm599_vm7 = vcmp.eq.s32.totalorder %v1714_v55, %v538_v17  ;;  %vm601_vm8 = vcmp.eq.s32.totalorder %v1720_v57, %v538_v17 }
 0x373   :  { %v554_v6 = vpop.xlane.xlu1 %553  ;;  %v1124_v45 = vsel %vm600_vm5, 1.0, %v1381_v36  ;;  %1139 = vmatprep.mubr.msk.f32.mxu0 %vm600_vm5, %v1382_v30  ;;  %v1126_v46 = vsel %vm602_vm6, 1.0, %v1381_v36  ;;  %1147 = vmatprep.mubr.msk.f32.mxu1 %vm602_vm6, %v1382_v30  ;;  %v1123_v47 = vsel %vm599_vm7, 1.0, %v1381_v36  ;;  %v1125_v52 = vsel %vm601_vm8, 1.0, %v1381_v36 }
 0x374   :  { %v555_v20 = vcvt.f32.s32 %v554_v6  ;;  %886 = vst [vmem:[#allocation4 + $0x8] sm:$0xff] %v1124_v45  ;;  %888 = vst [vmem:[#allocation4 + $0x18] sm:$0xff] %v1126_v46  ;;  %1140 = vmatmul.mubr.msk.f32.vlgmr.msra.gmra.mxu0 %vm599_vm7, %v1382_v30  ;;  %1148 = vmatmul.mubr.msk.f32.vlgmr.msra.gmra.mxu1 %vm601_vm8, %v1382_v30  ;;  %vm1041_vm7 = vcmask 1040384  }
 0x375   :  { %v574_v49 = vpop.xlane.xlu0 %573  ;;  %885 = vst [vmem:[#allocation4] sm:$0xff] %v1123_v47  ;;  %887 = vst [vmem:[#allocation4 + $0x10] sm:$0xff] %v1125_v52 }
 0x376   :  { %v558_v54 = vadd.s32 %v557_v34, %v555_v20  ;;  %v575_v56 = vcvt.f32.s32 %v574_v49 }
 0x378   :  { %903 = vst.msk [vmem:[%s2118_s8 + $0x8] sm:$0xff] %vm901_vm4, %v558_v54  ;;  %v578_v60 = vadd.s32 %v577_v27, %v575_v56  ;;  %vm604_vm9 = vcmp.eq.s32.totalorder %v1717_v33, %v558_v54  ;;  %vm606_vm10 = vcmp.eq.s32.totalorder %v1728_v61, %v558_v54  ;;  %vm603_vm11 = vcmp.eq.s32.totalorder %v1714_v55, %v558_v54  ;;  %v594_v62 = vpop.xlane.xlu1 %593 }
 0x379   :  { %v1128_v63 = vsel %vm604_vm9, 1.0, %v1381_v36  ;;  %1141 = vmatprep.mubr.msk.f32.mxu0 %vm604_vm9, %v1382_v30  ;;  %v1130_v1 = vsel %vm606_vm10, 1.0, %v1381_v36  ;;  %1149 = vmatprep.mubr.msk.f32.mxu1 %vm606_vm10, %v1382_v30  ;;  %v1127_v32 = vsel %vm603_vm11, 1.0, %v1381_v36  ;;  %vm605_vm12 = vcmp.eq.s32.totalorder %v1720_v57, %v558_v54 }
 0x37a   :  { %904 = vst.msk [vmem:[%s2118_s8 + $0x10] sm:$0xff] %vm901_vm4, %v578_v60  ;;  %890 = vst [vmem:[#allocation4 + $0x28] sm:$0xff] %v1128_v63  ;;  %v945_v38 = vadd.f32 %v1128_v63, %v1124_v45  ;;  %v963_v48 = vadd.f32 %v1130_v1, %v1126_v46  ;;  %1142 = vmatmul.mubr.msk.f32.gmra.mxu0 %vm603_vm11, %v1382_v30  ;;  %v936_v2 = vadd.f32 %v1127_v32, %v1123_v47 }
 0x37b   :  { %892 = vst [vmem:[#allocation4 + $0x38] sm:$0xff] %v1130_v1  ;;  %889 = vst [vmem:[#allocation4 + $0x20] sm:$0xff] %v1127_v32  ;;  %v1129_v58 = vsel %vm605_vm12, 1.0, %v1381_v36  ;;  %1150 = vmatmul.mubr.msk.f32.gmra.mxu1 %vm605_vm12, %v1382_v30  ;;  %v595_v53 = vcvt.f32.s32 %v594_v62  ;;  %vm608_vm13 = vcmp.eq.s32.totalorder %v1717_v33, %v578_v60  ;;  %vm610_vm14 = vcmp.eq.s32.totalorder %v1728_v61, %v578_v60 }
 0x37c   :  { %891 = vst [vmem:[#allocation4 + $0x30] sm:$0xff] %v1129_v58  ;;  %v954_v3 = vadd.f32 %v1129_v58, %v1125_v52  ;;  %v1132_v5 = vsel %vm608_vm13, 1.0, %v1381_v36  ;;  %1143 = vmatprep.mubr.msk.f32.mxu0 %vm608_vm13, %v1382_v30  ;;  %v1134_v19 = vsel %vm610_vm14, 1.0, %v1381_v36  ;;  %1151 = vmatprep.mubr.msk.f32.mxu1 %vm610_vm14, %v1382_v30  ;;  %vm607_vm15 = vcmp.eq.s32.totalorder %v1714_v55, %v578_v60  ;;  %v935_v58 = vld [vmem:[#allocation3] sm:$0xf] }
 0x37d   :  { %vm609_vm1 = vcmp.eq.s32.totalorder %v1720_v57, %v578_v60  ;;  %v598_v25 = vadd.s32 %v597_v59, %v595_v53  ;;  %894 = vst [vmem:[#allocation4 + $0x48] sm:$0xff] %v1132_v5  ;;  %896 = vst [vmem:[#allocation4 + $0x58] sm:$0xff] %v1134_v19  ;;  %v1131_v44 = vsel %vm607_vm15, 1.0, %v1381_v36  ;;  %v946_v31 = vadd.f32 %v1132_v5, %v945_v38 }
 0x37e   :  { %v964_v23 = vadd.f32 %v1134_v19, %v963_v48  ;;  %1144 = vmatmul.mubr.msk.f32.gmra.mxu0 %vm607_vm15, %v1382_v30  ;;  %893 = vst [vmem:[#allocation4 + $0x40] sm:$0xff] %v1131_v44  ;;  %v937_v37 = vadd.f32 %v1131_v44, %v936_v2  ;;  %v1133_v39 = vsel %vm609_vm1, 1.0, %v1381_v36 }
 0x37f   :  { %1152 = vmatmul.mubr.msk.f32.gmra.mxu1 %vm609_vm1, %v1382_v30  ;;  %905 = vst.msk [vmem:[%s2118_s8 + $0x18] sm:$0xff] %vm901_vm4, %v598_v25  ;;  %895 = vst [vmem:[#allocation4 + $0x50] sm:$0xff] %v1133_v39  ;;  %v955_v42 = vadd.f32 %v1133_v39, %v954_v3  ;;  %vm612_vm2 = vcmp.eq.s32.totalorder %v1717_v33, %v598_v25  ;;  %vm614_vm5 = vcmp.eq.s32.totalorder %v1728_v61, %v598_v25 }
 0x380   :  { %vm611_vm6 = vcmp.eq.s32.totalorder %v1714_v55, %v598_v25  ;;  %v1136_v4 = vsel %vm612_vm2, 1.0, %v1381_v36  ;;  %1145 = vmatprep.mubr.msk.f32.mxu0 %vm612_vm2, %v1382_v30  ;;  %v1138_v7 = vsel %vm614_vm5, 1.0, %v1381_v36  ;;  %1153 = vmatprep.mubr.msk.f32.mxu1 %vm614_vm5, %v1382_v30  ;;  %vm613_vm4 = vcmp.eq.s32.totalorder %v1720_v57, %v598_v25 }
 0x381   :  { %v1135_v10 = vsel %vm611_vm6, 1.0, %v1381_v36  ;;  %898 = vst [vmem:[#allocation4 + $0x68] sm:$0xff] %v1136_v4  ;;  %v947_v12 = vadd.f32 %v1136_v4, %v946_v31  ;;  %900 = vst [vmem:[#allocation4 + $0x78] sm:$0xff] %v1138_v7  ;;  %v965_v33 = vadd.f32 %v1138_v7, %v964_v23  ;;  %v1137_v55 = vsel %vm613_vm4, 1.0, %v1381_v36 }
 0x382   :  { %897 = vst [vmem:[#allocation4 + $0x60] sm:$0xff] %v1135_v10  ;;  %v938_v61 = vadd.f32 %v1135_v10, %v937_v37  ;;  %1146 = vmatmul.mubr.msk.f32.gmra.mxu0 %vm611_vm6, %v1382_v30  ;;  %899 = vst [vmem:[#allocation4 + $0x70] sm:$0xff] %v1137_v55  ;;  %v956_v9 = vadd.f32 %v1137_v55, %v955_v42 }
 0x383   :  { %1154 = vmatmul.mubr.msk.f32.gmra.mxu1 %vm613_vm4, %v1382_v30  ;;  %v948_v13 = vrot.slane %v947_v12, 4  ;;  %v966_v0 = vrot.slane %v965_v33, 4  ;;  %v980_v30 = vunpack.c.0.s8 %v979_v29 }
 0x384   :  { %v939_v14 = vrot.slane %v938_v61, 4  ;;  %v957_v21 = vrot.slane %v956_v9, 4 }
 0x385   :  { %v949_v24 = vadd.f32 %v948_v13, %v947_v12  ;;  %v967_v57 = vadd.f32 %v966_v0, %v965_v33  ;;  %v983_v62 = vsub.s32 %v980_v30, %v1648_v8 }
 0x386   :  { %v940_v26 = vadd.f32 %v939_v14, %v938_v61  ;;  %v958_v17 = vadd.f32 %v957_v21, %v956_v9 }
 0x387   :  { %v950_v34 = vrot.slane %v949_v24, 2  ;;  %v968_v35 = vrot.slane %v967_v57, 2 }
 0x388   :  { %v941_v40 = vrot.slane %v940_v26, 2  ;;  %v959_v6 = vrot.slane %v958_v17, 2 }
 0x389   :  { %v951_v20 = vadd.f32 %v950_v34, %v949_v24  ;;  %v969_v45 = vadd.f32 %v968_v35, %v967_v57 }
 0x38a   :  { %v942_v46 = vadd.f32 %v941_v40, %v940_v26  ;;  %v960_v47 = vadd.f32 %v959_v6, %v958_v17 }
 0x38b   :  { %v952_v49 = vrot.slane %v951_v20, 1  ;;  %v970_v52 = vrot.slane %v969_v45, 1 }
 0x38c   :  { %v943_v27 = vrot.slane %v942_v46, 1  ;;  %v961_v54 = vrot.slane %v960_v47, 1 }
 0x38d   :  { %v953_v56 = vadd.f32 %v952_v49, %v951_v20  ;;  %v971_v59 = vadd.f32 %v970_v52, %v969_v45 }
 0x38e   :  { %v944_v60 = vadd.f32 %v943_v27, %v942_v46  ;;  %v962_v63 = vadd.f32 %v961_v54, %v960_v47 }
 0x390   :  { %v976_v1 = vcombine.low %v944_v60, %v953_v56  ;;  %v977_v32 = vcombine.low %v962_v63, %v971_v59 }
 0x392   :  { %v984_v38 = vrot.slane %v976_v1, %v983_v62  ;;  %v991_v48 = vrot.slane %v977_v32, %v983_v62 }
 0x394   :  { %v992_v2 = vcombine.low %v984_v38, %v991_v48 }
 0x396   :  { %v999_v3 = vrot.slane %v992_v2, %v983_v62 }
 0x398   :  { %v1001_v53 = vadd.f32 %v999_v3, %v935_v58 }
 0x39a   :  { %1006 = vst.msk [vmem:[#allocation3] sm:$0xf] %vm1988_vm3, %v1001_v53  ;;  %vm34_vm3 = vcmask 0  }
 0x39b   :  { %35 = vst.msk [vmem:[#allocation2] sm:$0x1] %vm34_vm3, %v1381_v36 }
 0x3a1   :  { %v1013_v5 = vld [vmem:[#allocation3] sm:$0xf] }
 0x3a2   :  { %v1015_v19 = vmul.f32 0.03125, %v1013_v5 }
 0x3a4   :  { %v1016_v25 = vadd.f32 1e-10, %v1015_v19 }
 0x3a6   :  { %1313 = vlog2.f32 %v1016_v25 }
 0x3b3   :  { %v1314_v44 = vpop.eup %1313 }
 0x3b4   :  { %v1018_v31 = vmul.f32 0.6931472, %v1314_v44 }
 0x3b6   :  { %v1019_v23 = vmul.f32 %v1018_v31, %v1015_v19 }
 0x3b8   :  { %v1024_v37 = vrot.slane %v1019_v23, %v396_v15  ;;  %v1028_v39 = vrot.slane %v1019_v23, %v400_v11  ;;  %v1032_v42 = vrot.slane %v1019_v23, %v404_v18  ;;  %v1036_v16 = vrot.slane %v1019_v23, %v408_v22 }
 0x3ba   :  { %v1042_v4 = vsel %vm1041_vm7, %v1024_v37, 0.0  ;;  %v1043_v7 = vsel %vm1041_vm7, %v1028_v39, 0.0  ;;  %v1045_v12 = vsel %vm1041_vm7, %v1032_v42, 0.0  ;;  %v1047_v61 = vsel %vm1041_vm7, %v1036_v16, 0.0 }
 0x3bb   :  { %v1044_v10 = vadd.f32 %v1043_v7, %v1042_v4 }
 0x3bd   :  { %v1046_v33 = vadd.f32 %v1045_v12, %v1044_v10 }
 0x3bf   :  { %v1048_v55 = vadd.f32 %v1047_v61, %v1046_v33 }
 0x3c1   :  { %1049 = vadd.xlane.f32.xlu1 %v1048_v55 }
 0x434   :  { %v1207_v9 = vpop.f32.mrf.mxu0  ;;  %v1251_v13 = vpop.f32.mrf.mxu1 }
 0x436   :  { %v1208_v15 = vpop.f32.mrf.mxu0  ;;  %v1252_v0 = vpop.f32.mrf.mxu1 }
 0x437   :  { %v1209_v14 = vadd.f32 %v1208_v15, %v1207_v9  ;;  %v1253_v11 = vadd.f32 %v1252_v0, %v1251_v13 }
 0x439   :  { %v863_v21 = vadd.f32 %v1253_v11, %v1209_v14 }
 0x43a   :  { %v1210_v24 = vpop.f32.mrf.mxu0 }
 0x43b   :  { %v1254_v18 = vpop.f32.mrf.mxu1  ;;  %881 = vst.msk [vmem:[%s2116_s6] sm:$0xff] %vm157_vm0, %v863_v21  ;;  %v906_v40 = vsub.f32 %v863_v21, %v1559_v41 }
 0x43c   :  { %v1211_v8 = vpop.f32.mrf.mxu0 }
 0x43d   :  { %v1255_v22 = vpop.f32.mrf.mxu1  ;;  %v1212_v57 = vadd.f32 %v1211_v8, %v1210_v24  ;;  %v911_v54 = vmul.f32 %v906_v40, %v906_v40 }
 0x43e   :  { %v1256_v26 = vadd.f32 %v1255_v22, %v1254_v18  ;;  %v1213_v28 = vpop.f32.mrf.mxu0 }
 0x43f   :  { %v1257_v29 = vpop.f32.mrf.mxu1  ;;  %v915_v1 = vsel %vm157_vm0, %v911_v54, 0.0 }
 0x440   :  { %v868_v17 = vadd.f32 %v1256_v26, %v1212_v57  ;;  %v1214_v34 = vpop.f32.mrf.mxu0 }
 0x441   :  { %v1258_v35 = vpop.f32.mrf.mxu1  ;;  %v1215_v20 = vadd.f32 %v1214_v34, %v1213_v28 }
 0x442   :  { %882 = vst.msk [vmem:[%s2116_s6 + $0x8] sm:$0xff] %vm157_vm0, %v868_v17  ;;  %v907_v6 = vsub.f32 %v868_v17, %v1564_v43  ;;  %v1259_v45 = vadd.f32 %v1258_v35, %v1257_v29  ;;  %v1216_v46 = vpop.f32.mrf.mxu0 }
 0x443   :  { %v1260_v30 = vpop.f32.mrf.mxu1 }
 0x444   :  { %v912_v47 = vmul.f32 %v907_v6, %v907_v6  ;;  %v873_v49 = vadd.f32 %v1259_v45, %v1215_v20  ;;  %v1217_v52 = vpop.f32.mrf.mxu0 }
 0x445   :  { %v1261_v27 = vpop.f32.mrf.mxu1  ;;  %v1218_v56 = vadd.f32 %v1217_v52, %v1216_v46 }
 0x446   :  { %883 = vst.msk [vmem:[%s2116_s6 + $0x10] sm:$0xff] %vm157_vm0, %v873_v49  ;;  %v908_v41 = vsub.f32 %v873_v49, %v1582_v51  ;;  %v1262_v59 = vadd.f32 %v1261_v27, %v1260_v30  ;;  %v916_v62 = vsel %vm157_vm0, %v912_v47, 0.0 }
 0x447   :  { %v917_v38 = vadd.f32 %v916_v62, %v915_v1 }
 0x448   :  { %v913_v60 = vmul.f32 %v908_v41, %v908_v41  ;;  %v878_v43 = vadd.f32 %v1262_v59, %v1218_v56 }
 0x44a   :  { %884 = vst.msk [vmem:[%s2116_s6 + $0x18] sm:$0xff] %vm157_vm0, %v878_v43  ;;  %v909_v63 = vsub.f32 %v878_v43, %v1580_v50  ;;  %v918_v32 = vsel %vm157_vm0, %v913_v60, 0.0  ;;  %s1317_s6 = scalar_lea.vmem %s1071_s29, 2048 }
 0x44b   :  { %v919_v51 = vadd.f32 %v918_v32, %v917_v38  ;;  %p1318_p0 = scmp.ne.s32.totalorder %s1071_s29, %s1317_s6  ;;  %p1323_p2 = scmp.lt.s32.totalorder %s1317_s6, %s1317_s6 }
 0x44c   :  { %v914_v48 = vmul.f32 %v909_v63, %v909_v63 }
 0x44d   :  { %p1324_p3 = por %p1323_p2, %p1322_p1 }
 0x44e   :  { %v920_v2 = vsel %vm157_vm0, %v914_v48, 0.0 }
 0x44f   :  { %v921_v58 = vadd.f32 %v920_v2, %v919_v51  ;;  %p1325_p4 = pnand %p1324_p3, %p1318_p0 }
 0x451   :  { %922 = vadd.xlane.f32.xlu0 %v921_v58 }
 0x452   :  { %1328 = shalt.err (!%p1325_p4)
}
 0x453   :  { %s1385_s30 = smov 512   ;;  %s1386_s11 = smov 32   ;;  %v1050_v50 = vpop.xlane.xlu1 %1049  ;;  %v910_v4 = vld [vmem:[#allocation2] sm:$0x1] }
 0x454   :  { %1076 = dma.vmem_to_hbm [thread:$0]  %s1071_s29, 2048, %s2117_s7, [#allocation5], %s1385_s30, %s1385_s30, %s1386_s11   ;;  %v1051_v3 = vrot.slane %v1050_v50, 4 }
 0x455   :  { %s1387_s13 = smov [#allocation6]  }
 0x456   :  { %v1052_v53 = vadd.f32 %v1051_v3, %v1050_v50  ;;  %s1085_s5 = sshll.u32 %s1387_s13, 4  ;;  %s1086_s5 = int_to_ptr.vmem [resolvable:$true] %s1085_s5 }
 0x457   :  { %s1337_s14 = scalar_lea.vmem %s1086_s5, 16  ;;  %s1341_s15 = scalar_lea.vmem %s1086_s5, 32 }
 0x458   :  { %v1053_v36 = vrot.slane %v1052_v53, 2  ;;  %p1338_p5 = scmp.ne.s32.totalorder %s1086_s5, %s1337_s14  ;;  %p1342_p6 = scmp.lt.s32.totalorder %s1086_s5, %s1086_s5 }
 0x459   :  { %p1343_p7 = scmp.lt.s32.totalorder %s1341_s15, %s1337_s14 }
 0x45a   :  { %v1054_v44 = vadd.f32 %v1053_v36, %v1052_v53 }
 0x45b   :  { %p1344_p8 = por %p1343_p7, %p1342_p6 }
 0x45c   :  { %v1055_v37 = vrot.slane %v1054_v44, 1 }
 0x45d   :  { %p1345_p9 = pnand %p1344_p8, %p1338_p5 }
 0x45e   :  { %v1056_v16 = vadd.f32 %v1055_v37, %v1054_v44 }
 0x4da   :  { %v923_v5 = vpop.xlane.xlu0 %922 }
 0x4db   :  { %v924_v19 = vrot.slane %v923_v5, 4 }
 0x4dd   :  { %v925_v25 = vadd.f32 %v924_v19, %v923_v5 }
 0x4df   :  { %v926_v31 = vrot.slane %v925_v25, 2 }
 0x4e1   :  { %v927_v23 = vadd.f32 %v926_v31, %v925_v25 }
 0x4e3   :  { %v928_v39 = vrot.slane %v927_v23, 1 }
 0x4e5   :  { %v929_v42 = vadd.f32 %v928_v39, %v927_v23 }
 0x4e7   :  { %1301 = vpush %v929_v42 }
 0x4e8   :  { %1303 = vpush %v1056_v16 }
 0x518   :  { %s1302_s4 = spop %1301 }
 0x519   :  { %v931_v7 = vstv %s1302_s4  ;;  %s1304_s7 = spop %1303 }
 0x51a   :  { %v932_v10 = vadd.f32 %v931_v7, %v910_v4  ;;  %v1058_v12 = vstv %s1304_s7 }
 0x51b   :  { %v1059_v33 = vsub.f32 0.0, %v1058_v12 }
 0x51c   :  { %934 = vst.msk [vmem:[#allocation2] sm:$0x1] %vm34_vm3, %v932_v10 }
 0x51d   :  { %v1060_v61 = vmul.f32 1.442695, %v1059_v33 }
 0x51f   :  { %1315 = vpow2.f32 %v1060_v61 }
 0x523   :  { %v1010_v55 = vld [vmem:[#allocation2] sm:$0x1] }
 0x524   :  { %v1011_v9 = vmul.f32 0.00012207031, %v1010_v55 }
 0x526   :  { %1012 = vst.msk [vmem:[#allocation6] sm:$0x1] %vm34_vm3, %v1011_v9 }
 0x527   :  { %1348 = shalt.err (!%p1345_p9)
}
 0x528   :  { %1088 = dma.vmem_to_hbm [thread:$0]  %s1086_s5, 16, %s2119_s9, [#allocation7]  }
 0x529   :  { %s1388_s1 = smov [#allocation8]  }
 0x52a   :  { %s1095_s17 = sshll.u32 %s1388_s1, 4  ;;  %s1096_s17 = int_to_ptr.vmem [resolvable:$true] %s1095_s17 }
 0x52b   :  { %s1357_s18 = scalar_lea.vmem %s1096_s17, 16  ;;  %s1361_s19 = scalar_lea.vmem %s1096_s17, 32 }
 0x52c   :  { %v1316_v13 = vpop.eup %1315  ;;  %p1358_p10 = scmp.ne.s32.totalorder %s1096_s17, %s1357_s18  ;;  %p1362_p11 = scmp.lt.s32.totalorder %s1096_s17, %s1096_s17 }
 0x52d   :  { %1062 = vst.msk [vmem:[#allocation8] sm:$0x1] %vm34_vm3, %v1316_v13  ;;  %p1363_p12 = scmp.lt.s32.totalorder %s1361_s19, %s1357_s18 }
 0x52f   :  { %p1364_p13 = por %p1363_p12, %p1362_p11 }
 0x531   :  { %p1365_p0 = pnand %p1364_p13, %p1358_p10 }
 0x533   :  { %1368 = shalt.err (!%p1365_p0)
}
 0x534   :  { %1098 = dma.vmem_to_hbm [thread:$0]  %s1096_s17, 16, %s2120_s10, [#allocation7]  }
 0x535   :  { %1377 = dma.done.wait [#allocation5], 2048  }
 0x536   :  { %1378 = vsyncadd [#allocation5], 4294965248 }
 0x537   :  { %1379 = dma.done.wait [#allocation7], 32  }
 0x538   :  { %1380 = vsyncadd [#allocation7], 4294967264 }
 0x539   :  { %1112 = vsyncpa [#allocation5], 1 }
 0x53a   :  { %1113 = vsyncpa [#allocation7], 1 }

// kernel: model_forward.29
= control target key start
LH: loop header
LB: loop body
LE: loop exit
PB: predicated region body
PF: predicated region fallthrough
CT: control target
= control target key end

     0   :  { %s1049_s12 = smov 0   ;;  %s1051_s13 = smov 0   ;;  %s1205_s0 = inlined_call_operand.vmem [shape: bf16[128,640], index: 0, kind: input, shape index: {}]   ;;  %s1206_s1 = inlined_call_operand.vmem [shape: bf16[640,128], index: 1, kind: input, shape index: {}]   ;;  %s1207_s2 = inlined_call_operand.vmem [shape: f32[1,128], index: 2, kind: input, shape index: {}]   ;;  %s1208_s3 = inlined_call_operand.vmem [shape: f32[128,128], index: 3, kind: output, shape index: {}]  }
   0x1   :  { %s1053_s14 = smov 0   ;;  %s1055_s15 = smov 0  }
   0x2   :  { %s1057_s16 = smov 0  }
   0x3 LB: > { %s25_s17 = sadd.s32 1, %s1022_s15  ;;  %p48_p1 = scmp.ne.s32.totalorder %s1014_s13, %s1010_s12  ;;  %s1026_s16 = sphi %s1057_s16, %s13_s16   ;;  %s1022_s15 = sphi %s1055_s15, %s1212_s15   ;;  %s1018_s14 = sphi %s1053_s14, %s1211_s14   ;;  %s1014_s13 = sphi %s1051_s13, %s1210_s13   ;;  %s1010_s12 = sphi %s1049_s12, %s1209_s12  }
   0x4   : > { %p26_p0 = scmp.ge.s32.totalorder %s25_s17, 5  ;;  %p49_p2 = scmp.eq.s32.totalorder %s1026_s16, 0 }
   0x5   : > { %s41_s19 = sadd.s32 1, %s1014_s13  ;;  %p837_p5 = scmp.ge.s32.totalorder %s1026_s16, 5 }
   0x6   : > { %s1214_s17 = smov (%p26_p0, %s25_s17), 0  ;;  %p50_p3 = por %p49_p2, %p48_p1 }
   0x7   : > { %s37_s18 = ssub.s32 %s1022_s15, %s1214_s17  ;;  %162 = sbr.rel (%p837_p5) target bundleno = 26 (0x1a), region = 20 }
   0x8   : > { %p39_p4 = scmp.eq.s32.totalorder %s37_s18, 0 }
   0xa   : > { %s1084_s20 = scalar_select %p39_p4, %s1014_s13, %s41_s19  }
   0xc   : > { %165 = sbr.rel (!%p50_p3) target bundleno = 26 (0x1a), region = 24  ;;  %s167_s21 = sand.u32 (%p50_p3), 1, %s1014_s13  }
   0xd   : > { %s839_s22 = sshll.u32 (%p50_p3), %s1022_s15, 2  ;;  %s838_s23 = sshll.u32 (%p50_p3), %s167_s21, 6 }
   0xe   : > { %s1092_s26 = scalar_lea.vmem (%p50_p3), %s1205_s0, %s839_s22  ;;  %s169_s27 = scalar_lea.vmem (%p50_p3), [#allocation3], %s838_s23 }
   0xf   : > { %v191_v0 = vld [vmem:[%s1092_s26] sm:$0xf] (%p50_p3)  ;;  %v193_v1 = vld [vmem:[%s1092_s26 + $0x14] sm:$0xf] (%p50_p3)  ;;  %v195_v2 = vld [vmem:[%s1092_s26 + $0x28] sm:$0xf] (%p50_p3) }
  0x10   : > { %192 = vst [vmem:[%s169_s27] sm:$0xf] (%p50_p3), %v191_v0  ;;  %194 = vst [vmem:[%s169_s27 + $0x4] sm:$0xf] (%p50_p3), %v193_v1  ;;  %v197_v3 = vld [vmem:[%s1092_s26 + $0x3c] sm:$0xf] (%p50_p3) }
  0x11   : > { %v199_v4 = vld [vmem:[%s1092_s26 + $0x50] sm:$0xf]  ;;  %196 = vst [vmem:[%s169_s27 + $0x8] sm:$0xf] %v195_v2  ;;  %198 = vst [vmem:[%s169_s27 + $0xc] sm:$0xf] %v197_v3 }
  0x12   : > { %200 = vst [vmem:[%s169_s27 + $0x10] sm:$0xf] %v199_v4  ;;  %v201_v5 = vld [vmem:[%s1092_s26 + $0x64] sm:$0xf]  ;;  %v203_v6 = vld [vmem:[%s1092_s26 + $0x78] sm:$0xf] }
  0x13   : > { %v205_v7 = vld [vmem:[%s1092_s26 + $0x8c] sm:$0xf]  ;;  %202 = vst [vmem:[%s169_s27 + $0x14] sm:$0xf] %v201_v5  ;;  %204 = vst [vmem:[%s169_s27 + $0x18] sm:$0xf] %v203_v6 }
  0x14   : > { %206 = vst [vmem:[%s169_s27 + $0x1c] sm:$0xf] %v205_v7  ;;  %v207_v8 = vld [vmem:[%s1092_s26 + $0xa0] sm:$0xf]  ;;  %v209_v9 = vld [vmem:[%s1092_s26 + $0xb4] sm:$0xf] }
  0x15   : > { %v211_v10 = vld [vmem:[%s1092_s26 + $0xc8] sm:$0xf]  ;;  %208 = vst [vmem:[%s169_s27 + $0x20] sm:$0xf] %v207_v8  ;;  %210 = vst [vmem:[%s169_s27 + $0x24] sm:$0xf] %v209_v9 }
  0x16   : > { %212 = vst [vmem:[%s169_s27 + $0x28] sm:$0xf] %v211_v10  ;;  %v213_v11 = vld [vmem:[%s1092_s26 + $0xdc] sm:$0xf]  ;;  %v215_v12 = vld [vmem:[%s1092_s26 + $0xf0] sm:$0xf] }
  0x17   : > { %v217_v13 = vld [vmem:[%s1092_s26 + $0x104] sm:$0xf]  ;;  %214 = vst [vmem:[%s169_s27 + $0x2c] sm:$0xf] %v213_v11  ;;  %216 = vst [vmem:[%s169_s27 + $0x30] sm:$0xf] %v215_v12 }
  0x18   : > { %218 = vst [vmem:[%s169_s27 + $0x34] sm:$0xf] %v217_v13  ;;  %v219_v14 = vld [vmem:[%s1092_s26 + $0x118] sm:$0xf]  ;;  %v221_v15 = vld [vmem:[%s1092_s26 + $0x12c] sm:$0xf] }
  0x19   : > { %220 = vst [vmem:[%s169_s27 + $0x38] sm:$0xf] %v219_v14  ;;  %222 = vst [vmem:[%s169_s27 + $0x3c] sm:$0xf] %v221_v15 }
  0x1a PF: > { %p840_p6 = scmp.ge.s32.totalorder %s1026_s16, 1  ;;  %p289_p7 = scmp.lt.s32.totalorder %s1026_s16, 6 }
  0x1c   : > { %p290_p8 = pnand %p840_p6, %p289_p7 }
  0x1d   : > { %s296_s28 = sand.u32 (!%p290_p8), 1, %s1010_s12   ;;  %s842_s29 = sshll.u32 (!%p290_p8), %s1018_s14, 4 }
  0x1e   : > { %293 = sbr.rel (%p290_p8) target bundleno = 305 (0x131), region = 69  ;;  %s841_s30 = sshll.u32 (!%p290_p8), %s296_s28, 6 }
  0x1f   : > { %p335_p9 = scmp.lt.s32.totalorder (!%p290_p8), %s842_s29, 79  ;;  %s1119_s8 = scalar_lea.vmem (!%p290_p8), [#allocation3], %s841_s30 }
  0x20   : > { %p844_p10 = scmp.ne.s32.totalorder (!%p290_p8), %s1018_s14, 0 }
  0x23   : > { %s1216_s29 = smov (!%p335_p9, %s842_s29), 79  ;;  %359 = sbr.rel (%p844_p10) target bundleno = 49 (0x31), region = 77 }
  0x24   : > { %s843_s4 = sshll.u32 %s1216_s29, 2 }
  0x25   : > { %s1117_s7 = scalar_lea.vmem %s1206_s1, %s843_s4 }
  0x28   : > { %v1028_v16 = vmov 0.0  }
  0x29   : > { %360 = vst [vmem:[#allocation2 + $0x30] sm:$0xff] %v1028_v16  ;;  %361 = vst [vmem:[#allocation2] sm:$0xff] %v1028_v16 }
  0x2a   : > { %362 = vst [vmem:[#allocation2 + $0x58] sm:$0xff] %v1028_v16  ;;  %363 = vst [vmem:[#allocation2 + $0x18] sm:$0xff] %v1028_v16 }
  0x2b   : > { %364 = vst [vmem:[#allocation2 + $0x50] sm:$0xff] %v1028_v16  ;;  %365 = vst [vmem:[#allocation2 + $0x68] sm:$0xff] %v1028_v16 }
  0x2c   : > { %366 = vst [vmem:[#allocation2 + $0x8] sm:$0xff] %v1028_v16  ;;  %367 = vst [vmem:[#allocation2 + $0x48] sm:$0xff] %v1028_v16 }
  0x2d   : > { %368 = vst [vmem:[#allocation2 + $0x40] sm:$0xff] %v1028_v16  ;;  %369 = vst [vmem:[#allocation2 + $0x20] sm:$0xff] %v1028_v16 }
  0x2e   : > { %370 = vst [vmem:[#allocation2 + $0x10] sm:$0xff] %v1028_v16  ;;  %371 = vst [vmem:[#allocation2 + $0x38] sm:$0xff] %v1028_v16 }
  0x2f   : > { %372 = vst [vmem:[#allocation2 + $0x60] sm:$0xff] %v1028_v16  ;;  %373 = vst [vmem:[#allocation2 + $0x70] sm:$0xff] %v1028_v16 }
  0x30   : > { %374 = vst [vmem:[#allocation2 + $0x78] sm:$0xff] %v1028_v16  ;;  %375 = vst [vmem:[#allocation2 + $0x28] sm:$0xff] %v1028_v16 }
  0x31 PF: > { %v972_v17 = vld [vmem:[%s1117_s7 + $0x38] sm:$0xff]   ;;  %v973_v18 = vld [vmem:[%s1117_s7 + $0x30] sm:$0xff]   ;;  %v974_v19 = vld [vmem:[%s1117_s7 + $0x28] sm:$0xff]   ;;  %p861_p11 = scmp.ne.s32.totalorder %s1018_s14, 4 }
  0x32   : > { %883 = vmatprep.subr.bf16.mxu0 %v972_v17  ;;  %915 = vmatprep.subr.bf16.mxu1 %v972_v17  ;;  %v975_v20 = vld [vmem:[%s1117_s7 + $0x20] sm:$0xff]   ;;  %v976_v23 = vld [vmem:[%s1117_s7 + $0x18] sm:$0xff]   ;;  %v977_v24 = vld [vmem:[%s1117_s7 + $0x10] sm:$0xff]  }
  0x33   : > { %884 = vmatpush3.bf16.msra.mxu0 %v972_v17  ;;  %923 = vmatpush3.bf16.msra.mxu1 %v972_v17  ;;  %v980_v21 = vld [vmem:[%s1119_s8] sm:$0xff]   ;;  %v978_v25 = vld [vmem:[%s1117_s7 + $0x8] sm:$0xff]   ;;  %v984_v29 = vld [vmem:[%s1119_s8 + $0x10] sm:$0xff]  }
  0x34   : > { %885 = vmatprep.subr.bf16.mxu0 %v973_v18  ;;  %916 = vmatprep.subr.bf16.mxu1 %v973_v18  ;;  %v981_v22 = vld [vmem:[%s1119_s8 + $0x20] sm:$0xff]   ;;  %v982_v27 = vld [vmem:[%s1119_s8 + $0x8] sm:$0xff]   ;;  %v985_v30 = vld [vmem:[%s1119_s8 + $0x30] sm:$0xff]  }
  0x35   : > { %899 = vmatprep.mubr.bf16.mxu0 %v980_v21  ;;  %907 = vmatprep.mubr.bf16.mxu1 %v981_v22  ;;  %v979_v26 = vld [vmem:[%s1117_s7] sm:$0xff]   ;;  %v983_v28 = vld [vmem:[%s1119_s8 + $0x28] sm:$0xff]   ;;  %v986_v31 = vld [vmem:[%s1119_s8 + $0x18] sm:$0xff]  }
  0x36   : > { %v987_v32 = vld [vmem:[%s1119_s8 + $0x38] sm:$0xff]   ;;  %v386_v34 = vld [vmem:[#allocation2 + $0x10] sm:$0xff]  ;;  %v384_v38 = vld [vmem:[#allocation2 + $0x40] sm:$0xff] }
  0x37   : > { %886 = vmatpush3.bf16.msra.mxu0 %v973_v18  ;;  %924 = vmatpush3.bf16.msra.mxu1 %v973_v18  ;;  %v378_v33 = vld [vmem:[#allocation2 + $0x58] sm:$0xff]  ;;  %v376_v37 = vld [vmem:[#allocation2 + $0x30] sm:$0xff]  ;;  %v377_v49 = vld [vmem:[#allocation2] sm:$0xff] }
  0x38   : > { %887 = vmatprep.subr.bf16.mxu0 %v974_v19  ;;  %917 = vmatprep.subr.bf16.mxu1 %v974_v19  ;;  %v379_v43 = vld [vmem:[#allocation2 + $0x18] sm:$0xff]  ;;  %v385_v50 = vld [vmem:[#allocation2 + $0x20] sm:$0xff]  ;;  %v382_v55 = vld [vmem:[#allocation2 + $0x8] sm:$0xff] }
  0x39   : > { %v387_v44 = vld [vmem:[#allocation2 + $0x38] sm:$0xff]  ;;  %v380_v61 = vld [vmem:[#allocation2 + $0x50] sm:$0xff]  ;;  %v388_v62 = vld [vmem:[#allocation2 + $0x60] sm:$0xff] }
  0x3a   : > { %v390_v56 = vld [vmem:[#allocation2 + $0x78] sm:$0xff]  ;;  %v383_v3 = vld [vmem:[#allocation2 + $0x48] sm:$0xff]  ;;  %v389_v10 = vld [vmem:[#allocation2 + $0x70] sm:$0xff] }
  0x3b   : > { %888 = vmatpush3.bf16.msra.mxu0 %v974_v19  ;;  %925 = vmatpush3.bf16.msra.mxu1 %v974_v19  ;;  %v391_v4 = vld [vmem:[#allocation2 + $0x28] sm:$0xff] }
  0x3c   : > { %889 = vmatprep.subr.bf16.mxu0 %v975_v20  ;;  %918 = vmatprep.subr.bf16.mxu1 %v975_v20  ;;  %v381_v9 = vld [vmem:[#allocation2 + $0x68] sm:$0xff] }
  0x3f   : > { %890 = vmatpush3.bf16.msra.mxu0 %v975_v20  ;;  %926 = vmatpush3.bf16.msra.mxu1 %v975_v20 }
  0x40   : > { %891 = vmatprep.subr.bf16.mxu0 %v976_v23  ;;  %919 = vmatprep.subr.bf16.mxu1 %v976_v23 }
  0x43   : > { %892 = vmatpush3.bf16.msra.mxu0 %v976_v23  ;;  %927 = vmatpush3.bf16.msra.mxu1 %v976_v23 }
  0x44   : > { %893 = vmatprep.subr.bf16.mxu0 %v977_v24  ;;  %920 = vmatprep.subr.bf16.mxu1 %v977_v24 }
  0x47   : > { %894 = vmatpush3.bf16.msra.mxu0 %v977_v24  ;;  %928 = vmatpush3.bf16.msra.mxu1 %v977_v24 }
  0x48   : > { %895 = vmatprep.subr.bf16.mxu0 %v978_v25  ;;  %921 = vmatprep.subr.bf16.mxu1 %v978_v25 }
  0x4b   : > { %896 = vmatpush3.bf16.msra.mxu0 %v978_v25  ;;  %929 = vmatpush3.bf16.msra.mxu1 %v978_v25 }
  0x4c   : > { %897 = vmatprep.subr.bf16.mxu0 %v979_v26  ;;  %922 = vmatprep.subr.bf16.mxu1 %v979_v26 }
  0x4f   : > { %898 = vmatpush3.bf16.msra.mxu0 %v979_v26  ;;  %930 = vmatpush3.bf16.msra.mxu1 %v979_v26 }
  0x52   : > { %900 = vmatmul.mubr.bf16.vlgmr.msra.gmra.mxu0 %v982_v27  ;;  %908 = vmatmul.mubr.bf16.vlgmr.msra.gmra.mxu1 %v983_v28 }
  0x53   : > { %903 = vmatprep.mubr.bf16.mxu0 %v984_v29  ;;  %911 = vmatprep.mubr.bf16.mxu1 %v985_v30 }
  0x5a   : > { %904 = vmatmul.mubr.bf16.gmra.mxu0 %v986_v31  ;;  %912 = vmatmul.mubr.bf16.gmra.mxu1 %v987_v32 }
 0x112   : > { %v901_v35 = vpop.f32.mrf.mxu0  ;;  %v909_v36 = vpop.f32.mrf.mxu1 }
 0x113   : > { %v619_v39 = vadd.f32 %v901_v35, %v378_v33  ;;  %v627_v40 = vadd.f32 %v909_v36, %v386_v34 }
 0x114   : > { %v554_v41 = vpop.f32.mrf.mxu0  ;;  %v586_v42 = vpop.f32.mrf.mxu1 }
 0x115   : > { %635 = vst [vmem:[#allocation2 + $0x58] sm:$0xff] %v619_v39  ;;  %643 = vst [vmem:[#allocation2 + $0x10] sm:$0xff] %v627_v40  ;;  %v617_v45 = vadd.f32 %v554_v41, %v376_v37  ;;  %v625_v46 = vadd.f32 %v586_v42, %v384_v38 }
 0x116   : > { %v902_v47 = vpop.f32.mrf.mxu0  ;;  %v910_v48 = vpop.f32.mrf.mxu1 }
 0x117   : > { %633 = vst [vmem:[#allocation2 + $0x30] sm:$0xff] %v617_v45  ;;  %641 = vst [vmem:[#allocation2 + $0x40] sm:$0xff] %v625_v46  ;;  %v620_v51 = vadd.f32 %v902_v47, %v379_v43  ;;  %v628_v52 = vadd.f32 %v910_v48, %v387_v44 }
 0x118   : > { %v557_v53 = vpop.f32.mrf.mxu0  ;;  %v589_v54 = vpop.f32.mrf.mxu1 }
 0x119   : > { %636 = vst [vmem:[#allocation2 + $0x18] sm:$0xff] %v620_v51  ;;  %644 = vst [vmem:[#allocation2 + $0x38] sm:$0xff] %v628_v52  ;;  %v618_v57 = vadd.f32 %v557_v53, %v377_v49  ;;  %v626_v58 = vadd.f32 %v589_v54, %v385_v50 }
 0x11a   : > { %v905_v59 = vpop.f32.mrf.mxu0  ;;  %v913_v60 = vpop.f32.mrf.mxu1 }
 0x11b   : > { %634 = vst [vmem:[#allocation2] sm:$0xff] %v618_v57  ;;  %642 = vst [vmem:[#allocation2 + $0x20] sm:$0xff] %v626_v58  ;;  %v623_v63 = vadd.f32 %v905_v59, %v382_v55  ;;  %v631_v0 = vadd.f32 %v913_v60, %v390_v56 }
 0x11c   : > { %v570_v1 = vpop.f32.mrf.mxu0  ;;  %v602_v2 = vpop.f32.mrf.mxu1 }
 0x11d   : > { %639 = vst [vmem:[#allocation2 + $0x8] sm:$0xff] %v623_v63  ;;  %647 = vst [vmem:[#allocation2 + $0x78] sm:$0xff] %v631_v0  ;;  %v621_v5 = vadd.f32 %v570_v1, %v380_v61  ;;  %v629_v6 = vadd.f32 %v602_v2, %v388_v62 }
 0x11e   : > { %v906_v7 = vpop.f32.mrf.mxu0  ;;  %v914_v8 = vpop.f32.mrf.mxu1 }
 0x11f   : > { %637 = vst [vmem:[#allocation2 + $0x50] sm:$0xff] %v621_v5  ;;  %645 = vst [vmem:[#allocation2 + $0x60] sm:$0xff] %v629_v6  ;;  %v624_v11 = vadd.f32 %v906_v7, %v383_v3  ;;  %v632_v12 = vadd.f32 %v914_v8, %v391_v4  ;;  %652 = sbr.rel (%p861_p11) target bundleno = 305 (0x131), region = 81 }
 0x120   : > { %v573_v13 = vpop.f32.mrf.mxu0  ;;  %v605_v14 = vpop.f32.mrf.mxu1 }
 0x121   : > { %640 = vst [vmem:[#allocation2 + $0x48] sm:$0xff] %v624_v11  ;;  %648 = vst [vmem:[#allocation2 + $0x28] sm:$0xff] %v632_v12  ;;  %v622_v15 = vadd.f32 %v573_v13, %v381_v9  ;;  %v630_v16 = vadd.f32 %v605_v14, %v389_v10 }
 0x123   : > { %638 = vst [vmem:[#allocation2 + $0x68] sm:$0xff] %v622_v15  ;;  %646 = vst [vmem:[#allocation2 + $0x70] sm:$0xff] %v630_v16 }
 0x124   : > { %v653_v17 = vld [vmem:[#allocation2 + $0x30] sm:$0xff]  ;;  %v862_v18 = vld [vmem:[%s1207_s2] ss:$0 sm:$0xff]  ;;  %v655_v22 = vld [vmem:[#allocation2 + $0x58] sm:$0xff] }
 0x125   : > { %v654_v19 = vld [vmem:[#allocation2] sm:$0xff]  ;;  %v676_v20 = vadd.f32 %v862_v18, %v653_v17  ;;  %v656_v23 = vld [vmem:[#allocation2 + $0x18] sm:$0xff]  ;;  %v678_v25 = vadd.f32 %v862_v18, %v655_v22  ;;  %v659_v29 = vld [vmem:[#allocation2 + $0x8] sm:$0xff] }
 0x126   : > { %v677_v21 = vadd.f32 %v862_v18, %v654_v19  ;;  %v657_v24 = vld [vmem:[#allocation2 + $0x50] sm:$0xff]  ;;  %v679_v26 = vadd.f32 %v862_v18, %v656_v23  ;;  %v682_v34 = vadd.f32 %v862_v18, %v659_v29  ;;  %v661_v35 = vld [vmem:[#allocation2 + $0x40] sm:$0xff]  ;;  %v664_v42 = vld [vmem:[#allocation2 + $0x38] sm:$0xff] }
 0x127   : > { %v680_v27 = vadd.f32 %v862_v18, %v657_v24  ;;  %v692_v31 = vmax.f32 %v676_v20, 0.0  ;;  %v662_v36 = vld [vmem:[#allocation2 + $0x20] sm:$0xff]  ;;  %v663_v37 = vld [vmem:[#allocation2 + $0x10] sm:$0xff]  ;;  %v694_v38 = vmax.f32 %v678_v25, 0.0  ;;  %v684_v47 = vadd.f32 %v862_v18, %v661_v35  ;;  %v667_v49 = vld [vmem:[#allocation2 + $0x78] sm:$0xff] }
 0x128   : > { %v660_v30 = vld [vmem:[#allocation2 + $0x48] sm:$0xff]  ;;  %v693_v32 = vmax.f32 %v677_v21, 0.0  ;;  %v695_v39 = vmax.f32 %v679_v26, 0.0  ;;  %v665_v43 = vld [vmem:[#allocation2 + $0x60] sm:$0xff]  ;;  %v698_v46 = vmax.f32 %v682_v34, 0.0  ;;  %v685_v48 = vadd.f32 %v862_v18, %v662_v36 }
 0x129   : > { %v696_v40 = vmax.f32 %v680_v27, 0.0  ;;  %v683_v41 = vadd.f32 %v862_v18, %v660_v30  ;;  %708 = vst [vmem:[%s1208_s3] sm:$0xff] %v692_v31  ;;  %v668_v50 = vld [vmem:[#allocation2 + $0x28] sm:$0xff]  ;;  %710 = vst [vmem:[%s1208_s3 + $0x10] sm:$0xff] %v694_v38  ;;  %v686_v52 = vadd.f32 %v862_v18, %v663_v37  ;;  %v687_v53 = vadd.f32 %v862_v18, %v664_v42 }
 0x12a   : > { %v658_v28 = vld [vmem:[#allocation2 + $0x68] sm:$0xff]  ;;  %v666_v44 = vld [vmem:[#allocation2 + $0x70] sm:$0xff]  ;;  %709 = vst [vmem:[%s1208_s3 + $0x8] sm:$0xff] %v693_v32  ;;  %711 = vst [vmem:[%s1208_s3 + $0x18] sm:$0xff] %v695_v39  ;;  %v688_v54 = vadd.f32 %v862_v18, %v665_v43  ;;  %v700_v55 = vmax.f32 %v684_v47, 0.0  ;;  %v701_v56 = vmax.f32 %v685_v48, 0.0  ;;  %v690_v58 = vadd.f32 %v862_v18, %v667_v49 }
 0x12b   : > { %v681_v33 = vadd.f32 %v862_v18, %v658_v28  ;;  %712 = vst [vmem:[%s1208_s3 + $0x20] sm:$0xff] %v696_v40  ;;  %v699_v51 = vmax.f32 %v683_v41, 0.0  ;;  %714 = vst [vmem:[%s1208_s3 + $0x30] sm:$0xff] %v698_v46  ;;  %v689_v57 = vadd.f32 %v862_v18, %v666_v44  ;;  %v702_v59 = vmax.f32 %v686_v52, 0.0 }
 0x12c   : > { %v703_v60 = vmax.f32 %v687_v53, 0.0  ;;  %v704_v61 = vmax.f32 %v688_v54, 0.0  ;;  %v691_v62 = vadd.f32 %v862_v18, %v668_v50  ;;  %716 = vst [vmem:[%s1208_s3 + $0x40] sm:$0xff] %v700_v55  ;;  %717 = vst [vmem:[%s1208_s3 + $0x48] sm:$0xff] %v701_v56  ;;  %v706_v0 = vmax.f32 %v690_v58, 0.0 }
 0x12d   : > { %v697_v45 = vmax.f32 %v681_v33, 0.0  ;;  %715 = vst [vmem:[%s1208_s3 + $0x38] sm:$0xff] %v699_v51  ;;  %v705_v63 = vmax.f32 %v689_v57, 0.0  ;;  %718 = vst [vmem:[%s1208_s3 + $0x50] sm:$0xff] %v702_v59 }
 0x12e   : > { %719 = vst [vmem:[%s1208_s3 + $0x58] sm:$0xff] %v703_v60  ;;  %720 = vst [vmem:[%s1208_s3 + $0x60] sm:$0xff] %v704_v61  ;;  %v707_v1 = vmax.f32 %v691_v62, 0.0 }
 0x12f   : > { %713 = vst [vmem:[%s1208_s3 + $0x28] sm:$0xff] %v697_v45  ;;  %721 = vst [vmem:[%s1208_s3 + $0x68] sm:$0xff] %v705_v63 }
 0x130   : > { %722 = vst [vmem:[%s1208_s3 + $0x70] sm:$0xff] %v706_v0  ;;  %723 = vst [vmem:[%s1208_s3 + $0x78] sm:$0xff] %v707_v1 }
 0x131 PF: > { %s13_s16 = sadd.s32 1, %s1026_s16   ;;  %s1209_s12 = smov %s1014_s13 }
 0x132   : > { %p10_p12 = scmp.ge.s32.totalorder %s13_s16, 7   ;;  %s1210_s13 = smov %s1084_s20 }
 0x133   : > { %s1211_s14 = smov %s1022_s15  ;;  %s1212_s15 = smov %s1214_s17 }
 0x134   :  { %12 = sbr.rel (!%p10_p12) target bundleno = 3 (0x3), region = 122 }

// kernel: model_forward.34
= control target key start
LH: loop header
LB: loop body
LE: loop exit
PB: predicated region body
PF: predicated region fallthrough
CT: control target
= control target key end

     0   :  { %s1357_s1 = inlined_call_operand.vmem [shape: bf16[512,128], index: 1, kind: input, shape index: {}]   ;;  %s1358_s0 = inlined_call_operand.vmem [shape: bf16[128,512], index: 0, kind: input, shape index: {}]   ;;  %s1359_s2 = inlined_call_operand.vmem [shape: f32[1,128], index: 2, kind: input, shape index: {}]   ;;  %s1360_s3 = inlined_call_operand.vmem [shape: f32[128,128], index: 3, kind: output, shape index: {}]  }
   0x1   :  { %v996_v0 = vld [vmem:[%s1357_s1 + $0x78] sm:$0xff]   ;;  %v1000_v4 = vld [vmem:[%s1357_s1 + $0x70] sm:$0xff]   ;;  %v1004_v8 = vld [vmem:[%s1357_s1 + $0x68] sm:$0xff]  }
   0x2   :  { %v997_v1 = vld [vmem:[%s1357_s1 + $0xf8] sm:$0xff]   ;;  %868 = vmatprep.subr.bf16.mxu0 %v996_v0  ;;  %v1001_v5 = vld [vmem:[%s1357_s1 + $0xf0] sm:$0xff]   ;;  %v1005_v9 = vld [vmem:[%s1357_s1 + $0xe8] sm:$0xff]  }
   0x3   :  { %v998_v2 = vld [vmem:[%s1357_s1 + $0x38] sm:$0xff]   ;;  %932 = vmatprep.subr.bf16.mxu1 %v997_v1  ;;  %v1002_v6 = vld [vmem:[%s1357_s1 + $0x30] sm:$0xff]   ;;  %v1006_v10 = vld [vmem:[%s1357_s1 + $0x28] sm:$0xff]  }
   0x4   :  { %v999_v3 = vld [vmem:[%s1357_s1 + $0xb8] sm:$0xff]   ;;  %869 = vmatpush3.bf16.msra.mxu0 %v998_v2  ;;  %v1003_v7 = vld [vmem:[%s1357_s1 + $0xb0] sm:$0xff]   ;;  %v1007_v11 = vld [vmem:[%s1357_s1 + $0xa8] sm:$0xff]  }
   0x5   :  { %933 = vmatpush3.bf16.msra.mxu1 %v999_v3  ;;  %870 = vmatprep.subr.bf16.mxu0 %v1000_v4  ;;  %v1008_v12 = vld [vmem:[%s1357_s1 + $0x60] sm:$0xff]   ;;  %v1012_v16 = vld [vmem:[%s1357_s1 + $0x58] sm:$0xff]   ;;  %v1016_v20 = vld [vmem:[%s1357_s1 + $0x50] sm:$0xff]  }
   0x6   :  { %934 = vmatprep.subr.bf16.mxu1 %v1001_v5  ;;  %v1009_v13 = vld [vmem:[%s1357_s1 + $0xe0] sm:$0xff]   ;;  %v1013_v17 = vld [vmem:[%s1357_s1 + $0xd8] sm:$0xff]   ;;  %v1017_v21 = vld [vmem:[%s1357_s1 + $0xd0] sm:$0xff]  }
   0x7   :  { %v1010_v14 = vld [vmem:[%s1357_s1 + $0x20] sm:$0xff]   ;;  %v1014_v18 = vld [vmem:[%s1357_s1 + $0x18] sm:$0xff]   ;;  %v1018_v22 = vld [vmem:[%s1357_s1 + $0x10] sm:$0xff]  }
   0x8   :  { %871 = vmatpush3.bf16.msra.mxu0 %v1002_v6  ;;  %v1011_v15 = vld [vmem:[%s1357_s1 + $0xa0] sm:$0xff]   ;;  %v1015_v19 = vld [vmem:[%s1357_s1 + $0x98] sm:$0xff]   ;;  %v1019_v23 = vld [vmem:[%s1357_s1 + $0x90] sm:$0xff]  }
   0x9   :  { %935 = vmatpush3.bf16.msra.mxu1 %v1003_v7  ;;  %872 = vmatprep.subr.bf16.mxu0 %v1004_v8  ;;  %v1020_v24 = vld [vmem:[%s1357_s1 + $0x48] sm:$0xff]   ;;  %v1024_v28 = vld [vmem:[%s1357_s1 + $0x40] sm:$0xff]  }
   0xa   :  { %936 = vmatprep.subr.bf16.mxu1 %v1005_v9  ;;  %v1021_v25 = vld [vmem:[%s1357_s1 + $0xc8] sm:$0xff]   ;;  %v1025_v29 = vld [vmem:[%s1357_s1 + $0xc0] sm:$0xff]  }
   0xb   :  { %v1022_v26 = vld [vmem:[%s1357_s1 + $0x8] sm:$0xff]   ;;  %v1026_v30 = vld [vmem:[%s1357_s1] sm:$0xff]  }
   0xc   :  { %873 = vmatpush3.bf16.msra.mxu0 %v1006_v10  ;;  %v1023_v27 = vld [vmem:[%s1357_s1 + $0x88] sm:$0xff]   ;;  %v1027_v31 = vld [vmem:[%s1357_s1 + $0x80] sm:$0xff]  }
   0xd   :  { %937 = vmatpush3.bf16.msra.mxu1 %v1007_v11  ;;  %874 = vmatprep.subr.bf16.mxu0 %v1008_v12  ;;  %v1028_v32 = vld [vmem:[%s1358_s0] ss:$16 sps:$4 sm:$0xff]   ;;  %v1030_v33 = vld [vmem:[%s1358_s0 + $0x4] ss:$16 sps:$4 sm:$0xff]   ;;  %v1031_v34 = vld [vmem:[%s1358_s0 + $0x8] ss:$16 sps:$4 sm:$0xff]  }
   0xe   :  { %938 = vmatprep.subr.bf16.mxu1 %v1009_v13  ;;  %v1033_v35 = vld [vmem:[%s1358_s0 + $0xc] ss:$16 sps:$4 sm:$0xff]   ;;  %531 = vmatprep.mubr.bf16.mxu0 %v1030_v33  ;;  %v1034_v36 = vld [vmem:[%s1358_s0 + $0x24] ss:$16 sps:$4 sm:$0xff]   ;;  %v1038_v38 = vld [vmem:[%s1358_s0 + $0x20] ss:$16 sps:$4 sm:$0xff]  }
   0xf   :  { %628 = vmatprep.mubr.bf16.mxu1 %v1033_v35  ;;  %v1036_v37 = vld [vmem:[%s1358_s0 + $0x2c] ss:$16 sps:$4 sm:$0xff]   ;;  %v1039_v39 = vld [vmem:[%s1358_s0 + $0x28] ss:$16 sps:$4 sm:$0xff]   ;;  %v1040_v40 = vld [vmem:[%s1358_s0 + $0x44] ss:$16 sps:$4 sm:$0xff]  }
  0x10   :  { %875 = vmatpush3.bf16.msra.mxu0 %v1010_v14  ;;  %v1042_v41 = vld [vmem:[%s1358_s0 + $0x4c] ss:$16 sps:$4 sm:$0xff]   ;;  %v1044_v42 = vld [vmem:[%s1358_s0 + $0x40] ss:$16 sps:$4 sm:$0xff]   ;;  %v1045_v43 = vld [vmem:[%s1358_s0 + $0x48] ss:$16 sps:$4 sm:$0xff]  }
  0x11   :  { %939 = vmatpush3.bf16.msra.mxu1 %v1011_v15  ;;  %876 = vmatprep.subr.bf16.mxu0 %v1012_v16  ;;  %v1046_v44 = vld [vmem:[%s1358_s0 + $0x64] ss:$16 sps:$4 sm:$0xff]   ;;  %v1048_v45 = vld [vmem:[%s1358_s0 + $0x6c] ss:$16 sps:$4 sm:$0xff]   ;;  %v1050_v46 = vld [vmem:[%s1358_s0 + $0x60] ss:$16 sps:$4 sm:$0xff]  }
  0x12   :  { %940 = vmatprep.subr.bf16.mxu1 %v1013_v17  ;;  %v1051_v47 = vld [vmem:[%s1358_s0 + $0x68] ss:$16 sps:$4 sm:$0xff]   ;;  %v1052_v48 = vld [vmem:[%s1358_s0 + $0x84] ss:$16 sps:$4 sm:$0xff]   ;;  %v1054_v49 = vld [vmem:[%s1358_s0 + $0x8c] ss:$16 sps:$4 sm:$0xff]  }
  0x13   :  { %v1056_v50 = vld [vmem:[%s1358_s0 + $0x80] ss:$16 sps:$4 sm:$0xff]   ;;  %v1057_v51 = vld [vmem:[%s1358_s0 + $0x88] ss:$16 sps:$4 sm:$0xff]   ;;  %v1058_v52 = vld [vmem:[%s1358_s0 + $0xa4] ss:$16 sps:$4 sm:$0xff]  }
  0x14   :  { %877 = vmatpush3.bf16.msra.mxu0 %v1014_v18  ;;  %v1060_v53 = vld [vmem:[%s1358_s0 + $0xac] ss:$16 sps:$4 sm:$0xff]   ;;  %v1062_v54 = vld [vmem:[%s1358_s0 + $0xa0] ss:$16 sps:$4 sm:$0xff]   ;;  %v1063_v55 = vld [vmem:[%s1358_s0 + $0xa8] ss:$16 sps:$4 sm:$0xff]  }
  0x15   :  { %941 = vmatpush3.bf16.msra.mxu1 %v1015_v19  ;;  %878 = vmatprep.subr.bf16.mxu0 %v1016_v20  ;;  %v1064_v56 = vld [vmem:[%s1358_s0 + $0xc4] ss:$16 sps:$4 sm:$0xff]   ;;  %v1066_v57 = vld [vmem:[%s1358_s0 + $0xcc] ss:$16 sps:$4 sm:$0xff]   ;;  %v1068_v58 = vld [vmem:[%s1358_s0 + $0xc0] ss:$16 sps:$4 sm:$0xff]  }
  0x16   :  { %942 = vmatprep.subr.bf16.mxu1 %v1017_v21  ;;  %v1069_v59 = vld [vmem:[%s1358_s0 + $0xc8] ss:$16 sps:$4 sm:$0xff]   ;;  %v1070_v60 = vld [vmem:[%s1358_s0 + $0xe4] ss:$16 sps:$4 sm:$0xff]   ;;  %v1072_v61 = vld [vmem:[%s1358_s0 + $0xec] ss:$16 sps:$4 sm:$0xff]  }
  0x17   :  { %v1074_v62 = vld [vmem:[%s1358_s0 + $0xe0] ss:$16 sps:$4 sm:$0xff]   ;;  %v1075_v63 = vld [vmem:[%s1358_s0 + $0xe8] ss:$16 sps:$4 sm:$0xff]  }
  0x18   :  { %879 = vmatpush3.bf16.msra.mxu0 %v1018_v22  ;;  %v1291_v7 = vld [vmem:[%s1359_s2] ss:$0 sm:$0xff] }
  0x19   :  { %943 = vmatpush3.bf16.msra.mxu1 %v1019_v23  ;;  %880 = vmatprep.subr.bf16.mxu0 %v1020_v24 }
  0x1a   :  { %944 = vmatprep.subr.bf16.mxu1 %v1021_v25 }
  0x1c   :  { %881 = vmatpush3.bf16.msra.mxu0 %v1022_v26 }
  0x1d   :  { %945 = vmatpush3.bf16.msra.mxu1 %v1023_v27  ;;  %882 = vmatprep.subr.bf16.mxu0 %v1024_v28 }
  0x1e   :  { %946 = vmatprep.subr.bf16.mxu1 %v1025_v29 }
  0x20   :  { %883 = vmatpush3.bf16.msra.mxu0 %v1026_v30 }
  0x21   :  { %947 = vmatpush3.bf16.msra.mxu1 %v1027_v31 }
  0x23   :  { %532 = vmatmul.mubr.bf16.vlgmr.msra.gmra.mxu0 %v1028_v32 }
  0x24   :  { %629 = vmatmul.mubr.bf16.vlgmr.msra.gmra.mxu1 %v1031_v34  ;;  %539 = vmatprep.mubr.bf16.mxu0 %v1034_v36 }
  0x25   :  { %636 = vmatprep.mubr.bf16.mxu1 %v1036_v37 }
  0x2b   :  { %540 = vmatmul.mubr.bf16.gmra.mxu0 %v1038_v38 }
  0x2c   :  { %637 = vmatmul.mubr.bf16.gmra.mxu1 %v1039_v39  ;;  %547 = vmatprep.mubr.bf16.mxu0 %v1040_v40 }
  0x2d   :  { %644 = vmatprep.mubr.bf16.mxu1 %v1042_v41 }
  0x33   :  { %548 = vmatmul.mubr.bf16.gmra.mxu0 %v1044_v42 }
  0x34   :  { %645 = vmatmul.mubr.bf16.gmra.mxu1 %v1045_v43  ;;  %555 = vmatprep.mubr.bf16.mxu0 %v1046_v44 }
  0x35   :  { %652 = vmatprep.mubr.bf16.mxu1 %v1048_v45 }
  0x3b   :  { %556 = vmatmul.mubr.bf16.gmra.mxu0 %v1050_v46 }
  0x3c   :  { %653 = vmatmul.mubr.bf16.gmra.mxu1 %v1051_v47  ;;  %563 = vmatprep.mubr.bf16.mxu0 %v1052_v48 }
  0x3d   :  { %660 = vmatprep.mubr.bf16.mxu1 %v1054_v49 }
  0x43   :  { %564 = vmatmul.mubr.bf16.gmra.mxu0 %v1056_v50 }
  0x44   :  { %661 = vmatmul.mubr.bf16.gmra.mxu1 %v1057_v51  ;;  %571 = vmatprep.mubr.bf16.mxu0 %v1058_v52 }
  0x45   :  { %668 = vmatprep.mubr.bf16.mxu1 %v1060_v53 }
  0x4b   :  { %572 = vmatmul.mubr.bf16.gmra.mxu0 %v1062_v54 }
  0x4c   :  { %669 = vmatmul.mubr.bf16.gmra.mxu1 %v1063_v55  ;;  %579 = vmatprep.mubr.bf16.mxu0 %v1064_v56 }
  0x4d   :  { %676 = vmatprep.mubr.bf16.mxu1 %v1066_v57 }
  0x53   :  { %580 = vmatmul.mubr.bf16.gmra.mxu0 %v1068_v58 }
  0x54   :  { %677 = vmatmul.mubr.bf16.gmra.mxu1 %v1069_v59  ;;  %587 = vmatprep.mubr.bf16.mxu0 %v1070_v60 }
  0x55   :  { %684 = vmatprep.mubr.bf16.mxu1 %v1072_v61 }
  0x5b   :  { %588 = vmatmul.mubr.bf16.gmra.mxu0 %v1074_v62 }
  0x5c   :  { %685 = vmatmul.mubr.bf16.gmra.mxu1 %v1075_v63 }
  0xe3   :  { %v884_v0 = vpop.f32.mrf.mxu0 }
  0xe4   :  { %v948_v1 = vpop.f32.mrf.mxu1 }
  0xe5   :  { %v885_v2 = vpop.f32.mrf.mxu0 }
  0xe6   :  { %v886_v3 = vadd.f32 %v885_v2, %v884_v0  ;;  %v949_v4 = vpop.f32.mrf.mxu1 }
  0xe7   :  { %v950_v5 = vadd.f32 %v949_v4, %v948_v1  ;;  %v887_v6 = vpop.f32.mrf.mxu0 }
  0xe8   :  { %v951_v8 = vpop.f32.mrf.mxu1 }
  0xe9   :  { %v631_v9 = vadd.f32 %v950_v5, %v886_v3  ;;  %v888_v10 = vpop.f32.mrf.mxu0 }
  0xea   :  { %v889_v11 = vadd.f32 %v888_v10, %v887_v6  ;;  %v952_v12 = vpop.f32.mrf.mxu1 }
  0xeb   :  { %v751_v13 = vadd.f32 %v1291_v7, %v631_v9  ;;  %v953_v14 = vadd.f32 %v952_v12, %v951_v8  ;;  %v890_v15 = vpop.f32.mrf.mxu0 }
  0xec   :  { %v954_v16 = vpop.f32.mrf.mxu1 }
  0xed   :  { %v767_v17 = vmax.f32 %v751_v13, 0.0  ;;  %v634_v18 = vadd.f32 %v953_v14, %v889_v11  ;;  %v891_v19 = vpop.f32.mrf.mxu0 }
  0xee   :  { %v892_v20 = vadd.f32 %v891_v19, %v890_v15  ;;  %v955_v21 = vpop.f32.mrf.mxu1 }
  0xef   :  { %783 = vst [vmem:[%s1360_s3] sm:$0xff] %v767_v17  ;;  %v752_v22 = vadd.f32 %v1291_v7, %v634_v18  ;;  %v956_v23 = vadd.f32 %v955_v21, %v954_v16  ;;  %v893_v24 = vpop.f32.mrf.mxu0 }
  0xf0   :  { %v957_v25 = vpop.f32.mrf.mxu1 }
  0xf1   :  { %v768_v26 = vmax.f32 %v752_v22, 0.0  ;;  %v639_v27 = vadd.f32 %v956_v23, %v892_v20  ;;  %v894_v28 = vpop.f32.mrf.mxu0 }
  0xf2   :  { %v895_v29 = vadd.f32 %v894_v28, %v893_v24  ;;  %v958_v30 = vpop.f32.mrf.mxu1 }
  0xf3   :  { %784 = vst [vmem:[%s1360_s3 + $0x8] sm:$0xff] %v768_v26  ;;  %v753_v31 = vadd.f32 %v1291_v7, %v639_v27  ;;  %v959_v32 = vadd.f32 %v958_v30, %v957_v25  ;;  %v896_v33 = vpop.f32.mrf.mxu0 }
  0xf4   :  { %v960_v34 = vpop.f32.mrf.mxu1 }
  0xf5   :  { %v769_v35 = vmax.f32 %v753_v31, 0.0  ;;  %v642_v36 = vadd.f32 %v959_v32, %v895_v29  ;;  %v897_v37 = vpop.f32.mrf.mxu0 }
  0xf6   :  { %v898_v38 = vadd.f32 %v897_v37, %v896_v33  ;;  %v961_v39 = vpop.f32.mrf.mxu1 }
  0xf7   :  { %785 = vst [vmem:[%s1360_s3 + $0x10] sm:$0xff] %v769_v35  ;;  %v754_v40 = vadd.f32 %v1291_v7, %v642_v36  ;;  %v962_v41 = vadd.f32 %v961_v39, %v960_v34  ;;  %v899_v42 = vpop.f32.mrf.mxu0 }
  0xf8   :  { %v963_v43 = vpop.f32.mrf.mxu1 }
  0xf9   :  { %v770_v44 = vmax.f32 %v754_v40, 0.0  ;;  %v647_v45 = vadd.f32 %v962_v41, %v898_v38  ;;  %v900_v46 = vpop.f32.mrf.mxu0 }
  0xfa   :  { %v901_v47 = vadd.f32 %v900_v46, %v899_v42  ;;  %v964_v48 = vpop.f32.mrf.mxu1 }
  0xfb   :  { %786 = vst [vmem:[%s1360_s3 + $0x18] sm:$0xff] %v770_v44  ;;  %v755_v49 = vadd.f32 %v1291_v7, %v647_v45  ;;  %v965_v50 = vadd.f32 %v964_v48, %v963_v43  ;;  %v902_v51 = vpop.f32.mrf.mxu0 }
  0xfc   :  { %v966_v52 = vpop.f32.mrf.mxu1 }
  0xfd   :  { %v771_v53 = vmax.f32 %v755_v49, 0.0  ;;  %v650_v54 = vadd.f32 %v965_v50, %v901_v47  ;;  %v903_v55 = vpop.f32.mrf.mxu0 }
  0xfe   :  { %v904_v56 = vadd.f32 %v903_v55, %v902_v51  ;;  %v967_v57 = vpop.f32.mrf.mxu1 }
  0xff   :  { %787 = vst [vmem:[%s1360_s3 + $0x20] sm:$0xff] %v771_v53  ;;  %v756_v58 = vadd.f32 %v1291_v7, %v650_v54  ;;  %v968_v59 = vadd.f32 %v967_v57, %v966_v52  ;;  %v905_v60 = vpop.f32.mrf.mxu0 }
 0x100   :  { %v969_v61 = vpop.f32.mrf.mxu1 }
 0x101   :  { %v772_v62 = vmax.f32 %v756_v58, 0.0  ;;  %v655_v63 = vadd.f32 %v968_v59, %v904_v56  ;;  %v906_v0 = vpop.f32.mrf.mxu0 }
 0x102   :  { %v907_v1 = vadd.f32 %v906_v0, %v905_v60  ;;  %v970_v2 = vpop.f32.mrf.mxu1 }
 0x103   :  { %788 = vst [vmem:[%s1360_s3 + $0x28] sm:$0xff] %v772_v62  ;;  %v757_v3 = vadd.f32 %v1291_v7, %v655_v63  ;;  %v971_v4 = vadd.f32 %v970_v2, %v969_v61  ;;  %v908_v5 = vpop.f32.mrf.mxu0 }
 0x104   :  { %v972_v6 = vpop.f32.mrf.mxu1 }
 0x105   :  { %v773_v8 = vmax.f32 %v757_v3, 0.0  ;;  %v658_v9 = vadd.f32 %v971_v4, %v907_v1  ;;  %v909_v10 = vpop.f32.mrf.mxu0 }
 0x106   :  { %v910_v11 = vadd.f32 %v909_v10, %v908_v5  ;;  %v973_v12 = vpop.f32.mrf.mxu1 }
 0x107   :  { %789 = vst [vmem:[%s1360_s3 + $0x30] sm:$0xff] %v773_v8  ;;  %v758_v13 = vadd.f32 %v1291_v7, %v658_v9  ;;  %v974_v14 = vadd.f32 %v973_v12, %v972_v6  ;;  %v911_v15 = vpop.f32.mrf.mxu0 }
 0x108   :  { %v975_v16 = vpop.f32.mrf.mxu1 }
 0x109   :  { %v774_v17 = vmax.f32 %v758_v13, 0.0  ;;  %v663_v18 = vadd.f32 %v974_v14, %v910_v11  ;;  %v912_v19 = vpop.f32.mrf.mxu0 }
 0x10a   :  { %v913_v20 = vadd.f32 %v912_v19, %v911_v15  ;;  %v976_v21 = vpop.f32.mrf.mxu1 }
 0x10b   :  { %790 = vst [vmem:[%s1360_s3 + $0x38] sm:$0xff] %v774_v17  ;;  %v759_v22 = vadd.f32 %v1291_v7, %v663_v18  ;;  %v977_v23 = vadd.f32 %v976_v21, %v975_v16  ;;  %v914_v24 = vpop.f32.mrf.mxu0 }
 0x10c   :  { %v978_v25 = vpop.f32.mrf.mxu1 }
 0x10d   :  { %v775_v26 = vmax.f32 %v759_v22, 0.0  ;;  %v666_v27 = vadd.f32 %v977_v23, %v913_v20  ;;  %v915_v28 = vpop.f32.mrf.mxu0 }
 0x10e   :  { %v916_v29 = vadd.f32 %v915_v28, %v914_v24  ;;  %v979_v30 = vpop.f32.mrf.mxu1 }
 0x10f   :  { %791 = vst [vmem:[%s1360_s3 + $0x40] sm:$0xff] %v775_v26  ;;  %v760_v31 = vadd.f32 %v1291_v7, %v666_v27  ;;  %v980_v32 = vadd.f32 %v979_v30, %v978_v25  ;;  %v917_v33 = vpop.f32.mrf.mxu0 }
 0x110   :  { %v981_v34 = vpop.f32.mrf.mxu1 }
 0x111   :  { %v776_v35 = vmax.f32 %v760_v31, 0.0  ;;  %v671_v36 = vadd.f32 %v980_v32, %v916_v29  ;;  %v918_v37 = vpop.f32.mrf.mxu0 }
 0x112   :  { %v919_v38 = vadd.f32 %v918_v37, %v917_v33  ;;  %v982_v39 = vpop.f32.mrf.mxu1 }
 0x113   :  { %792 = vst [vmem:[%s1360_s3 + $0x48] sm:$0xff] %v776_v35  ;;  %v761_v40 = vadd.f32 %v1291_v7, %v671_v36  ;;  %v983_v41 = vadd.f32 %v982_v39, %v981_v34  ;;  %v920_v42 = vpop.f32.mrf.mxu0 }
 0x114   :  { %v984_v43 = vpop.f32.mrf.mxu1 }
 0x115   :  { %v777_v44 = vmax.f32 %v761_v40, 0.0  ;;  %v674_v45 = vadd.f32 %v983_v41, %v919_v38  ;;  %v921_v46 = vpop.f32.mrf.mxu0 }
 0x116   :  { %v922_v47 = vadd.f32 %v921_v46, %v920_v42  ;;  %v985_v48 = vpop.f32.mrf.mxu1 }
 0x117   :  { %793 = vst [vmem:[%s1360_s3 + $0x50] sm:$0xff] %v777_v44  ;;  %v762_v49 = vadd.f32 %v1291_v7, %v674_v45  ;;  %v986_v50 = vadd.f32 %v985_v48, %v984_v43  ;;  %v923_v51 = vpop.f32.mrf.mxu0 }
 0x118   :  { %v987_v52 = vpop.f32.mrf.mxu1 }
 0x119   :  { %v778_v53 = vmax.f32 %v762_v49, 0.0  ;;  %v679_v54 = vadd.f32 %v986_v50, %v922_v47  ;;  %v924_v55 = vpop.f32.mrf.mxu0 }
 0x11a   :  { %v925_v56 = vadd.f32 %v924_v55, %v923_v51  ;;  %v988_v57 = vpop.f32.mrf.mxu1 }
 0x11b   :  { %794 = vst [vmem:[%s1360_s3 + $0x58] sm:$0xff] %v778_v53  ;;  %v763_v58 = vadd.f32 %v1291_v7, %v679_v54  ;;  %v989_v59 = vadd.f32 %v988_v57, %v987_v52  ;;  %v926_v60 = vpop.f32.mrf.mxu0 }
 0x11c   :  { %v990_v61 = vpop.f32.mrf.mxu1 }
 0x11d   :  { %v779_v62 = vmax.f32 %v763_v58, 0.0  ;;  %v682_v63 = vadd.f32 %v989_v59, %v925_v56  ;;  %v927_v0 = vpop.f32.mrf.mxu0 }
 0x11e   :  { %v928_v1 = vadd.f32 %v927_v0, %v926_v60  ;;  %v991_v2 = vpop.f32.mrf.mxu1 }
 0x11f   :  { %795 = vst [vmem:[%s1360_s3 + $0x60] sm:$0xff] %v779_v62  ;;  %v764_v3 = vadd.f32 %v1291_v7, %v682_v63  ;;  %v992_v4 = vadd.f32 %v991_v2, %v990_v61  ;;  %v929_v5 = vpop.f32.mrf.mxu0 }
 0x120   :  { %v993_v6 = vpop.f32.mrf.mxu1 }
 0x121   :  { %v780_v8 = vmax.f32 %v764_v3, 0.0  ;;  %v687_v9 = vadd.f32 %v992_v4, %v928_v1  ;;  %v930_v10 = vpop.f32.mrf.mxu0 }
 0x122   :  { %v931_v11 = vadd.f32 %v930_v10, %v929_v5  ;;  %v994_v12 = vpop.f32.mrf.mxu1 }
 0x123   :  { %796 = vst [vmem:[%s1360_s3 + $0x68] sm:$0xff] %v780_v8  ;;  %v765_v13 = vadd.f32 %v1291_v7, %v687_v9  ;;  %v995_v14 = vadd.f32 %v994_v12, %v993_v6 }
 0x125   :  { %v781_v15 = vmax.f32 %v765_v13, 0.0  ;;  %v690_v16 = vadd.f32 %v995_v14, %v931_v11 }
 0x127   :  { %797 = vst [vmem:[%s1360_s3 + $0x70] sm:$0xff] %v781_v15  ;;  %v766_v17 = vadd.f32 %v1291_v7, %v690_v16 }
 0x129   :  { %v782_v18 = vmax.f32 %v766_v17, 0.0 }
 0x12b   :  { %798 = vst [vmem:[%s1360_s3 + $0x78] sm:$0xff] %v782_v18 }

// kernel: model_forward.38
= control target key start
LH: loop header
LB: loop body
LE: loop exit
PB: predicated region body
PF: predicated region fallthrough
CT: control target
= control target key end

     0   :  { %s804_s1 = inlined_call_operand.vmem [shape: bf16[256,128], index: 1, kind: input, shape index: {}]   ;;  %s805_s0 = inlined_call_operand.vmem [shape: bf16[128,256], index: 0, kind: input, shape index: {}]   ;;  %s806_s2 = inlined_call_operand.vmem [shape: f32[1,128], index: 2, kind: input, shape index: {}]   ;;  %s807_s3 = inlined_call_operand.vmem [shape: f32[128,128], index: 3, kind: output, shape index: {}]  }
   0x1   :  { %v579_v0 = vld [vmem:[%s804_s1 + $0x78] sm:$0xff]   ;;  %v581_v2 = vld [vmem:[%s804_s1 + $0x70] sm:$0xff]   ;;  %v583_v4 = vld [vmem:[%s804_s1 + $0x68] sm:$0xff]  }
   0x2   :  { %v580_v1 = vld [vmem:[%s804_s1 + $0x38] sm:$0xff]   ;;  %499 = vmatprep.subr.bf16.mxu0 %v579_v0  ;;  %563 = vmatprep.subr.bf16.mxu1 %v579_v0  ;;  %v582_v3 = vld [vmem:[%s804_s1 + $0x30] sm:$0xff]   ;;  %v584_v5 = vld [vmem:[%s804_s1 + $0x28] sm:$0xff]  }
   0x3   :  { %500 = vmatpush3.bf16.msra.mxu0 %v580_v1  ;;  %571 = vmatpush3.bf16.msra.mxu1 %v580_v1  ;;  %v585_v6 = vld [vmem:[%s804_s1 + $0x60] sm:$0xff]   ;;  %v587_v8 = vld [vmem:[%s804_s1 + $0x58] sm:$0xff]   ;;  %v589_v10 = vld [vmem:[%s804_s1 + $0x50] sm:$0xff]  }
   0x4   :  { %501 = vmatprep.subr.bf16.mxu0 %v581_v2  ;;  %564 = vmatprep.subr.bf16.mxu1 %v581_v2  ;;  %v586_v7 = vld [vmem:[%s804_s1 + $0x20] sm:$0xff]   ;;  %v588_v9 = vld [vmem:[%s804_s1 + $0x18] sm:$0xff]   ;;  %v590_v13 = vld [vmem:[%s804_s1 + $0x10] sm:$0xff]  }
   0x5   :  { %v597_v11 = vld [vmem:[%s805_s0 + $0x4] ss:$8 sps:$4 sm:$0xff]   ;;  %v595_v18 = vld [vmem:[%s805_s0] ss:$8 sps:$4 sm:$0xff]   ;;  %v601_v20 = vld [vmem:[%s805_s0 + $0x14] ss:$8 sps:$4 sm:$0xff]  }
   0x6   :  { %v600_v12 = vld [vmem:[%s805_s0 + $0x44] ss:$8 sps:$4 sm:$0xff]   ;;  %307 = vmatprep.mubr.bf16.mxu0 %v597_v11  ;;  %v598_v19 = vld [vmem:[%s805_s0 + $0x40] ss:$8 sps:$4 sm:$0xff]   ;;  %v603_v21 = vld [vmem:[%s805_s0 + $0x54] ss:$8 sps:$4 sm:$0xff]  }
   0x7   :  { %502 = vmatpush3.bf16.msra.mxu0 %v582_v3  ;;  %572 = vmatpush3.bf16.msra.mxu1 %v582_v3  ;;  %v591_v14 = vld [vmem:[%s804_s1 + $0x48] sm:$0xff]   ;;  %v593_v16 = vld [vmem:[%s804_s1 + $0x40] sm:$0xff]   ;;  %v605_v22 = vld [vmem:[%s805_s0 + $0x10] ss:$8 sps:$4 sm:$0xff]  }
   0x8   :  { %503 = vmatprep.subr.bf16.mxu0 %v583_v4  ;;  %565 = vmatprep.subr.bf16.mxu1 %v583_v4  ;;  %v592_v15 = vld [vmem:[%s804_s1 + $0x8] sm:$0xff]   ;;  %v594_v17 = vld [vmem:[%s804_s1] sm:$0xff]   ;;  %v606_v23 = vld [vmem:[%s805_s0 + $0x50] ss:$8 sps:$4 sm:$0xff]  }
   0x9   :  { %339 = vmatprep.mubr.bf16.mxu1 %v600_v12  ;;  %v607_v24 = vld [vmem:[%s805_s0 + $0x24] ss:$8 sps:$4 sm:$0xff]   ;;  %v611_v26 = vld [vmem:[%s805_s0 + $0x20] ss:$8 sps:$4 sm:$0xff]   ;;  %v613_v28 = vld [vmem:[%s805_s0 + $0x34] ss:$8 sps:$4 sm:$0xff]  }
   0xa   :  { %v609_v25 = vld [vmem:[%s805_s0 + $0x64] ss:$8 sps:$4 sm:$0xff]   ;;  %v612_v27 = vld [vmem:[%s805_s0 + $0x60] ss:$8 sps:$4 sm:$0xff]   ;;  %v615_v29 = vld [vmem:[%s805_s0 + $0x74] ss:$8 sps:$4 sm:$0xff]  }
   0xb   :  { %504 = vmatpush3.bf16.msra.mxu0 %v584_v5  ;;  %573 = vmatpush3.bf16.msra.mxu1 %v584_v5  ;;  %v617_v30 = vld [vmem:[%s805_s0 + $0x30] ss:$8 sps:$4 sm:$0xff]   ;;  %v738_v35 = vld [vmem:[%s806_s2] ss:$0 sm:$0xff] }
   0xc   :  { %505 = vmatprep.subr.bf16.mxu0 %v585_v6  ;;  %566 = vmatprep.subr.bf16.mxu1 %v585_v6  ;;  %v618_v31 = vld [vmem:[%s805_s0 + $0x70] ss:$8 sps:$4 sm:$0xff]  }
   0xf   :  { %506 = vmatpush3.bf16.msra.mxu0 %v586_v7  ;;  %574 = vmatpush3.bf16.msra.mxu1 %v586_v7 }
  0x10   :  { %507 = vmatprep.subr.bf16.mxu0 %v587_v8  ;;  %567 = vmatprep.subr.bf16.mxu1 %v587_v8 }
  0x13   :  { %508 = vmatpush3.bf16.msra.mxu0 %v588_v9  ;;  %575 = vmatpush3.bf16.msra.mxu1 %v588_v9 }
  0x14   :  { %509 = vmatprep.subr.bf16.mxu0 %v589_v10  ;;  %568 = vmatprep.subr.bf16.mxu1 %v589_v10 }
  0x17   :  { %510 = vmatpush3.bf16.msra.mxu0 %v590_v13  ;;  %576 = vmatpush3.bf16.msra.mxu1 %v590_v13 }
  0x18   :  { %511 = vmatprep.subr.bf16.mxu0 %v591_v14  ;;  %569 = vmatprep.subr.bf16.mxu1 %v591_v14 }
  0x1b   :  { %512 = vmatpush3.bf16.msra.mxu0 %v592_v15  ;;  %577 = vmatpush3.bf16.msra.mxu1 %v592_v15 }
  0x1c   :  { %513 = vmatprep.subr.bf16.mxu0 %v593_v16  ;;  %570 = vmatprep.subr.bf16.mxu1 %v593_v16 }
  0x1f   :  { %514 = vmatpush3.bf16.msra.mxu0 %v594_v17  ;;  %578 = vmatpush3.bf16.msra.mxu1 %v594_v17 }
  0x22   :  { %308 = vmatmul.mubr.bf16.vlgmr.msra.gmra.mxu0 %v595_v18  ;;  %340 = vmatmul.mubr.bf16.vlgmr.msra.gmra.mxu1 %v598_v19 }
  0x23   :  { %315 = vmatprep.mubr.bf16.mxu0 %v601_v20  ;;  %347 = vmatprep.mubr.bf16.mxu1 %v603_v21 }
  0x2a   :  { %316 = vmatmul.mubr.bf16.gmra.mxu0 %v605_v22  ;;  %348 = vmatmul.mubr.bf16.gmra.mxu1 %v606_v23 }
  0x2b   :  { %323 = vmatprep.mubr.bf16.mxu0 %v607_v24  ;;  %355 = vmatprep.mubr.bf16.mxu1 %v609_v25 }
  0x32   :  { %324 = vmatmul.mubr.bf16.gmra.mxu0 %v611_v26  ;;  %356 = vmatmul.mubr.bf16.gmra.mxu1 %v612_v27 }
  0x33   :  { %331 = vmatprep.mubr.bf16.mxu0 %v613_v28  ;;  %363 = vmatprep.mubr.bf16.mxu1 %v615_v29 }
  0x3a   :  { %332 = vmatmul.mubr.bf16.gmra.mxu0 %v617_v30  ;;  %364 = vmatmul.mubr.bf16.gmra.mxu1 %v618_v31 }
  0xe2   :  { %v515_v32 = vpop.f32.mrf.mxu0  ;;  %v539_v33 = vpop.f32.mrf.mxu1 }
  0xe4   :  { %v516_v34 = vpop.f32.mrf.mxu0  ;;  %v540_v36 = vpop.f32.mrf.mxu1 }
  0xe5   :  { %v517_v37 = vadd.f32 %v516_v34, %v515_v32  ;;  %v541_v38 = vadd.f32 %v540_v36, %v539_v33 }
  0xe6   :  { %v518_v39 = vpop.f32.mrf.mxu0  ;;  %v542_v40 = vpop.f32.mrf.mxu1 }
  0xe7   :  { %v430_v41 = vadd.f32 %v517_v37, %v738_v35  ;;  %v438_v42 = vadd.f32 %v541_v38, %v738_v35 }
  0xe8   :  { %v519_v43 = vpop.f32.mrf.mxu0  ;;  %v543_v44 = vpop.f32.mrf.mxu1 }
  0xe9   :  { %446 = vst [vmem:[%s807_s3] sm:$0xff] %v430_v41  ;;  %454 = vst [vmem:[%s807_s3 + $0x40] sm:$0xff] %v438_v42  ;;  %v520_v45 = vadd.f32 %v519_v43, %v518_v39  ;;  %v544_v46 = vadd.f32 %v543_v44, %v542_v40 }
  0xea   :  { %v521_v47 = vpop.f32.mrf.mxu0  ;;  %v545_v48 = vpop.f32.mrf.mxu1 }
  0xeb   :  { %v431_v49 = vadd.f32 %v520_v45, %v738_v35  ;;  %v439_v50 = vadd.f32 %v544_v46, %v738_v35 }
  0xec   :  { %v522_v51 = vpop.f32.mrf.mxu0  ;;  %v546_v52 = vpop.f32.mrf.mxu1 }
  0xed   :  { %447 = vst [vmem:[%s807_s3 + $0x8] sm:$0xff] %v431_v49  ;;  %455 = vst [vmem:[%s807_s3 + $0x48] sm:$0xff] %v439_v50  ;;  %v523_v53 = vadd.f32 %v522_v51, %v521_v47  ;;  %v547_v54 = vadd.f32 %v546_v52, %v545_v48 }
  0xee   :  { %v524_v55 = vpop.f32.mrf.mxu0  ;;  %v548_v56 = vpop.f32.mrf.mxu1 }
  0xef   :  { %v432_v57 = vadd.f32 %v523_v53, %v738_v35  ;;  %v440_v58 = vadd.f32 %v547_v54, %v738_v35 }
  0xf0   :  { %v525_v59 = vpop.f32.mrf.mxu0  ;;  %v549_v60 = vpop.f32.mrf.mxu1 }
  0xf1   :  { %448 = vst [vmem:[%s807_s3 + $0x10] sm:$0xff] %v432_v57  ;;  %456 = vst [vmem:[%s807_s3 + $0x50] sm:$0xff] %v440_v58  ;;  %v526_v61 = vadd.f32 %v525_v59, %v524_v55  ;;  %v550_v62 = vadd.f32 %v549_v60, %v548_v56 }
  0xf2   :  { %v527_v63 = vpop.f32.mrf.mxu0  ;;  %v551_v0 = vpop.f32.mrf.mxu1 }
  0xf3   :  { %v433_v1 = vadd.f32 %v526_v61, %v738_v35  ;;  %v441_v2 = vadd.f32 %v550_v62, %v738_v35 }
  0xf4   :  { %v528_v3 = vpop.f32.mrf.mxu0  ;;  %v552_v4 = vpop.f32.mrf.mxu1 }
  0xf5   :  { %449 = vst [vmem:[%s807_s3 + $0x18] sm:$0xff] %v433_v1  ;;  %457 = vst [vmem:[%s807_s3 + $0x58] sm:$0xff] %v441_v2  ;;  %v529_v5 = vadd.f32 %v528_v3, %v527_v63  ;;  %v553_v6 = vadd.f32 %v552_v4, %v551_v0 }
  0xf6   :  { %v530_v7 = vpop.f32.mrf.mxu0  ;;  %v554_v8 = vpop.f32.mrf.mxu1 }
  0xf7   :  { %v434_v9 = vadd.f32 %v529_v5, %v738_v35  ;;  %v442_v10 = vadd.f32 %v553_v6, %v738_v35 }
  0xf8   :  { %v531_v11 = vpop.f32.mrf.mxu0  ;;  %v555_v12 = vpop.f32.mrf.mxu1 }
  0xf9   :  { %450 = vst [vmem:[%s807_s3 + $0x20] sm:$0xff] %v434_v9  ;;  %458 = vst [vmem:[%s807_s3 + $0x60] sm:$0xff] %v442_v10  ;;  %v532_v13 = vadd.f32 %v531_v11, %v530_v7  ;;  %v556_v14 = vadd.f32 %v555_v12, %v554_v8 }
  0xfa   :  { %v533_v15 = vpop.f32.mrf.mxu0  ;;  %v557_v16 = vpop.f32.mrf.mxu1 }
  0xfb   :  { %v435_v17 = vadd.f32 %v532_v13, %v738_v35  ;;  %v443_v18 = vadd.f32 %v556_v14, %v738_v35 }
  0xfc   :  { %v534_v19 = vpop.f32.mrf.mxu0  ;;  %v558_v20 = vpop.f32.mrf.mxu1 }
  0xfd   :  { %451 = vst [vmem:[%s807_s3 + $0x28] sm:$0xff] %v435_v17  ;;  %459 = vst [vmem:[%s807_s3 + $0x68] sm:$0xff] %v443_v18  ;;  %v535_v21 = vadd.f32 %v534_v19, %v533_v15  ;;  %v559_v22 = vadd.f32 %v558_v20, %v557_v16 }
  0xfe   :  { %v536_v23 = vpop.f32.mrf.mxu0  ;;  %v560_v24 = vpop.f32.mrf.mxu1 }
  0xff   :  { %v436_v25 = vadd.f32 %v535_v21, %v738_v35  ;;  %v444_v26 = vadd.f32 %v559_v22, %v738_v35 }
 0x100   :  { %v537_v27 = vpop.f32.mrf.mxu0  ;;  %v561_v28 = vpop.f32.mrf.mxu1 }
 0x101   :  { %452 = vst [vmem:[%s807_s3 + $0x30] sm:$0xff] %v436_v25  ;;  %460 = vst [vmem:[%s807_s3 + $0x70] sm:$0xff] %v444_v26  ;;  %v538_v29 = vadd.f32 %v537_v27, %v536_v23  ;;  %v562_v30 = vadd.f32 %v561_v28, %v560_v24 }
 0x103   :  { %v437_v31 = vadd.f32 %v538_v29, %v738_v35  ;;  %v445_v32 = vadd.f32 %v562_v30, %v738_v35 }
 0x105   :  { %453 = vst [vmem:[%s807_s3 + $0x38] sm:$0xff] %v437_v31  ;;  %461 = vst [vmem:[%s807_s3 + $0x78] sm:$0xff] %v445_v32 }

</bundles_post_ra>
